<compile_context>
chip_gen: v6e
topology: v6e:2x2x1
jax: 0.10.0
libtpu: 0.0.40
codegen_flags: <defaults>
</compile_context>

<pallas_src>
import jax
import jax.numpy as jnp
from jax.experimental import pallas as pl
from jax.experimental.pallas import tpu as pltpu

# Model hyper-parameters (nn.TransformerEncoderLayer defaults where not set).
EMBED_DIM = 64
NUM_HEADS = 4
NUM_LAYERS = 2
FF_DIM = 2048          # default dim_feedforward
NUM_CLASSES = 2
OUT_PAD = 128          # lane-dense classifier width (sliced to NUM_CLASSES outside)
LN_EPS = 1e-5


def _layernorm(v, gamma, beta):
    mu = jnp.mean(v, axis=-1, keepdims=True)
    var = jnp.mean((v - mu) ** 2, axis=-1, keepdims=True)
    return (v - mu) * jax.lax.rsqrt(var + LN_EPS) * gamma + beta


def transformer_kernel(
    h0_ref,      # (1, S, D)     f32   embedded tokens for this batch element
    wqkv_ref,    # (L, D, 3D)    bf16  fused [Q|K|V] weights, 1/sqrt(Dh) folded into Q
    bqkv_ref,    # (L, 1, 3D)    f32   fused bias (Q part scaled)
    wo_ref,      # (L, D, D)     bf16  out_proj weight (pre-transposed)
    ob_ref,      # (L, 1, D)     f32
    ln1g_ref,    # (L, 1, D)     f32
    ln1b_ref,    # (L, 1, D)     f32
    w1_ref,      # (L, D, FF)    bf16  FFN linear1 (pre-transposed)
    b1_ref,      # (L, 1, FF)    f32
    w2_ref,      # (L, FF, D)    bf16  FFN linear2 (pre-transposed)
    b2_ref,      # (L, 1, D)     f32
    ln2g_ref,    # (L, 1, D)     f32
    ln2b_ref,    # (L, 1, D)     f32
    wc_ref,      # (D, OUT_PAD)  bf16  classifier, zero-padded to 128 lanes
    bc_ref,      # (1, OUT_PAD)  f32
    out_ref,     # (1, 1, OUT_PAD) f32
):
    S = h0_ref.shape[1]
    L, D, _ = wqkv_ref.shape
    H = NUM_HEADS
    Dh = D // H
    f32, bf16 = jnp.float32, jnp.bfloat16

    h = h0_ref[0]                                                    # (S, D) f32

    for l in range(L):                                               # L=2, static unroll
        # ---- multi-head self-attention (eval mode: no dropout) ----
        hb = h.astype(bf16)
        # Fused QKV: one lane-dense (S,D)@(D,3D) MXU matmul + one 192-wide bias add.
        qkv = jnp.dot(hb, wqkv_ref[l], preferred_element_type=f32) + bqkv_ref[l]  # (S, 3D)
        qkv_b = qkv.astype(bf16)

        # Per-head scores/softmax/PV (inherently K=Dh work); contexts are
        # lane-concatenated so out_proj runs as a single full-K matmul.
        ctx_heads = []
        for hh in range(H):
            qh = qkv_b[:, hh * Dh:(hh + 1) * Dh]                      # (S, Dh)
            kh = qkv_b[:, D + hh * Dh:D + (hh + 1) * Dh]              # (S, Dh)
            vh = qkv_b[:, 2 * D + hh * Dh:2 * D + (hh + 1) * Dh]      # (S, Dh)
            s = jnp.einsum('qe,ke->qk', qh, kh,
                           preferred_element_type=f32)                # (S, S)
            s = s - jnp.max(s, axis=-1, keepdims=True)
            p = jnp.exp(s)
            p = p * pl.reciprocal(jnp.sum(p, axis=-1, keepdims=True), approx=True)
            ctx_heads.append(jnp.dot(p.astype(bf16), vh,
                                     preferred_element_type=f32))     # (S, Dh)
        ctx = jnp.concatenate(ctx_heads, axis=-1).astype(bf16)        # (S, D)

        attn = jnp.dot(ctx, wo_ref[l], preferred_element_type=f32) + ob_ref[l]   # (S, D)
        h = _layernorm(h + attn, ln1g_ref[l], ln1b_ref[l])            # post-norm, f32

        # ---- feed-forward ----
        ff = jnp.dot(h.astype(bf16), w1_ref[l],
                     preferred_element_type=f32) + b1_ref[l]          # (S, FF) f32
        ff = jnp.maximum(ff, 0.0).astype(bf16)                        # ReLU, store bf16
        ff = jnp.dot(ff, w2_ref[l], preferred_element_type=f32) + b2_ref[l]       # (S, D)

        h = _layernorm(h + ff, ln2g_ref[l], ln2b_ref[l])

    # ---- mean-pool over the sequence + classifier (lane-dense 128-wide store) ----
    pooled = jnp.mean(h, axis=0, keepdims=True)                       # (1, D)
    logits = jnp.dot(pooled.astype(bf16), wc_ref[...],
                     preferred_element_type=f32) + bc_ref[...]        # (1, OUT_PAD)
    out_ref[0] = logits


# ----------------------------------------------------------------------------
# Parameters (PyTorch layout) and conversion to the kernel layout.
# ----------------------------------------------------------------------------
def init_torch_style_params(key, embed_dim=EMBED_DIM, num_layers=NUM_LAYERS,
                            ff_dim=FF_DIM, num_classes=NUM_CLASSES):
    D, L, FF, C = embed_dim, num_layers, ff_dim, num_classes
    keys = jax.random.split(key, L + 2)
    std = 0.02

    def normal(k, shape, s=std):
        return jax.random.normal(k, shape, jnp.float32) * s

    layers = []
    for l in range(L):
        k = jax.random.split(keys[l], 8)
        layers.append(dict(
            in_proj_weight=normal(k[0], (3 * D, D)),
            in_proj_bias=normal(k[1], (3 * D,), 0.01),
            out_proj_weight=normal(k[2], (D, D)),
            out_proj_bias=normal(k[3], (D,), 0.01),
            linear1_weight=normal(k[4], (FF, D)),
            linear1_bias=normal(k[5], (FF,), 0.01),
            linear2_weight=normal(k[6], (D, FF)),
            linear2_bias=normal(k[7], (D,), 0.01),
            norm1_weight=jnp.ones((D,), jnp.float32),
            norm1_bias=jnp.zeros((D,), jnp.float32),
            norm2_weight=jnp.ones((D,), jnp.float32),
            norm2_bias=jnp.zeros((D,), jnp.float32),
        ))
    ke = jax.random.split(keys[-1], 4)
    return dict(
        embedding_weight=normal(ke[0], (D, 1)),
        embedding_bias=normal(ke[1], (D,), 0.01),
        layers=layers,
        classifier_weight=normal(ke[2], (C, D)),
        classifier_bias=normal(ke[3], (C,), 0.01),
    )


def prepare_kernel_params(params):
    """PyTorch-layout -> kernel layout: fused bf16 QKV (scale folded into Q),
    pre-transposed bf16 out_proj / FFN weights, padded bf16 classifier."""
    D, H, FF, C = EMBED_DIM, NUM_HEADS, FF_DIM, NUM_CLASSES
    Dh = D // H
    scale = 1.0 / (Dh ** 0.5)
    bf16 = jnp.bfloat16

    cols = {n: [] for n in ("wqkv", "bqkv", "wo", "ob", "ln1g", "ln1b",
                            "w1", "b1", "w2", "b2", "ln2g", "ln2b")}
    # Scale vector folding 1/sqrt(Dh) into the Q third of the fused projection.
    sc = jnp.concatenate([jnp.full((D,), scale, jnp.float32),
                          jnp.ones((2 * D,), jnp.float32)])
    for lyr in params["layers"]:
        inw, inb = lyr["in_proj_weight"], lyr["in_proj_bias"]          # (3D, D), (3D,)
        cols["wqkv"].append((inw * sc[:, None]).T)                     # (D, 3D) cols = q|k|v
        cols["bqkv"].append((inb * sc).reshape(1, 3 * D))
        cols["wo"].append(lyr["out_proj_weight"].T)                    # (D, D)
        cols["ob"].append(lyr["out_proj_bias"].reshape(1, D))
        cols["ln1g"].append(lyr["norm1_weight"].reshape(1, D))
        cols["ln1b"].append(lyr["norm1_bias"].reshape(1, D))
        cols["w1"].append(lyr["linear1_weight"].T)                     # (D, FF)
        cols["b1"].append(lyr["linear1_bias"].reshape(1, FF))
        cols["w2"].append(lyr["linear2_weight"].T)                     # (FF, D)
        cols["b2"].append(lyr["linear2_bias"].reshape(1, D))
        cols["ln2g"].append(lyr["norm2_weight"].reshape(1, D))
        cols["ln2b"].append(lyr["norm2_bias"].reshape(1, D))

    st = {n: jnp.stack(v, axis=0) for n, v in cols.items()}
    wc = jnp.zeros((D, OUT_PAD), jnp.float32).at[:, :C].set(params["classifier_weight"].T)
    bc = jnp.zeros((1, OUT_PAD), jnp.float32).at[:, :C].set(params["classifier_bias"][None, :])

    return (
        params["embedding_weight"].reshape(1, EMBED_DIM),   # used in the wrapper
        params["embedding_bias"].reshape(1, EMBED_DIM),
        st["wqkv"].astype(bf16), st["bqkv"],
        st["wo"].astype(bf16), st["ob"],
        st["ln1g"], st["ln1b"],
        st["w1"].astype(bf16), st["b1"],
        st["w2"].astype(bf16), st["b2"],
        st["ln2g"], st["ln2b"],
        wc.astype(bf16), bc,
    )


# ----------------------------------------------------------------------------
# Wrapper: embedding in XLA, then a batch-parallel Pallas grid.
# ----------------------------------------------------------------------------
@jax.jit
def transformer_classifier(x, flat_params):
    B, S = x.shape
    D, FF, H, L = EMBED_DIM, FF_DIM, NUM_HEADS, NUM_LAYERS
    Dh = D // H
    N = B * S

    we, be = flat_params[0], flat_params[1]
    kparams = flat_params[2:]

    # Embedding Linear(1, D): trivial scalar-affine, fused by XLA outside the kernel
    # (avoids an (N,1) lane-width-1 operand in the kernel).
    h0 = x[..., None] * we.reshape(1, 1, D) + be.reshape(1, 1, D)      # (B, S, D) f32

    flops = int(
        L * (2 * N * D * 3 * D                  # fused QKV projection
             + 2 * 2 * H * N * S * Dh           # scores + PV (per-example S keys)
             + 2 * N * D * D                    # out_proj
             + 2 * 2 * N * D * FF)              # FFN
        + 2 * B * D * OUT_PAD)                  # classifier
    transcendentals = int(L * (H * N * S + 4 * N) + N)
    param_bytes = int(sum(int(a.size) * a.dtype.itemsize for a in kparams))
    bytes_accessed = int(param_bytes + 4 * N * D + 4 * B * OUT_PAD)

    # Explicit scoped-VMEM limit from the resident footprint (+ headroom),
    # capped below v7x's 64 MiB physical VMEM.
    vmem_limit = int(min(max(2 * param_bytes + (8 << 20), 16 << 20), 64 << 20))

    out = pl.pallas_call(
        transformer_kernel,
        out_shape=jax.ShapeDtypeStruct((B, 1, OUT_PAD), jnp.float32),
        grid=(B,),
        in_specs=[pl.BlockSpec((1, S, D), lambda b: (b, 0, 0))]
                 + [pl.BlockSpec(memory_space=pltpu.MemorySpace.VMEM)] * len(kparams),
        out_specs=pl.BlockSpec((1, 1, OUT_PAD), lambda b: (b, 0, 0)),
        compiler_params=pltpu.CompilerParams(
            dimension_semantics=("parallel",),
            vmem_limit_bytes=vmem_limit),
        cost_estimate=pl.CostEstimate(flops=flops,
                                      transcendentals=transcendentals,
                                      bytes_accessed=bytes_accessed),
    )(h0, *kparams)
    return out.reshape(B, OUT_PAD)[:, :NUM_CLASSES]


# ----------------------------------------------------------------------------
# Pure-JAX reference (f32) for a numerical sanity check.
# ----------------------------------------------------------------------------
def reference_forward(x, params):
    D, H = EMBED_DIM, NUM_HEADS
    Dh = D // H
    scale = 1.0 / (Dh ** 0.5)
    B, S = x.shape
    h = x[..., None] * params["embedding_weight"].reshape(1, 1, D) + params["embedding_bias"]
    for lyr in params["layers"]:
        qkv = h @ lyr["in_proj_weight"].T + lyr["in_proj_bias"]
        q, k, v = qkv[..., :D], qkv[..., D:2 * D], qkv[..., 2 * D:]
        heads = lambda t: t.reshape(B, S, H, Dh).transpose(0, 2, 1, 3)
        qh, kh, vh = heads(q) * scale, heads(k), heads(v)
        s = jnp.einsum('bhqd,bhkd->bhqk', qh, kh)
        p = jax.nn.softmax(s, axis=-1)
        ctx = jnp.einsum('bhqk,bhkd->bhqd', p, vh).transpose(0, 2, 1, 3).reshape(B, S, D)
        attn = ctx @ lyr["out_proj_weight"].T + lyr["out_proj_bias"]
        h = _layernorm(h + attn, lyr["norm1_weight"], lyr["norm1_bias"])
        ff = jnp.maximum(h @ lyr["linear1_weight"].T + lyr["linear1_bias"], 0.0)
        ff = ff @ lyr["linear2_weight"].T + lyr["linear2_bias"]
        h = _layernorm(h + ff, lyr["norm2_weight"], lyr["norm2_bias"])
    pooled = h.mean(axis=1)
    return pooled @ params["classifier_weight"].T + params["classifier_bias"]


if __name__ == "__main__":
    key = jax.random.PRNGKey(0)
    k_x, k_p = jax.random.split(key)

    # Small shapes consistent with the module: batch=2, sequence length=8.
    # (For performance measurements, B*S should be raised to a few hundred rows.)
    B, S = 2, 8
    x = jax.random.normal(k_x, (B, S), jnp.float32)
    torch_params = init_torch_style_params(k_p)
    flat = prepare_kernel_params(torch_params)

    logits = transformer_classifier(x, flat)
    logits = jax.block_until_ready(logits)

    assert logits.shape == (B, NUM_CLASSES)
    assert bool(jnp.all(jnp.isfinite(logits)))

    ref = reference_forward(x, torch_params)
    max_err = float(jnp.max(jnp.abs(logits - ref)))
    assert max_err < 5e-2, f"kernel vs reference mismatch: {max_err}"

    print("KERNEL_OK")
</pallas_src>

<mosaic_0001>
module attributes {stable_mosaic.version = 11 : i64} {
  func.func @transformer_kernel(%arg0: i32, %arg1: memref<1x8x64xf32, #tpu.memory_space<vmem>>, %arg2: memref<2x64x192xbf16, #tpu.memory_space<vmem>>, %arg3: memref<2x1x192xf32, #tpu.memory_space<vmem>>, %arg4: memref<2x64x64xbf16, #tpu.memory_space<vmem>>, %arg5: memref<2x1x64xf32, #tpu.memory_space<vmem>>, %arg6: memref<2x1x64xf32, #tpu.memory_space<vmem>>, %arg7: memref<2x1x64xf32, #tpu.memory_space<vmem>>, %arg8: memref<2x64x2048xbf16, #tpu.memory_space<vmem>>, %arg9: memref<2x1x2048xf32, #tpu.memory_space<vmem>>, %arg10: memref<2x2048x64xbf16, #tpu.memory_space<vmem>>, %arg11: memref<2x1x64xf32, #tpu.memory_space<vmem>>, %arg12: memref<2x1x64xf32, #tpu.memory_space<vmem>>, %arg13: memref<2x1x64xf32, #tpu.memory_space<vmem>>, %arg14: memref<64x128xbf16, #tpu.memory_space<vmem>>, %arg15: memref<1x128xf32, #tpu.memory_space<vmem>>, %arg16: memref<1x1x128xf32, #tpu.memory_space<vmem>>) attributes {dimension_semantics = [#tpu.dimension_semantics<parallel>], iteration_bounds = array<i64: 2>, scalar_prefetch = 0 : i64, scratch_operands = 0 : i64, tpu.core_type = #tpu.core_type<tc>, window_params = [{transform_indices = @transform_0, window_bounds = array<i64: 1, 8, 64>}, {pipeline_mode = #tpu.pipeline_mode<synchronous>, transform_indices = @transform_1, window_bounds = array<i64: 2, 64, 192>}, {pipeline_mode = #tpu.pipeline_mode<synchronous>, transform_indices = @transform_2, window_bounds = array<i64: 2, 1, 192>}, {pipeline_mode = #tpu.pipeline_mode<synchronous>, transform_indices = @transform_3, window_bounds = array<i64: 2, 64, 64>}, {pipeline_mode = #tpu.pipeline_mode<synchronous>, transform_indices = @transform_4, window_bounds = array<i64: 2, 1, 64>}, {pipeline_mode = #tpu.pipeline_mode<synchronous>, transform_indices = @transform_5, window_bounds = array<i64: 2, 1, 64>}, {pipeline_mode = #tpu.pipeline_mode<synchronous>, transform_indices = @transform_6, window_bounds = array<i64: 2, 1, 64>}, {pipeline_mode = #tpu.pipeline_mode<synchronous>, transform_indices = @transform_7, window_bounds = array<i64: 2, 64, 2048>}, {pipeline_mode = #tpu.pipeline_mode<synchronous>, transform_indices = @transform_8, window_bounds = array<i64: 2, 1, 2048>}, {pipeline_mode = #tpu.pipeline_mode<synchronous>, transform_indices = @transform_9, window_bounds = array<i64: 2, 2048, 64>}, {pipeline_mode = #tpu.pipeline_mode<synchronous>, transform_indices = @transform_10, window_bounds = array<i64: 2, 1, 64>}, {pipeline_mode = #tpu.pipeline_mode<synchronous>, transform_indices = @transform_11, window_bounds = array<i64: 2, 1, 64>}, {pipeline_mode = #tpu.pipeline_mode<synchronous>, transform_indices = @transform_12, window_bounds = array<i64: 2, 1, 64>}, {pipeline_mode = #tpu.pipeline_mode<synchronous>, transform_indices = @transform_13, window_bounds = array<i64: 64, 128>}, {pipeline_mode = #tpu.pipeline_mode<synchronous>, transform_indices = @transform_14, window_bounds = array<i64: 1, 128>}, {transform_indices = @transform_15, window_bounds = array<i64: 1, 1, 128>}]} {
    %c0 = arith.constant 0 : index
    %c0_0 = arith.constant 0 : index
    %c0_1 = arith.constant 0 : index
    %0 = vector.load %arg1[%c0, %c0_0, %c0_1] : memref<1x8x64xf32, #tpu.memory_space<vmem>>, vector<1x8x64xf32>
    %1 = vector.shape_cast %0 : vector<1x8x64xf32> to vector<8x64xf32>
    %2 = arith.truncf %1 : vector<8x64xf32> to vector<8x64xbf16>
    %c0_2 = arith.constant 0 : index
    %c0_3 = arith.constant 0 : index
    %c0_4 = arith.constant 0 : index
    %3 = vector.load %arg2[%c0_2, %c0_3, %c0_4] : memref<2x64x192xbf16, #tpu.memory_space<vmem>>, vector<1x64x192xbf16>
    %4 = vector.shape_cast %3 : vector<1x64x192xbf16> to vector<64x192xbf16>
    %cst = arith.constant dense<0.000000e+00> : vector<8x192xf32>
    %5 = tpu.matmul %2, %4, %cst {dimension_numbers = #tpu.dot_dimension_numbers<[1], [0], [0], [1], [0, 0, 1, 1], [], []>} : vector<8x64xbf16>, vector<64x192xbf16>, vector<8x192xf32> -> vector<8x192xf32>
    %c0_5 = arith.constant 0 : index
    %c0_6 = arith.constant 0 : index
    %c0_7 = arith.constant 0 : index
    %6 = vector.load %arg3[%c0_5, %c0_6, %c0_7] : memref<2x1x192xf32, #tpu.memory_space<vmem>>, vector<1x1x192xf32>
    %7 = vector.shape_cast %6 : vector<1x1x192xf32> to vector<1x192xf32>
    %8 = vector.broadcast %7 : vector<1x192xf32> to vector<8x192xf32>
    %9 = arith.addf %5, %8 : vector<8x192xf32>
    %10 = arith.truncf %9 : vector<8x192xf32> to vector<8x192xbf16>
    %11 = vector.extract_strided_slice %10 {offsets = [0, 0], sizes = [8, 16], strides = [1, 1]} : vector<8x192xbf16> to vector<8x16xbf16>
    %12 = vector.extract_strided_slice %10 {offsets = [0, 64], sizes = [8, 16], strides = [1, 1]} : vector<8x192xbf16> to vector<8x16xbf16>
    %13 = vector.extract_strided_slice %10 {offsets = [0, 128], sizes = [8, 16], strides = [1, 1]} : vector<8x192xbf16> to vector<8x16xbf16>
    "tpu.trace_start"() <{level = 10 : i32, message = "qe,ke->qk"}> : () -> ()
    %cst_8 = arith.constant dense<0.000000e+00> : vector<8x8xf32>
    %14 = tpu.matmul %11, %12, %cst_8 {dimension_numbers = #tpu.dot_dimension_numbers<[1], [1], [0], [0], [0, 0, 1, 0], [], []>} : vector<8x16xbf16>, vector<8x16xbf16>, vector<8x8xf32> -> vector<8x8xf32>
    "tpu.trace_stop"() : () -> ()
    %cst_9 = arith.constant dense<0xFF800000> : vector<8xf32>
    %15 = vector.multi_reduction <maximumf>, %14, %cst_9 [1] : vector<8x8xf32> to vector<8xf32>
    %16 = vector.shape_cast %15 : vector<8xf32> to vector<8x1xf32>
    %17 = vector.broadcast %16 : vector<8x1xf32> to vector<8x8xf32>
    %18 = arith.subf %14, %17 : vector<8x8xf32>
    %19 = math.exp %18 : vector<8x8xf32>
    %cst_10 = arith.constant dense<0.000000e+00> : vector<8xf32>
    %20 = vector.multi_reduction <add>, %19, %cst_10 [1] : vector<8x8xf32> to vector<8xf32>
    %21 = vector.shape_cast %20 : vector<8xf32> to vector<8x1xf32>
    %22 = tpu.reciprocal %21 {approx = true} : vector<8x1xf32> -> vector<8x1xf32>
    %23 = vector.broadcast %22 : vector<8x1xf32> to vector<8x8xf32>
    %24 = arith.mulf %19, %23 : vector<8x8xf32>
    %25 = arith.truncf %24 : vector<8x8xf32> to vector<8x8xbf16>
    %cst_11 = arith.constant dense<0.000000e+00> : vector<8x16xf32>
    %26 = tpu.matmul %25, %13, %cst_11 {dimension_numbers = #tpu.dot_dimension_numbers<[1], [0], [0], [1], [0, 0, 1, 1], [], []>} : vector<8x8xbf16>, vector<8x16xbf16>, vector<8x16xf32> -> vector<8x16xf32>
    %27 = vector.extract_strided_slice %10 {offsets = [0, 16], sizes = [8, 16], strides = [1, 1]} : vector<8x192xbf16> to vector<8x16xbf16>
    %28 = vector.extract_strided_slice %10 {offsets = [0, 80], sizes = [8, 16], strides = [1, 1]} : vector<8x192xbf16> to vector<8x16xbf16>
    %29 = vector.extract_strided_slice %10 {offsets = [0, 144], sizes = [8, 16], strides = [1, 1]} : vector<8x192xbf16> to vector<8x16xbf16>
    "tpu.trace_start"() <{level = 10 : i32, message = "qe,ke->qk"}> : () -> ()
    %cst_12 = arith.constant dense<0.000000e+00> : vector<8x8xf32>
    %30 = tpu.matmul %27, %28, %cst_12 {dimension_numbers = #tpu.dot_dimension_numbers<[1], [1], [0], [0], [0, 0, 1, 0], [], []>} : vector<8x16xbf16>, vector<8x16xbf16>, vector<8x8xf32> -> vector<8x8xf32>
    "tpu.trace_stop"() : () -> ()
    %cst_13 = arith.constant dense<0xFF800000> : vector<8xf32>
    %31 = vector.multi_reduction <maximumf>, %30, %cst_13 [1] : vector<8x8xf32> to vector<8xf32>
    %32 = vector.shape_cast %31 : vector<8xf32> to vector<8x1xf32>
    %33 = vector.broadcast %32 : vector<8x1xf32> to vector<8x8xf32>
    %34 = arith.subf %30, %33 : vector<8x8xf32>
    %35 = math.exp %34 : vector<8x8xf32>
    %cst_14 = arith.constant dense<0.000000e+00> : vector<8xf32>
    %36 = vector.multi_reduction <add>, %35, %cst_14 [1] : vector<8x8xf32> to vector<8xf32>
    %37 = vector.shape_cast %36 : vector<8xf32> to vector<8x1xf32>
    %38 = tpu.reciprocal %37 {approx = true} : vector<8x1xf32> -> vector<8x1xf32>
    %39 = vector.broadcast %38 : vector<8x1xf32> to vector<8x8xf32>
    %40 = arith.mulf %35, %39 : vector<8x8xf32>
    %41 = arith.truncf %40 : vector<8x8xf32> to vector<8x8xbf16>
    %cst_15 = arith.constant dense<0.000000e+00> : vector<8x16xf32>
    %42 = tpu.matmul %41, %29, %cst_15 {dimension_numbers = #tpu.dot_dimension_numbers<[1], [0], [0], [1], [0, 0, 1, 1], [], []>} : vector<8x8xbf16>, vector<8x16xbf16>, vector<8x16xf32> -> vector<8x16xf32>
    %43 = vector.extract_strided_slice %10 {offsets = [0, 32], sizes = [8, 16], strides = [1, 1]} : vector<8x192xbf16> to vector<8x16xbf16>
    %44 = vector.extract_strided_slice %10 {offsets = [0, 96], sizes = [8, 16], strides = [1, 1]} : vector<8x192xbf16> to vector<8x16xbf16>
    %45 = vector.extract_strided_slice %10 {offsets = [0, 160], sizes = [8, 16], strides = [1, 1]} : vector<8x192xbf16> to vector<8x16xbf16>
    "tpu.trace_start"() <{level = 10 : i32, message = "qe,ke->qk"}> : () -> ()
    %cst_16 = arith.constant dense<0.000000e+00> : vector<8x8xf32>
    %46 = tpu.matmul %43, %44, %cst_16 {dimension_numbers = #tpu.dot_dimension_numbers<[1], [1], [0], [0], [0, 0, 1, 0], [], []>} : vector<8x16xbf16>, vector<8x16xbf16>, vector<8x8xf32> -> vector<8x8xf32>
    "tpu.trace_stop"() : () -> ()
    %cst_17 = arith.constant dense<0xFF800000> : vector<8xf32>
    %47 = vector.multi_reduction <maximumf>, %46, %cst_17 [1] : vector<8x8xf32> to vector<8xf32>
    %48 = vector.shape_cast %47 : vector<8xf32> to vector<8x1xf32>
    %49 = vector.broadcast %48 : vector<8x1xf32> to vector<8x8xf32>
    %50 = arith.subf %46, %49 : vector<8x8xf32>
    %51 = math.exp %50 : vector<8x8xf32>
    %cst_18 = arith.constant dense<0.000000e+00> : vector<8xf32>
    %52 = vector.multi_reduction <add>, %51, %cst_18 [1] : vector<8x8xf32> to vector<8xf32>
    %53 = vector.shape_cast %52 : vector<8xf32> to vector<8x1xf32>
    %54 = tpu.reciprocal %53 {approx = true} : vector<8x1xf32> -> vector<8x1xf32>
    %55 = vector.broadcast %54 : vector<8x1xf32> to vector<8x8xf32>
    %56 = arith.mulf %51, %55 : vector<8x8xf32>
    %57 = arith.truncf %56 : vector<8x8xf32> to vector<8x8xbf16>
    %cst_19 = arith.constant dense<0.000000e+00> : vector<8x16xf32>
    %58 = tpu.matmul %57, %45, %cst_19 {dimension_numbers = #tpu.dot_dimension_numbers<[1], [0], [0], [1], [0, 0, 1, 1], [], []>} : vector<8x8xbf16>, vector<8x16xbf16>, vector<8x16xf32> -> vector<8x16xf32>
    %59 = vector.extract_strided_slice %10 {offsets = [0, 48], sizes = [8, 16], strides = [1, 1]} : vector<8x192xbf16> to vector<8x16xbf16>
    %60 = vector.extract_strided_slice %10 {offsets = [0, 112], sizes = [8, 16], strides = [1, 1]} : vector<8x192xbf16> to vector<8x16xbf16>
    %61 = vector.extract_strided_slice %10 {offsets = [0, 176], sizes = [8, 16], strides = [1, 1]} : vector<8x192xbf16> to vector<8x16xbf16>
    "tpu.trace_start"() <{level = 10 : i32, message = "qe,ke->qk"}> : () -> ()
    %cst_20 = arith.constant dense<0.000000e+00> : vector<8x8xf32>
    %62 = tpu.matmul %59, %60, %cst_20 {dimension_numbers = #tpu.dot_dimension_numbers<[1], [1], [0], [0], [0, 0, 1, 0], [], []>} : vector<8x16xbf16>, vector<8x16xbf16>, vector<8x8xf32> -> vector<8x8xf32>
    "tpu.trace_stop"() : () -> ()
    %cst_21 = arith.constant dense<0xFF800000> : vector<8xf32>
    %63 = vector.multi_reduction <maximumf>, %62, %cst_21 [1] : vector<8x8xf32> to vector<8xf32>
    %64 = vector.shape_cast %63 : vector<8xf32> to vector<8x1xf32>
    %65 = vector.broadcast %64 : vector<8x1xf32> to vector<8x8xf32>
    %66 = arith.subf %62, %65 : vector<8x8xf32>
    %67 = math.exp %66 : vector<8x8xf32>
    %cst_22 = arith.constant dense<0.000000e+00> : vector<8xf32>
    %68 = vector.multi_reduction <add>, %67, %cst_22 [1] : vector<8x8xf32> to vector<8xf32>
    %69 = vector.shape_cast %68 : vector<8xf32> to vector<8x1xf32>
    %70 = tpu.reciprocal %69 {approx = true} : vector<8x1xf32> -> vector<8x1xf32>
    %71 = vector.broadcast %70 : vector<8x1xf32> to vector<8x8xf32>
    %72 = arith.mulf %67, %71 : vector<8x8xf32>
    %73 = arith.truncf %72 : vector<8x8xf32> to vector<8x8xbf16>
    %cst_23 = arith.constant dense<0.000000e+00> : vector<8x16xf32>
    %74 = tpu.matmul %73, %61, %cst_23 {dimension_numbers = #tpu.dot_dimension_numbers<[1], [0], [0], [1], [0, 0, 1, 1], [], []>} : vector<8x8xbf16>, vector<8x16xbf16>, vector<8x16xf32> -> vector<8x16xf32>
    %75 = tpu.concatenate %26, %42, %58, %74 in 1 : vector<8x16xf32>, vector<8x16xf32>, vector<8x16xf32>, vector<8x16xf32> -> vector<8x64xf32>
    %76 = arith.truncf %75 : vector<8x64xf32> to vector<8x64xbf16>
    %c0_24 = arith.constant 0 : index
    %c0_25 = arith.constant 0 : index
    %c0_26 = arith.constant 0 : index
    %77 = vector.load %arg4[%c0_24, %c0_25, %c0_26] : memref<2x64x64xbf16, #tpu.memory_space<vmem>>, vector<1x64x64xbf16>
    %78 = vector.shape_cast %77 : vector<1x64x64xbf16> to vector<64x64xbf16>
    %cst_27 = arith.constant dense<0.000000e+00> : vector<8x64xf32>
    %79 = tpu.matmul %76, %78, %cst_27 {dimension_numbers = #tpu.dot_dimension_numbers<[1], [0], [0], [1], [0, 0, 1, 1], [], []>} : vector<8x64xbf16>, vector<64x64xbf16>, vector<8x64xf32> -> vector<8x64xf32>
    %c0_28 = arith.constant 0 : index
    %c0_29 = arith.constant 0 : index
    %c0_30 = arith.constant 0 : index
    %80 = vector.load %arg5[%c0_28, %c0_29, %c0_30] : memref<2x1x64xf32, #tpu.memory_space<vmem>>, vector<1x1x64xf32>
    %81 = vector.shape_cast %80 : vector<1x1x64xf32> to vector<1x64xf32>
    %82 = vector.broadcast %81 : vector<1x64xf32> to vector<8x64xf32>
    %83 = arith.addf %79, %82 : vector<8x64xf32>
    %84 = arith.addf %1, %83 : vector<8x64xf32>
    %c0_31 = arith.constant 0 : index
    %c0_32 = arith.constant 0 : index
    %c0_33 = arith.constant 0 : index
    %85 = vector.load %arg6[%c0_31, %c0_32, %c0_33] : memref<2x1x64xf32, #tpu.memory_space<vmem>>, vector<1x1x64xf32>
    %86 = vector.shape_cast %85 : vector<1x1x64xf32> to vector<1x64xf32>
    %c0_34 = arith.constant 0 : index
    %c0_35 = arith.constant 0 : index
    %c0_36 = arith.constant 0 : index
    %87 = vector.load %arg7[%c0_34, %c0_35, %c0_36] : memref<2x1x64xf32, #tpu.memory_space<vmem>>, vector<1x1x64xf32>
    %88 = vector.shape_cast %87 : vector<1x1x64xf32> to vector<1x64xf32>
    %cst_37 = arith.constant dense<0.000000e+00> : vector<8xf32>
    %89 = vector.multi_reduction <add>, %84, %cst_37 [1] : vector<8x64xf32> to vector<8xf32>
    %90 = vector.shape_cast %89 : vector<8xf32> to vector<8x1xf32>
    %cst_38 = arith.constant 6.400000e+01 : f32
    %91 = vector.broadcast %cst_38 : f32 to vector<8x1xf32>
    %92 = arith.divf %90, %91 : vector<8x1xf32>
    %93 = vector.broadcast %92 : vector<8x1xf32> to vector<8x64xf32>
    %94 = arith.subf %84, %93 : vector<8x64xf32>
    %95 = arith.mulf %94, %94 : vector<8x64xf32>
    %cst_39 = arith.constant dense<0.000000e+00> : vector<8xf32>
    %96 = vector.multi_reduction <add>, %95, %cst_39 [1] : vector<8x64xf32> to vector<8xf32>
    %97 = vector.shape_cast %96 : vector<8xf32> to vector<8x1xf32>
    %cst_40 = arith.constant 6.400000e+01 : f32
    %98 = vector.broadcast %cst_40 : f32 to vector<8x1xf32>
    %99 = arith.divf %97, %98 : vector<8x1xf32>
    %100 = vector.broadcast %92 : vector<8x1xf32> to vector<8x64xf32>
    %101 = arith.subf %84, %100 : vector<8x64xf32>
    %cst_41 = arith.constant 9.99999974E-6 : f32
    %102 = vector.broadcast %cst_41 : f32 to vector<8x1xf32>
    %103 = arith.addf %99, %102 : vector<8x1xf32>
    %104 = math.rsqrt %103 : vector<8x1xf32>
    %105 = vector.broadcast %104 : vector<8x1xf32> to vector<8x64xf32>
    %106 = arith.mulf %101, %105 : vector<8x64xf32>
    %107 = vector.broadcast %86 : vector<1x64xf32> to vector<8x64xf32>
    %108 = arith.mulf %106, %107 : vector<8x64xf32>
    %109 = vector.broadcast %88 : vector<1x64xf32> to vector<8x64xf32>
    %110 = arith.addf %108, %109 : vector<8x64xf32>
    %111 = arith.truncf %110 : vector<8x64xf32> to vector<8x64xbf16>
    %c0_42 = arith.constant 0 : index
    %c0_43 = arith.constant 0 : index
    %c0_44 = arith.constant 0 : index
    %112 = vector.load %arg8[%c0_42, %c0_43, %c0_44] : memref<2x64x2048xbf16, #tpu.memory_space<vmem>>, vector<1x64x2048xbf16>
    %113 = vector.shape_cast %112 : vector<1x64x2048xbf16> to vector<64x2048xbf16>
    %cst_45 = arith.constant dense<0.000000e+00> : vector<8x2048xf32>
    %114 = tpu.matmul %111, %113, %cst_45 {dimension_numbers = #tpu.dot_dimension_numbers<[1], [0], [0], [1], [0, 0, 1, 1], [], []>} : vector<8x64xbf16>, vector<64x2048xbf16>, vector<8x2048xf32> -> vector<8x2048xf32>
    %c0_46 = arith.constant 0 : index
    %c0_47 = arith.constant 0 : index
    %c0_48 = arith.constant 0 : index
    %115 = vector.load %arg9[%c0_46, %c0_47, %c0_48] : memref<2x1x2048xf32, #tpu.memory_space<vmem>>, vector<1x1x2048xf32>
    %116 = vector.shape_cast %115 : vector<1x1x2048xf32> to vector<1x2048xf32>
    %117 = vector.broadcast %116 : vector<1x2048xf32> to vector<8x2048xf32>
    %118 = arith.addf %114, %117 : vector<8x2048xf32>
    %cst_49 = arith.constant 0.000000e+00 : f32
    %119 = vector.broadcast %cst_49 : f32 to vector<8x2048xf32>
    %120 = arith.maximumf %118, %119 : vector<8x2048xf32>
    %121 = arith.truncf %120 : vector<8x2048xf32> to vector<8x2048xbf16>
    %c0_50 = arith.constant 0 : index
    %c0_51 = arith.constant 0 : index
    %c0_52 = arith.constant 0 : index
    %122 = vector.load %arg10[%c0_50, %c0_51, %c0_52] : memref<2x2048x64xbf16, #tpu.memory_space<vmem>>, vector<1x2048x64xbf16>
    %123 = vector.shape_cast %122 : vector<1x2048x64xbf16> to vector<2048x64xbf16>
    %cst_53 = arith.constant dense<0.000000e+00> : vector<8x64xf32>
    %124 = tpu.matmul %121, %123, %cst_53 {dimension_numbers = #tpu.dot_dimension_numbers<[1], [0], [0], [1], [0, 0, 1, 1], [], []>} : vector<8x2048xbf16>, vector<2048x64xbf16>, vector<8x64xf32> -> vector<8x64xf32>
    %c0_54 = arith.constant 0 : index
    %c0_55 = arith.constant 0 : index
    %c0_56 = arith.constant 0 : index
    %125 = vector.load %arg11[%c0_54, %c0_55, %c0_56] : memref<2x1x64xf32, #tpu.memory_space<vmem>>, vector<1x1x64xf32>
    %126 = vector.shape_cast %125 : vector<1x1x64xf32> to vector<1x64xf32>
    %127 = vector.broadcast %126 : vector<1x64xf32> to vector<8x64xf32>
    %128 = arith.addf %124, %127 : vector<8x64xf32>
    %129 = arith.addf %110, %128 : vector<8x64xf32>
    %c0_57 = arith.constant 0 : index
    %c0_58 = arith.constant 0 : index
    %c0_59 = arith.constant 0 : index
    %130 = vector.load %arg12[%c0_57, %c0_58, %c0_59] : memref<2x1x64xf32, #tpu.memory_space<vmem>>, vector<1x1x64xf32>
    %131 = vector.shape_cast %130 : vector<1x1x64xf32> to vector<1x64xf32>
    %c0_60 = arith.constant 0 : index
    %c0_61 = arith.constant 0 : index
    %c0_62 = arith.constant 0 : index
    %132 = vector.load %arg13[%c0_60, %c0_61, %c0_62] : memref<2x1x64xf32, #tpu.memory_space<vmem>>, vector<1x1x64xf32>
    %133 = vector.shape_cast %132 : vector<1x1x64xf32> to vector<1x64xf32>
    %cst_63 = arith.constant dense<0.000000e+00> : vector<8xf32>
    %134 = vector.multi_reduction <add>, %129, %cst_63 [1] : vector<8x64xf32> to vector<8xf32>
    %135 = vector.shape_cast %134 : vector<8xf32> to vector<8x1xf32>
    %cst_64 = arith.constant 6.400000e+01 : f32
    %136 = vector.broadcast %cst_64 : f32 to vector<8x1xf32>
    %137 = arith.divf %135, %136 : vector<8x1xf32>
    %138 = vector.broadcast %137 : vector<8x1xf32> to vector<8x64xf32>
    %139 = arith.subf %129, %138 : vector<8x64xf32>
    %140 = arith.mulf %139, %139 : vector<8x64xf32>
    %cst_65 = arith.constant dense<0.000000e+00> : vector<8xf32>
    %141 = vector.multi_reduction <add>, %140, %cst_65 [1] : vector<8x64xf32> to vector<8xf32>
    %142 = vector.shape_cast %141 : vector<8xf32> to vector<8x1xf32>
    %cst_66 = arith.constant 6.400000e+01 : f32
    %143 = vector.broadcast %cst_66 : f32 to vector<8x1xf32>
    %144 = arith.divf %142, %143 : vector<8x1xf32>
    %145 = vector.broadcast %137 : vector<8x1xf32> to vector<8x64xf32>
    %146 = arith.subf %129, %145 : vector<8x64xf32>
    %cst_67 = arith.constant 9.99999974E-6 : f32
    %147 = vector.broadcast %cst_67 : f32 to vector<8x1xf32>
    %148 = arith.addf %144, %147 : vector<8x1xf32>
    %149 = math.rsqrt %148 : vector<8x1xf32>
    %150 = vector.broadcast %149 : vector<8x1xf32> to vector<8x64xf32>
    %151 = arith.mulf %146, %150 : vector<8x64xf32>
    %152 = vector.broadcast %131 : vector<1x64xf32> to vector<8x64xf32>
    %153 = arith.mulf %151, %152 : vector<8x64xf32>
    %154 = vector.broadcast %133 : vector<1x64xf32> to vector<8x64xf32>
    %155 = arith.addf %153, %154 : vector<8x64xf32>
    %156 = arith.truncf %155 : vector<8x64xf32> to vector<8x64xbf16>
    %c1 = arith.constant 1 : index
    %c0_68 = arith.constant 0 : index
    %c0_69 = arith.constant 0 : index
    %157 = vector.load %arg2[%c1, %c0_68, %c0_69] : memref<2x64x192xbf16, #tpu.memory_space<vmem>>, vector<1x64x192xbf16>
    %158 = vector.shape_cast %157 : vector<1x64x192xbf16> to vector<64x192xbf16>
    %cst_70 = arith.constant dense<0.000000e+00> : vector<8x192xf32>
    %159 = tpu.matmul %156, %158, %cst_70 {dimension_numbers = #tpu.dot_dimension_numbers<[1], [0], [0], [1], [0, 0, 1, 1], [], []>} : vector<8x64xbf16>, vector<64x192xbf16>, vector<8x192xf32> -> vector<8x192xf32>
    %c1_71 = arith.constant 1 : index
    %c0_72 = arith.constant 0 : index
    %c0_73 = arith.constant 0 : index
    %160 = vector.load %arg3[%c1_71, %c0_72, %c0_73] : memref<2x1x192xf32, #tpu.memory_space<vmem>>, vector<1x1x192xf32>
    %161 = vector.shape_cast %160 : vector<1x1x192xf32> to vector<1x192xf32>
    %162 = vector.broadcast %161 : vector<1x192xf32> to vector<8x192xf32>
    %163 = arith.addf %159, %162 : vector<8x192xf32>
    %164 = arith.truncf %163 : vector<8x192xf32> to vector<8x192xbf16>
    %165 = vector.extract_strided_slice %164 {offsets = [0, 0], sizes = [8, 16], strides = [1, 1]} : vector<8x192xbf16> to vector<8x16xbf16>
    %166 = vector.extract_strided_slice %164 {offsets = [0, 64], sizes = [8, 16], strides = [1, 1]} : vector<8x192xbf16> to vector<8x16xbf16>
    %167 = vector.extract_strided_slice %164 {offsets = [0, 128], sizes = [8, 16], strides = [1, 1]} : vector<8x192xbf16> to vector<8x16xbf16>
    "tpu.trace_start"() <{level = 10 : i32, message = "qe,ke->qk"}> : () -> ()
    %cst_74 = arith.constant dense<0.000000e+00> : vector<8x8xf32>
    %168 = tpu.matmul %165, %166, %cst_74 {dimension_numbers = #tpu.dot_dimension_numbers<[1], [1], [0], [0], [0, 0, 1, 0], [], []>} : vector<8x16xbf16>, vector<8x16xbf16>, vector<8x8xf32> -> vector<8x8xf32>
    "tpu.trace_stop"() : () -> ()
    %cst_75 = arith.constant dense<0xFF800000> : vector<8xf32>
    %169 = vector.multi_reduction <maximumf>, %168, %cst_75 [1] : vector<8x8xf32> to vector<8xf32>
    %170 = vector.shape_cast %169 : vector<8xf32> to vector<8x1xf32>
    %171 = vector.broadcast %170 : vector<8x1xf32> to vector<8x8xf32>
    %172 = arith.subf %168, %171 : vector<8x8xf32>
    %173 = math.exp %172 : vector<8x8xf32>
    %cst_76 = arith.constant dense<0.000000e+00> : vector<8xf32>
    %174 = vector.multi_reduction <add>, %173, %cst_76 [1] : vector<8x8xf32> to vector<8xf32>
    %175 = vector.shape_cast %174 : vector<8xf32> to vector<8x1xf32>
    %176 = tpu.reciprocal %175 {approx = true} : vector<8x1xf32> -> vector<8x1xf32>
    %177 = vector.broadcast %176 : vector<8x1xf32> to vector<8x8xf32>
    %178 = arith.mulf %173, %177 : vector<8x8xf32>
    %179 = arith.truncf %178 : vector<8x8xf32> to vector<8x8xbf16>
    %cst_77 = arith.constant dense<0.000000e+00> : vector<8x16xf32>
    %180 = tpu.matmul %179, %167, %cst_77 {dimension_numbers = #tpu.dot_dimension_numbers<[1], [0], [0], [1], [0, 0, 1, 1], [], []>} : vector<8x8xbf16>, vector<8x16xbf16>, vector<8x16xf32> -> vector<8x16xf32>
    %181 = vector.extract_strided_slice %164 {offsets = [0, 16], sizes = [8, 16], strides = [1, 1]} : vector<8x192xbf16> to vector<8x16xbf16>
    %182 = vector.extract_strided_slice %164 {offsets = [0, 80], sizes = [8, 16], strides = [1, 1]} : vector<8x192xbf16> to vector<8x16xbf16>
    %183 = vector.extract_strided_slice %164 {offsets = [0, 144], sizes = [8, 16], strides = [1, 1]} : vector<8x192xbf16> to vector<8x16xbf16>
    "tpu.trace_start"() <{level = 10 : i32, message = "qe,ke->qk"}> : () -> ()
    %cst_78 = arith.constant dense<0.000000e+00> : vector<8x8xf32>
    %184 = tpu.matmul %181, %182, %cst_78 {dimension_numbers = #tpu.dot_dimension_numbers<[1], [1], [0], [0], [0, 0, 1, 0], [], []>} : vector<8x16xbf16>, vector<8x16xbf16>, vector<8x8xf32> -> vector<8x8xf32>
    "tpu.trace_stop"() : () -> ()
    %cst_79 = arith.constant dense<0xFF800000> : vector<8xf32>
    %185 = vector.multi_reduction <maximumf>, %184, %cst_79 [1] : vector<8x8xf32> to vector<8xf32>
    %186 = vector.shape_cast %185 : vector<8xf32> to vector<8x1xf32>
    %187 = vector.broadcast %186 : vector<8x1xf32> to vector<8x8xf32>
    %188 = arith.subf %184, %187 : vector<8x8xf32>
    %189 = math.exp %188 : vector<8x8xf32>
    %cst_80 = arith.constant dense<0.000000e+00> : vector<8xf32>
    %190 = vector.multi_reduction <add>, %189, %cst_80 [1] : vector<8x8xf32> to vector<8xf32>
    %191 = vector.shape_cast %190 : vector<8xf32> to vector<8x1xf32>
    %192 = tpu.reciprocal %191 {approx = true} : vector<8x1xf32> -> vector<8x1xf32>
    %193 = vector.broadcast %192 : vector<8x1xf32> to vector<8x8xf32>
    %194 = arith.mulf %189, %193 : vector<8x8xf32>
    %195 = arith.truncf %194 : vector<8x8xf32> to vector<8x8xbf16>
    %cst_81 = arith.constant dense<0.000000e+00> : vector<8x16xf32>
    %196 = tpu.matmul %195, %183, %cst_81 {dimension_numbers = #tpu.dot_dimension_numbers<[1], [0], [0], [1], [0, 0, 1, 1], [], []>} : vector<8x8xbf16>, vector<8x16xbf16>, vector<8x16xf32> -> vector<8x16xf32>
    %197 = vector.extract_strided_slice %164 {offsets = [0, 32], sizes = [8, 16], strides = [1, 1]} : vector<8x192xbf16> to vector<8x16xbf16>
    %198 = vector.extract_strided_slice %164 {offsets = [0, 96], sizes = [8, 16], strides = [1, 1]} : vector<8x192xbf16> to vector<8x16xbf16>
    %199 = vector.extract_strided_slice %164 {offsets = [0, 160], sizes = [8, 16], strides = [1, 1]} : vector<8x192xbf16> to vector<8x16xbf16>
    "tpu.trace_start"() <{level = 10 : i32, message = "qe,ke->qk"}> : () -> ()
    %cst_82 = arith.constant dense<0.000000e+00> : vector<8x8xf32>
    %200 = tpu.matmul %197, %198, %cst_82 {dimension_numbers = #tpu.dot_dimension_numbers<[1], [1], [0], [0], [0, 0, 1, 0], [], []>} : vector<8x16xbf16>, vector<8x16xbf16>, vector<8x8xf32> -> vector<8x8xf32>
    "tpu.trace_stop"() : () -> ()
    %cst_83 = arith.constant dense<0xFF800000> : vector<8xf32>
    %201 = vector.multi_reduction <maximumf>, %200, %cst_83 [1] : vector<8x8xf32> to vector<8xf32>
    %202 = vector.shape_cast %201 : vector<8xf32> to vector<8x1xf32>
    %203 = vector.broadcast %202 : vector<8x1xf32> to vector<8x8xf32>
    %204 = arith.subf %200, %203 : vector<8x8xf32>
    %205 = math.exp %204 : vector<8x8xf32>
    %cst_84 = arith.constant dense<0.000000e+00> : vector<8xf32>
    %206 = vector.multi_reduction <add>, %205, %cst_84 [1] : vector<8x8xf32> to vector<8xf32>
    %207 = vector.shape_cast %206 : vector<8xf32> to vector<8x1xf32>
    %208 = tpu.reciprocal %207 {approx = true} : vector<8x1xf32> -> vector<8x1xf32>
    %209 = vector.broadcast %208 : vector<8x1xf32> to vector<8x8xf32>
    %210 = arith.mulf %205, %209 : vector<8x8xf32>
    %211 = arith.truncf %210 : vector<8x8xf32> to vector<8x8xbf16>
    %cst_85 = arith.constant dense<0.000000e+00> : vector<8x16xf32>
    %212 = tpu.matmul %211, %199, %cst_85 {dimension_numbers = #tpu.dot_dimension_numbers<[1], [0], [0], [1], [0, 0, 1, 1], [], []>} : vector<8x8xbf16>, vector<8x16xbf16>, vector<8x16xf32> -> vector<8x16xf32>
    %213 = vector.extract_strided_slice %164 {offsets = [0, 48], sizes = [8, 16], strides = [1, 1]} : vector<8x192xbf16> to vector<8x16xbf16>
    %214 = vector.extract_strided_slice %164 {offsets = [0, 112], sizes = [8, 16], strides = [1, 1]} : vector<8x192xbf16> to vector<8x16xbf16>
    %215 = vector.extract_strided_slice %164 {offsets = [0, 176], sizes = [8, 16], strides = [1, 1]} : vector<8x192xbf16> to vector<8x16xbf16>
    "tpu.trace_start"() <{level = 10 : i32, message = "qe,ke->qk"}> : () -> ()
    %cst_86 = arith.constant dense<0.000000e+00> : vector<8x8xf32>
    %216 = tpu.matmul %213, %214, %cst_86 {dimension_numbers = #tpu.dot_dimension_numbers<[1], [1], [0], [0], [0, 0, 1, 0], [], []>} : vector<8x16xbf16>, vector<8x16xbf16>, vector<8x8xf32> -> vector<8x8xf32>
    "tpu.trace_stop"() : () -> ()
    %cst_87 = arith.constant dense<0xFF800000> : vector<8xf32>
    %217 = vector.multi_reduction <maximumf>, %216, %cst_87 [1] : vector<8x8xf32> to vector<8xf32>
    %218 = vector.shape_cast %217 : vector<8xf32> to vector<8x1xf32>
    %219 = vector.broadcast %218 : vector<8x1xf32> to vector<8x8xf32>
    %220 = arith.subf %216, %219 : vector<8x8xf32>
    %221 = math.exp %220 : vector<8x8xf32>
    %cst_88 = arith.constant dense<0.000000e+00> : vector<8xf32>
    %222 = vector.multi_reduction <add>, %221, %cst_88 [1] : vector<8x8xf32> to vector<8xf32>
    %223 = vector.shape_cast %222 : vector<8xf32> to vector<8x1xf32>
    %224 = tpu.reciprocal %223 {approx = true} : vector<8x1xf32> -> vector<8x1xf32>
    %225 = vector.broadcast %224 : vector<8x1xf32> to vector<8x8xf32>
    %226 = arith.mulf %221, %225 : vector<8x8xf32>
    %227 = arith.truncf %226 : vector<8x8xf32> to vector<8x8xbf16>
    %cst_89 = arith.constant dense<0.000000e+00> : vector<8x16xf32>
    %228 = tpu.matmul %227, %215, %cst_89 {dimension_numbers = #tpu.dot_dimension_numbers<[1], [0], [0], [1], [0, 0, 1, 1], [], []>} : vector<8x8xbf16>, vector<8x16xbf16>, vector<8x16xf32> -> vector<8x16xf32>
    %229 = tpu.concatenate %180, %196, %212, %228 in 1 : vector<8x16xf32>, vector<8x16xf32>, vector<8x16xf32>, vector<8x16xf32> -> vector<8x64xf32>
    %230 = arith.truncf %229 : vector<8x64xf32> to vector<8x64xbf16>
    %c1_90 = arith.constant 1 : index
    %c0_91 = arith.constant 0 : index
    %c0_92 = arith.constant 0 : index
    %231 = vector.load %arg4[%c1_90, %c0_91, %c0_92] : memref<2x64x64xbf16, #tpu.memory_space<vmem>>, vector<1x64x64xbf16>
    %232 = vector.shape_cast %231 : vector<1x64x64xbf16> to vector<64x64xbf16>
    %cst_93 = arith.constant dense<0.000000e+00> : vector<8x64xf32>
    %233 = tpu.matmul %230, %232, %cst_93 {dimension_numbers = #tpu.dot_dimension_numbers<[1], [0], [0], [1], [0, 0, 1, 1], [], []>} : vector<8x64xbf16>, vector<64x64xbf16>, vector<8x64xf32> -> vector<8x64xf32>
    %c1_94 = arith.constant 1 : index
    %c0_95 = arith.constant 0 : index
    %c0_96 = arith.constant 0 : index
    %234 = vector.load %arg5[%c1_94, %c0_95, %c0_96] : memref<2x1x64xf32, #tpu.memory_space<vmem>>, vector<1x1x64xf32>
    %235 = vector.shape_cast %234 : vector<1x1x64xf32> to vector<1x64xf32>
    %236 = vector.broadcast %235 : vector<1x64xf32> to vector<8x64xf32>
    %237 = arith.addf %233, %236 : vector<8x64xf32>
    %238 = arith.addf %155, %237 : vector<8x64xf32>
    %c1_97 = arith.constant 1 : index
    %c0_98 = arith.constant 0 : index
    %c0_99 = arith.constant 0 : index
    %239 = vector.load %arg6[%c1_97, %c0_98, %c0_99] : memref<2x1x64xf32, #tpu.memory_space<vmem>>, vector<1x1x64xf32>
    %240 = vector.shape_cast %239 : vector<1x1x64xf32> to vector<1x64xf32>
    %c1_100 = arith.constant 1 : index
    %c0_101 = arith.constant 0 : index
    %c0_102 = arith.constant 0 : index
    %241 = vector.load %arg7[%c1_100, %c0_101, %c0_102] : memref<2x1x64xf32, #tpu.memory_space<vmem>>, vector<1x1x64xf32>
    %242 = vector.shape_cast %241 : vector<1x1x64xf32> to vector<1x64xf32>
    %cst_103 = arith.constant dense<0.000000e+00> : vector<8xf32>
    %243 = vector.multi_reduction <add>, %238, %cst_103 [1] : vector<8x64xf32> to vector<8xf32>
    %244 = vector.shape_cast %243 : vector<8xf32> to vector<8x1xf32>
    %cst_104 = arith.constant 6.400000e+01 : f32
    %245 = vector.broadcast %cst_104 : f32 to vector<8x1xf32>
    %246 = arith.divf %244, %245 : vector<8x1xf32>
    %247 = vector.broadcast %246 : vector<8x1xf32> to vector<8x64xf32>
    %248 = arith.subf %238, %247 : vector<8x64xf32>
    %249 = arith.mulf %248, %248 : vector<8x64xf32>
    %cst_105 = arith.constant dense<0.000000e+00> : vector<8xf32>
    %250 = vector.multi_reduction <add>, %249, %cst_105 [1] : vector<8x64xf32> to vector<8xf32>
    %251 = vector.shape_cast %250 : vector<8xf32> to vector<8x1xf32>
    %cst_106 = arith.constant 6.400000e+01 : f32
    %252 = vector.broadcast %cst_106 : f32 to vector<8x1xf32>
    %253 = arith.divf %251, %252 : vector<8x1xf32>
    %254 = vector.broadcast %246 : vector<8x1xf32> to vector<8x64xf32>
    %255 = arith.subf %238, %254 : vector<8x64xf32>
    %cst_107 = arith.constant 9.99999974E-6 : f32
    %256 = vector.broadcast %cst_107 : f32 to vector<8x1xf32>
    %257 = arith.addf %253, %256 : vector<8x1xf32>
    %258 = math.rsqrt %257 : vector<8x1xf32>
    %259 = vector.broadcast %258 : vector<8x1xf32> to vector<8x64xf32>
    %260 = arith.mulf %255, %259 : vector<8x64xf32>
    %261 = vector.broadcast %240 : vector<1x64xf32> to vector<8x64xf32>
    %262 = arith.mulf %260, %261 : vector<8x64xf32>
    %263 = vector.broadcast %242 : vector<1x64xf32> to vector<8x64xf32>
    %264 = arith.addf %262, %263 : vector<8x64xf32>
    %265 = arith.truncf %264 : vector<8x64xf32> to vector<8x64xbf16>
    %c1_108 = arith.constant 1 : index
    %c0_109 = arith.constant 0 : index
    %c0_110 = arith.constant 0 : index
    %266 = vector.load %arg8[%c1_108, %c0_109, %c0_110] : memref<2x64x2048xbf16, #tpu.memory_space<vmem>>, vector<1x64x2048xbf16>
    %267 = vector.shape_cast %266 : vector<1x64x2048xbf16> to vector<64x2048xbf16>
    %cst_111 = arith.constant dense<0.000000e+00> : vector<8x2048xf32>
    %268 = tpu.matmul %265, %267, %cst_111 {dimension_numbers = #tpu.dot_dimension_numbers<[1], [0], [0], [1], [0, 0, 1, 1], [], []>} : vector<8x64xbf16>, vector<64x2048xbf16>, vector<8x2048xf32> -> vector<8x2048xf32>
    %c1_112 = arith.constant 1 : index
    %c0_113 = arith.constant 0 : index
    %c0_114 = arith.constant 0 : index
    %269 = vector.load %arg9[%c1_112, %c0_113, %c0_114] : memref<2x1x2048xf32, #tpu.memory_space<vmem>>, vector<1x1x2048xf32>
    %270 = vector.shape_cast %269 : vector<1x1x2048xf32> to vector<1x2048xf32>
    %271 = vector.broadcast %270 : vector<1x2048xf32> to vector<8x2048xf32>
    %272 = arith.addf %268, %271 : vector<8x2048xf32>
    %cst_115 = arith.constant 0.000000e+00 : f32
    %273 = vector.broadcast %cst_115 : f32 to vector<8x2048xf32>
    %274 = arith.maximumf %272, %273 : vector<8x2048xf32>
    %275 = arith.truncf %274 : vector<8x2048xf32> to vector<8x2048xbf16>
    %c1_116 = arith.constant 1 : index
    %c0_117 = arith.constant 0 : index
    %c0_118 = arith.constant 0 : index
    %276 = vector.load %arg10[%c1_116, %c0_117, %c0_118] : memref<2x2048x64xbf16, #tpu.memory_space<vmem>>, vector<1x2048x64xbf16>
    %277 = vector.shape_cast %276 : vector<1x2048x64xbf16> to vector<2048x64xbf16>
    %cst_119 = arith.constant dense<0.000000e+00> : vector<8x64xf32>
    %278 = tpu.matmul %275, %277, %cst_119 {dimension_numbers = #tpu.dot_dimension_numbers<[1], [0], [0], [1], [0, 0, 1, 1], [], []>} : vector<8x2048xbf16>, vector<2048x64xbf16>, vector<8x64xf32> -> vector<8x64xf32>
    %c1_120 = arith.constant 1 : index
    %c0_121 = arith.constant 0 : index
    %c0_122 = arith.constant 0 : index
    %279 = vector.load %arg11[%c1_120, %c0_121, %c0_122] : memref<2x1x64xf32, #tpu.memory_space<vmem>>, vector<1x1x64xf32>
    %280 = vector.shape_cast %279 : vector<1x1x64xf32> to vector<1x64xf32>
    %281 = vector.broadcast %280 : vector<1x64xf32> to vector<8x64xf32>
    %282 = arith.addf %278, %281 : vector<8x64xf32>
    %283 = arith.addf %264, %282 : vector<8x64xf32>
    %c1_123 = arith.constant 1 : index
    %c0_124 = arith.constant 0 : index
    %c0_125 = arith.constant 0 : index
    %284 = vector.load %arg12[%c1_123, %c0_124, %c0_125] : memref<2x1x64xf32, #tpu.memory_space<vmem>>, vector<1x1x64xf32>
    %285 = vector.shape_cast %284 : vector<1x1x64xf32> to vector<1x64xf32>
    %c1_126 = arith.constant 1 : index
    %c0_127 = arith.constant 0 : index
    %c0_128 = arith.constant 0 : index
    %286 = vector.load %arg13[%c1_126, %c0_127, %c0_128] : memref<2x1x64xf32, #tpu.memory_space<vmem>>, vector<1x1x64xf32>
    %287 = vector.shape_cast %286 : vector<1x1x64xf32> to vector<1x64xf32>
    %cst_129 = arith.constant dense<0.000000e+00> : vector<8xf32>
    %288 = vector.multi_reduction <add>, %283, %cst_129 [1] : vector<8x64xf32> to vector<8xf32>
    %289 = vector.shape_cast %288 : vector<8xf32> to vector<8x1xf32>
    %cst_130 = arith.constant 6.400000e+01 : f32
    %290 = vector.broadcast %cst_130 : f32 to vector<8x1xf32>
    %291 = arith.divf %289, %290 : vector<8x1xf32>
    %292 = vector.broadcast %291 : vector<8x1xf32> to vector<8x64xf32>
    %293 = arith.subf %283, %292 : vector<8x64xf32>
    %294 = arith.mulf %293, %293 : vector<8x64xf32>
    %cst_131 = arith.constant dense<0.000000e+00> : vector<8xf32>
    %295 = vector.multi_reduction <add>, %294, %cst_131 [1] : vector<8x64xf32> to vector<8xf32>
    %296 = vector.shape_cast %295 : vector<8xf32> to vector<8x1xf32>
    %cst_132 = arith.constant 6.400000e+01 : f32
    %297 = vector.broadcast %cst_132 : f32 to vector<8x1xf32>
    %298 = arith.divf %296, %297 : vector<8x1xf32>
    %299 = vector.broadcast %291 : vector<8x1xf32> to vector<8x64xf32>
    %300 = arith.subf %283, %299 : vector<8x64xf32>
    %cst_133 = arith.constant 9.99999974E-6 : f32
    %301 = vector.broadcast %cst_133 : f32 to vector<8x1xf32>
    %302 = arith.addf %298, %301 : vector<8x1xf32>
    %303 = math.rsqrt %302 : vector<8x1xf32>
    %304 = vector.broadcast %303 : vector<8x1xf32> to vector<8x64xf32>
    %305 = arith.mulf %300, %304 : vector<8x64xf32>
    %306 = vector.broadcast %285 : vector<1x64xf32> to vector<8x64xf32>
    %307 = arith.mulf %305, %306 : vector<8x64xf32>
    %308 = vector.broadcast %287 : vector<1x64xf32> to vector<8x64xf32>
    %309 = arith.addf %307, %308 : vector<8x64xf32>
    %cst_134 = arith.constant dense<0.000000e+00> : vector<64xf32>
    %310 = vector.multi_reduction <add>, %309, %cst_134 [0] : vector<8x64xf32> to vector<64xf32>
    %311 = vector.shape_cast %310 : vector<64xf32> to vector<1x64xf32>
    %cst_135 = arith.constant 8.000000e+00 : f32
    %312 = vector.broadcast %cst_135 : f32 to vector<1x64xf32>
    %313 = arith.divf %311, %312 : vector<1x64xf32>
    %314 = arith.truncf %313 : vector<1x64xf32> to vector<1x64xbf16>
    %c0_136 = arith.constant 0 : index
    %c0_137 = arith.constant 0 : index
    %315 = vector.load %arg14[%c0_136, %c0_137] : memref<64x128xbf16, #tpu.memory_space<vmem>>, vector<64x128xbf16>
    %cst_138 = arith.constant dense<0.000000e+00> : vector<1x128xf32>
    %316 = tpu.matmul %314, %315, %cst_138 {dimension_numbers = #tpu.dot_dimension_numbers<[1], [0], [0], [1], [0, 0, 1, 1], [], []>} : vector<1x64xbf16>, vector<64x128xbf16>, vector<1x128xf32> -> vector<1x128xf32>
    %c0_139 = arith.constant 0 : index
    %c0_140 = arith.constant 0 : index
    %317 = vector.load %arg15[%c0_139, %c0_140] : memref<1x128xf32, #tpu.memory_space<vmem>>, vector<1x128xf32>
    %318 = arith.addf %316, %317 : vector<1x128xf32>
    %c0_141 = arith.constant 0 : index
    %c0_142 = arith.constant 0 : index
    %c0_143 = arith.constant 0 : index
    %319 = vector.load %arg16[%c0_141, %c0_142, %c0_143] : memref<1x1x128xf32, #tpu.memory_space<vmem>>, vector<1x1x128xf32>
    %320 = vector.shape_cast %319 : vector<1x1x128xf32> to vector<1x128xf32>
    %321 = vector.shape_cast %318 : vector<1x128xf32> to vector<1x1x128xf32>
    tpu.vector_store %arg16[%c0_141, %c0_142, %c0_143], %321 {strides = array<i32>} : memref<1x1x128xf32, #tpu.memory_space<vmem>>, vector<1x1x128xf32>,
    return
  }
  func.func @transform_0(%arg0: i32) -> (i32, i32, i32) {
    %c0_i32 = arith.constant 0 : i32
    %c0_i32_0 = arith.constant 0 : i32
    %c0_i32_1 = arith.constant 0 : i32
    return %arg0, %c0_i32, %c0_i32_0 : i32, i32, i32
  }
  func.func @transform_1(%arg0: i32) -> (i32, i32, i32) {
    %c0_i32 = arith.constant 0 : i32
    %c0_i32_0 = arith.constant 0 : i32
    %c0_i32_1 = arith.constant 0 : i32
    %c0_i32_2 = arith.constant 0 : i32
    return %c0_i32, %c0_i32_0, %c0_i32_1 : i32, i32, i32
  }
  func.func @transform_2(%arg0: i32) -> (i32, i32, i32) {
    %c0_i32 = arith.constant 0 : i32
    %c0_i32_0 = arith.constant 0 : i32
    %c0_i32_1 = arith.constant 0 : i32
    %c0_i32_2 = arith.constant 0 : i32
    return %c0_i32, %c0_i32_0, %c0_i32_1 : i32, i32, i32
  }
  func.func @transform_3(%arg0: i32) -> (i32, i32, i32) {
    %c0_i32 = arith.constant 0 : i32
    %c0_i32_0 = arith.constant 0 : i32
    %c0_i32_1 = arith.constant 0 : i32
    %c0_i32_2 = arith.constant 0 : i32
    return %c0_i32, %c0_i32_0, %c0_i32_1 : i32, i32, i32
  }
  func.func @transform_4(%arg0: i32) -> (i32, i32, i32) {
    %c0_i32 = arith.constant 0 : i32
    %c0_i32_0 = arith.constant 0 : i32
    %c0_i32_1 = arith.constant 0 : i32
    %c0_i32_2 = arith.constant 0 : i32
    return %c0_i32, %c0_i32_0, %c0_i32_1 : i32, i32, i32
  }
  func.func @transform_5(%arg0: i32) -> (i32, i32, i32) {
    %c0_i32 = arith.constant 0 : i32
    %c0_i32_0 = arith.constant 0 : i32
    %c0_i32_1 = arith.constant 0 : i32
    %c0_i32_2 = arith.constant 0 : i32
    return %c0_i32, %c0_i32_0, %c0_i32_1 : i32, i32, i32
  }
  func.func @transform_6(%arg0: i32) -> (i32, i32, i32) {
    %c0_i32 = arith.constant 0 : i32
    %c0_i32_0 = arith.constant 0 : i32
    %c0_i32_1 = arith.constant 0 : i32
    %c0_i32_2 = arith.constant 0 : i32
    return %c0_i32, %c0_i32_0, %c0_i32_1 : i32, i32, i32
  }
  func.func @transform_7(%arg0: i32) -> (i32, i32, i32) {
    %c0_i32 = arith.constant 0 : i32
    %c0_i32_0 = arith.constant 0 : i32
    %c0_i32_1 = arith.constant 0 : i32
    %c0_i32_2 = arith.constant 0 : i32
    return %c0_i32, %c0_i32_0, %c0_i32_1 : i32, i32, i32
  }
  func.func @transform_8(%arg0: i32) -> (i32, i32, i32) {
    %c0_i32 = arith.constant 0 : i32
    %c0_i32_0 = arith.constant 0 : i32
    %c0_i32_1 = arith.constant 0 : i32
    %c0_i32_2 = arith.constant 0 : i32
    return %c0_i32, %c0_i32_0, %c0_i32_1 : i32, i32, i32
  }
  func.func @transform_9(%arg0: i32) -> (i32, i32, i32) {
    %c0_i32 = arith.constant 0 : i32
    %c0_i32_0 = arith.constant 0 : i32
    %c0_i32_1 = arith.constant 0 : i32
    %c0_i32_2 = arith.constant 0 : i32
    return %c0_i32, %c0_i32_0, %c0_i32_1 : i32, i32, i32
  }
  func.func @transform_10(%arg0: i32) -> (i32, i32, i32) {
    %c0_i32 = arith.constant 0 : i32
    %c0_i32_0 = arith.constant 0 : i32
    %c0_i32_1 = arith.constant 0 : i32
    %c0_i32_2 = arith.constant 0 : i32
    return %c0_i32, %c0_i32_0, %c0_i32_1 : i32, i32, i32
  }
  func.func @transform_11(%arg0: i32) -> (i32, i32, i32) {
    %c0_i32 = arith.constant 0 : i32
    %c0_i32_0 = arith.constant 0 : i32
    %c0_i32_1 = arith.constant 0 : i32
    %c0_i32_2 = arith.constant 0 : i32
    return %c0_i32, %c0_i32_0, %c0_i32_1 : i32, i32, i32
  }
  func.func @transform_12(%arg0: i32) -> (i32, i32, i32) {
    %c0_i32 = arith.constant 0 : i32
    %c0_i32_0 = arith.constant 0 : i32
    %c0_i32_1 = arith.constant 0 : i32
    %c0_i32_2 = arith.constant 0 : i32
    return %c0_i32, %c0_i32_0, %c0_i32_1 : i32, i32, i32
  }
  func.func @transform_13(%arg0: i32) -> (i32, i32) {
    %c0_i32 = arith.constant 0 : i32
    %c0_i32_0 = arith.constant 0 : i32
    %c0_i32_1 = arith.constant 0 : i32
    return %c0_i32, %c0_i32_0 : i32, i32
  }
  func.func @transform_14(%arg0: i32) -> (i32, i32) {
    %c0_i32 = arith.constant 0 : i32
    %c0_i32_0 = arith.constant 0 : i32
    %c0_i32_1 = arith.constant 0 : i32
    return %c0_i32, %c0_i32_0 : i32, i32
  }
  func.func @transform_15(%arg0: i32) -> (i32, i32, i32) {
    %c0_i32 = arith.constant 0 : i32
    %c0_i32_0 = arith.constant 0 : i32
    %c0_i32_1 = arith.constant 0 : i32
    return %arg0, %c0_i32, %c0_i32_0 : i32, i32, i32
  }
}

</mosaic_0001>

<bundles_post_ra>
// kernel: transformer_classifier.1
= control target key start
LH: loop header
LB: loop body
LE: loop exit
PB: predicated region body
PF: predicated region fallthrough
CT: control target
= control target key end

     0   :  { %s10090_s0 = inlined_call_operand.vmem [shape: f32[2,8,64], index: 0, kind: input, shape index: {}]   ;;  %s10091_s1 = inlined_call_operand.vmem [shape: bf16[2,64,192], index: 1, kind: input, shape index: {}]   ;;  %s10092_s2 = inlined_call_operand.vmem [shape: f32[2,1,192], index: 2, kind: input, shape index: {}]   ;;  %s10093_s3 = inlined_call_operand.vmem [shape: bf16[2,64,64], index: 3, kind: input, shape index: {}]   ;;  %s10094_s4 = inlined_call_operand.vmem [shape: f32[2,1,64], index: 4, kind: input, shape index: {}]   ;;  %s10095_s5 = inlined_call_operand.vmem [shape: f32[2,1,64], index: 5, kind: input, shape index: {}]   ;;  %s10096_s6 = inlined_call_operand.vmem [shape: f32[2,1,64], index: 6, kind: input, shape index: {}]   ;;  %s10097_s7 = inlined_call_operand.vmem [shape: bf16[2,64,2048], index: 7, kind: input, shape index: {}]   ;;  %s10098_s8 = inlined_call_operand.vmem [shape: f32[2,1,2048], index: 8, kind: input, shape index: {}]   ;;  %s10099_s9 = inlined_call_operand.vmem [shape: bf16[2,2048,64], index: 9, kind: input, shape index: {}]   ;;  %s10100_s10 = inlined_call_operand.vmem [shape: f32[2,1,64], index: 10, kind: input, shape index: {}]   ;;  %s10101_s11 = inlined_call_operand.vmem [shape: f32[2,1,64], index: 11, kind: input, shape index: {}]   ;;  %s10102_s12 = inlined_call_operand.vmem [shape: f32[2,1,64], index: 12, kind: input, shape index: {}]   ;;  %s10103_s13 = inlined_call_operand.vmem [shape: bf16[64,128], index: 13, kind: input, shape index: {}]   ;;  %s10104_s14 = inlined_call_operand.vmem [shape: f32[1,128], index: 14, kind: input, shape index: {}]   ;;  %s10105_s15 = inlined_call_operand.hbm [shape: f32[2,1,128], index: 15, kind: output, shape index: {}]  }
   0x1   :  { %10121 = sst [smem:[#allocation11_spill]] %s10105_s15 }
   0x2   :  { %20 = vsyncpa [#allocation3], 0 }
   0x3   :  { %22 = vsyncpa [#allocation3 + $0x1], 0  ;;  %s8317_s18 = smov 0   ;;  %s8319_s19 = smov 0  }
   0x4   :  { %s8321_s20 = smov 0   ;;  %s8323_s21 = smov 0  }
   0x5 LB: > { %10122 = sst [smem:[#allocation5_spill]] %s8212_s18  ;;  %s8338_s22 = sadd.s32 4294967295, %s8224_s21   ;;  %s8224_s21 = sphi %s8323_s21, %s10138_s21   ;;  %s8220_s20 = sphi %s8321_s20, %s10140_s20   ;;  %s8216_s19 = sphi %s8319_s19, %s10142_s19   ;;  %s8212_s18 = sphi %s8317_s18, %s10141_s18  }
   0x6   : > { %10123 = sst [smem:[#allocation6_spill]] %s8220_s20  ;;  %s6437_s23 = sadd.s32 4294967294, %s8224_s21  }
   0x7   : > { %10124 = sst [smem:[#allocation7_spill]] %s8224_s21  ;;  %s8342_s24 = sadd.s32 1, %s8224_s21  }
   0x8   : > { %10125 = sst [smem:[#allocation8_spill]] %s8342_s24  ;;  %s355_s25 = sadd.s32 1, %s8220_s20 }
   0x9   : > { %s352_s26 = ssub.s32 %s8224_s21, %s8342_s24  ;;  %p365_p0 = scmp.ne.s32.totalorder %s8220_s20, %s8216_s19 }
   0xa   : > { %p353_p1 = scmp.eq.s32.totalorder %s352_s26, 0  ;;  %p366_p2 = scmp.eq.s32.totalorder %s8338_s22, 1 }
   0xb   : > { %p371_p3 = scmp.ne.s32.totalorder %s8216_s19, %s8212_s18  ;;  %p372_p4 = scmp.eq.s32.totalorder %s6437_s23, 1 }
   0xc   : > { %s8353_s27 = scalar_select %p353_p1, %s8220_s20, %s355_s25  }
   0xd   : > { %p8355_p5 = por %p366_p2, %p365_p0  ;;  %p8359_p6 = por %p372_p4, %p371_p3 }
   0xe   : > { %10126 = sst [smem:[#allocation9_spill]] %s8353_s27  ;;  %p6440_p7 = scmp.ge.s32.totalorder %s8224_s21, 1 }
   0xf   : > { %s10128_s29 = scalar_select %p8359_p6, 1, 0 }
  0x10   : > { %p439_p8 = scmp.lt.s32.totalorder %s8224_s21, 3 }
  0x11   : > { %10129 = sst [smem:[#allocation10_spill]] %s10128_s29 }
  0x12   : > { %p440_p9 = pnand %p6440_p7, %p439_p8 }
  0x13   : > { %p485_p10 = scmp.lt.s32.totalorder (!%p440_p9), %s8338_s22, 1  ;;  %s8230_s29 = smov (!%p440_p9), 64  }
  0x14   : > { %443 = sbr.rel (%p440_p9) target bundleno = 5296 (0x14b0), region = 80  ;;  %s10119_s30 = smov (!%p440_p9), 32  }
  0x15   : > { %s8232_s16 = smov (!%p440_p9), 48   ;;  %s10117_s23 = smov (!%p440_p9), 96  }
  0x16   : > { %s10113_s25 = smov (!%p440_p9), 80   ;;  %s10133_s24 = smov (!%p440_p9), 80  }
  0x17   : > { %s7248_s21 = sshll.u32 (!%p440_p9), %s8338_s22, 4 }
  0x19   : > { %v7831_v0 = vld [vmem:[%s10091_s1 + $0x34] ss:$8 sps:$4 sm:$0xff]   ;;  %v7833_v1 = vld [vmem:[%s10091_s1 + $0x30] ss:$8 sps:$4 sm:$0xff]   ;;  %v8226_v2 = vmov 0   ;;  %s486_s27 = scalar_select %p485_p10, %s8338_s22, 1  ;;  %v502_v11 = vlaneseq }
  0x1a   : > { %588 = vmatprep.mubr.bf16.mxu0 %v8226_v2  ;;  %564 = vmatprep.subr.bf16.mxu0 %v7831_v0  ;;  %v7834_v3 = vld [vmem:[%s10091_s1 + $0x24] ss:$8 sps:$4 sm:$0xff]   ;;  %v7836_v4 = vld [vmem:[%s10091_s1 + $0x20] ss:$8 sps:$4 sm:$0xff]   ;;  %v7837_v5 = vld [vmem:[%s10091_s1 + $0x14] ss:$8 sps:$4 sm:$0xff]  }
  0x1b   : > { %565 = vmatpush1.bf16.msra.mxu0 %v7833_v1  ;;  %s6441_s17 = sshll.u32 %s486_s27, 3  ;;  %v7839_v6 = vld [vmem:[%s10091_s1 + $0x10] ss:$8 sps:$4 sm:$0xff]   ;;  %v7840_v7 = vld [vmem:[%s10091_s1 + $0x4] ss:$8 sps:$4 sm:$0xff]   ;;  %vm552_vm0 = vcmask 523264  }
  0x1c   : > { %566 = vmatprep.subr.bf16.mxu0 %v7834_v3  ;;  %s8392_s15 = scalar_lea.vmem %s10090_s0, %s6441_s17  ;;  %v7842_v8 = vld [vmem:[%s10091_s1] ss:$8 sps:$4 sm:$0xff]   ;;  %v8399_v12 = vshrl.u32 %v502_v11, 7  ;;  %v8227_v13 = vmov 0.0   ;;  %vm8228_vm1 = vmmov 0   ;;  %s8229_s27 = smov 112  }
  0x1d   : > { %v490_v9 = vld [vmem:[%s8392_s15] sm:$0xff]  ;;  %7650 = vmatprep.subr.bf16.mxu1 %v8227_v13  ;;  %7652 = vmatprep.mubr.msk.bf16.mxu1 %vm8228_vm1, %v8227_v13  ;;  %s10115_s17 = smov 16   ;;  %vm602_vm2 = vcmask 130048   ;;  %vm665_vm3 = vcmask 1043456   ;;  %vm649_vm4 = vcmask 64512   ;;  %vm1053_vm5 = vcmask 261120  }
  0x1e   : > { %v491_v10 = vpack.c.bf16 %v490_v9, %v490_v9  ;;  %v8404_v14 = vsub.s32 0, %v8399_v12  ;;  %v500_v15 = vld [vmem:[%s10092_s2] sm:$0x3]  ;;  %v8422_v23 = vsub.s32 1, %v8399_v12  ;;  %vm1055_vm6 = vcmask 392192   ;;  %s8236_s22 = smov [#allocation2]  }
  0x1f   : > { %567 = vmatpush1.bf16.msra.mxu0 %v7836_v4 }
  0x20   : > { %568 = vmatprep.subr.bf16.mxu0 %v7837_v5  ;;  %v505_v16 = vrot.slane %v500_v15, %v8404_v14  ;;  %v509_v24 = vrot.slane %v500_v15, %v8422_v23 }
  0x23   : > { %569 = vmatpush1.bf16.msra.mxu0 %v7839_v6 }
  0x24   : > { %570 = vmatprep.subr.bf16.mxu0 %v7840_v7 }
  0x27   : > { %571 = vmatpush1.bf16.msra.mxu0 %v7842_v8 }
  0x28   : > { %7662 = vmatprep.subr.bf16.mxu0 %v8227_v13 }
  0x2a   : > { %6450 = vmatmul.mubr.msk.bf16.vlgmr.msra.gmra.mxu0 %vm552_vm0, %v491_v10 }
  0x2b   : > { %7664 = vmatprep.mubr.msk.bf16.mxu0 %vm8228_vm1, %v8227_v13 }
  0xea   : > { %v590_v17 = vpop.f32.mrf.mxu0 }
  0xeb   : > { %v591_v18 = vadd.f32 %v590_v17, %v505_v16 }
  0xec   : > { %v592_v19 = vpop.f32.mrf.mxu0 }
  0xed   : > { %v597_v20 = vpack.c.bf16 %v591_v18, %v591_v18  ;;  %v593_v26 = vadd.f32 %v592_v19, %v509_v24 }
  0xee   : > { %v594_v21 = vpop.f32.mrf.mxu0 }
  0xef   : > { %709 = vrot.lane.b32.xlu1 %v597_v20, %s8229_s27  ;;  %600 = vrot.lane.b32.xlu0 %v597_v20, %s8230_s29  ;;  %v8427_v30 = vpack.c.bf16 %v593_v26, %v593_v26 }
  0xf0   : > { %v595_v22 = vpop.f32.mrf.mxu0 }
  0xf1   : > { %v667_v32 = vsel %vm665_vm3, %v8427_v30, 0 }
  0xf3   : > { %822 = vrot.lane.b32.xlu1 %v597_v20, %s10119_s30  ;;  %711 = vrot.lane.b32.xlu0 %v597_v20, %s8232_s16 }
  0xf7   : > { %932 = vrot.lane.b32.xlu1 %v597_v20, %s10115_s17  ;;  %820 = vrot.lane.b32.xlu0 %v597_v20, %s10117_s23 }
  0xfb   : > { %930 = vrot.lane.b32.xlu0 %v597_v20, %s10113_s25 }
 0x161   : > { %v601_v25 = vpop.permute.xlu0 %600  ;;  %v710_v28 = vpop.permute.xlu1 %709 }
 0x162   : > { %v607_v27 = vsel %vm602_vm2, %v601_v25, 0 }
 0x163   : > { %7651 = vmatpush3.bf16.xpose.msra.mxu1 %v607_v27 }
 0x164   : > { %7656 = vmatprep.subr.bf16.mxu1 %v8227_v13 }
 0x165   : > { %v712_v29 = vpop.permute.xlu0 %711  ;;  %v823_v33 = vpop.permute.xlu1 %822 }
 0x166   : > { %v717_v31 = vsel %vm602_vm2, %v712_v29, 0  ;;  %v828_v34 = vsel %vm602_vm2, %v823_v33, 0 }
 0x167   : > { %7663 = vmatpush3.bf16.xpose.msra.mxu0 %v717_v31 }
 0x168   : > { %7674 = vmatprep.subr.bf16.mxu0 %v8227_v13 }
 0x169   : > { %v933_v35 = vpop.permute.xlu1 %932  ;;  %v821_v36 = vpop.permute.xlu0 %820 }
 0x16a   : > { %7653 = vmatmul.mubr.msk.bf16.vlgmr.msra.gmra.mxu1 %vm602_vm2, %v597_v20  ;;  %v938_v37 = vsel %vm602_vm2, %v933_v35, 0 }
 0x16b   : > { %7657 = vmatpush3.bf16.msra.mxu1 %v667_v32  ;;  %7658 = vmatprep.mubr.msk.bf16.mxu1 %vm8228_vm1, %v8227_v13 }
 0x16c   : > { %7668 = vmatprep.subr.bf16.mxu1 %v8227_v13 }
 0x16d   : > { %v931_v38 = vpop.permute.xlu0 %930 }
 0x16e   : > { %7665 = vmatmul.mubr.msk.bf16.vlgmr.msra.gmra.mxu0 %vm602_vm2, %v710_v28 }
 0x16f   : > { %7675 = vmatpush3.bf16.xpose.msra.mxu0 %v828_v34  ;;  %7676 = vmatprep.mubr.msk.bf16.mxu0 %vm8228_vm1, %v8227_v13 }
 0x170   : > { %7686 = vmatprep.subr.bf16.mxu0 %v8227_v13 }
 0x176   : > { %7677 = vmatmul.mubr.msk.bf16.vlgmr.msra.gmra.mxu0 %vm602_vm2, %v821_v36 }
 0x177   : > { %7687 = vmatpush3.bf16.xpose.msra.mxu0 %v938_v37  ;;  %7688 = vmatprep.mubr.msk.bf16.mxu0 %vm8228_vm1, %v8227_v13 }
 0x178   : > { %7698 = vmatprep.subr.bf16.mxu0 %v8227_v13 }
 0x17e   : > { %7689 = vmatmul.mubr.msk.bf16.vlgmr.msra.gmra.mxu0 %vm602_vm2, %v931_v38 }
 0x17f   : > { %7706 = vmatprep.mubr.msk.bf16.mxu0 %vm8228_vm1, %v8227_v13 }
 0x22a   : > { %v643_v39 = vpop.f32.mrf.mxu1 }
 0x22b   : > { %v650_v40 = vsel %vm649_vm4, %v643_v39, -inf }
 0x22c   : > { %651 = vmax.xlane.f32.xlu1 %v650_v40  ;;  %v7654_v41 = vpop.f32.mrf.mxu1 }
 0x22e   : > { %v646_v42 = vpop.f32.mrf.mxu1  ;;  %v753_v43 = vpop.f32.mrf.mxu0 }
 0x22f   : > { %v759_v44 = vsel %vm649_vm4, %v753_v43, -inf }
 0x230   : > { %v7655_v45 = vpop.f32.mrf.mxu1  ;;  %760 = vmax.xlane.f32.xlu0 %v759_v44  ;;  %v7666_v46 = vpop.f32.mrf.mxu0 }
 0x231   : > { %v7843_v45 = vld [vmem:[%s10093_s3 + $0x18] sm:$0xff]  }
 0x232   : > { %v756_v47 = vpop.f32.mrf.mxu0  ;;  %7699 = vmatpush3.bf16.msra.mxu0 %v7843_v45 }
 0x233   : > { %v7844_v47 = vld [vmem:[%s10093_s3 + $0x10] sm:$0xff]   ;;  %7700 = vmatprep.subr.bf16.mxu0 %v8227_v13 }
 0x234   : > { %v7667_v48 = vpop.f32.mrf.mxu0 }
 0x236   : > { %v864_v49 = vpop.f32.mrf.mxu0  ;;  %7701 = vmatpush3.bf16.msra.mxu0 %v7844_v47 }
 0x237   : > { %v870_v50 = vsel %vm649_vm4, %v864_v49, -inf  ;;  %7702 = vmatprep.subr.bf16.mxu0 %v8227_v13 }
 0x238   : > { %871 = vmax.xlane.f32.xlu0 %v870_v50  ;;  %v7678_v51 = vpop.f32.mrf.mxu0  ;;  %v7845_v50 = vld [vmem:[%s10093_s3 + $0x8] sm:$0xff]  }
 0x23a   : > { %v867_v52 = vpop.f32.mrf.mxu0  ;;  %7703 = vmatpush3.bf16.msra.mxu0 %v7845_v50  ;;  %v1173_v50 = vld [vmem:[%s10097_s7 + $0x8] sm:$0xff] }
 0x23b   : > { %7704 = vmatprep.subr.bf16.mxu0 %v8227_v13 }
 0x23c   : > { %v7679_v53 = vpop.f32.mrf.mxu0 }
 0x23e   : > { %v974_v54 = vpop.f32.mrf.mxu0 }
 0x23f   : > { %v980_v55 = vsel %vm649_vm4, %v974_v54, -inf }
 0x240   : > { %981 = vmax.xlane.f32.xlu1 %v980_v55  ;;  %v7690_v56 = vpop.f32.mrf.mxu0 }
 0x242   : > { %v977_v57 = vpop.f32.mrf.mxu0 }
 0x243   : > { %v7846_v57 = vld [vmem:[%s10093_s3] sm:$0xff]  }
 0x244   : > { %v7691_v58 = vpop.f32.mrf.mxu0  ;;  %7705 = vmatpush3.bf16.msra.mxu0 %v7846_v57  ;;  %v1230_v57 = vld [vmem:[%s10097_s7 + $0x1d0] sm:$0xff] }
 0x2b5   : > { %v652_v59 = vpop.xlane.xlu1 %651 }
 0x2b6   : > { %v653_v60 = vsub.f32 %v643_v39, %v652_v59 }
 0x2b8   : > { %v654_v61 = vmul.f32 1.442695, %v653_v60 }
 0x2b9   : > { %v761_v62 = vpop.xlane.xlu0 %760 }
 0x2ba   : > { %8123 = vpow2.f32 %v654_v61  ;;  %v762_v63 = vsub.f32 %v753_v43, %v761_v62 }
 0x2bc   : > { %v763_v0 = vmul.f32 1.442695, %v762_v63 }
 0x2be   : > { %8125 = vpow2.f32 %v763_v0 }
 0x2c1   : > { %v872_v1 = vpop.xlane.xlu0 %871 }
 0x2c2   : > { %v873_v3 = vsub.f32 %v864_v49, %v872_v1 }
 0x2c4   : > { %v874_v4 = vmul.f32 1.442695, %v873_v3 }
 0x2c6   : > { %8127 = vpow2.f32 %v874_v4 }
 0x2c7   : > { %v8124_v5 = vpop.eup %8123 }
 0x2c8   : > { %v656_v6 = vsel %vm649_vm4, %v8124_v5, 0.0 }
 0x2c9   : > { %657 = vadd.xlane.f32.xlu0 %v656_v6  ;;  %v982_v11 = vpop.xlane.xlu1 %981  ;;  %v6459_v6 = vld [vmem:[%s10094_s4] ss:$0 sm:$0xff] }
 0x2ca   : > { %v983_v15 = vsub.f32 %v974_v54, %v982_v11 }
 0x2cb   : > { %v8126_v7 = vpop.eup %8125 }
 0x2cc   : > { %v765_v8 = vsel %vm649_vm4, %v8126_v7, 0.0  ;;  %v984_v16 = vmul.f32 1.442695, %v983_v15 }
 0x2cd   : > { %766 = vadd.xlane.f32.xlu1 %v765_v8 }
 0x2ce   : > { %8129 = vpow2.f32 %v984_v16 }
 0x2d3   : > { %v8128_v9 = vpop.eup %8127 }
 0x2d4   : > { %v876_v10 = vsel %vm649_vm4, %v8128_v9, 0.0 }
 0x2d5   : > { %877 = vadd.xlane.f32.xlu0 %v876_v10  ;;  %v8163_v10 = vld [vmem:[%s8392_s15] sm:$0xff] }
 0x2db   : > { %v8130_v17 = vpop.eup %8129 }
 0x2dc   : > { %v986_v18 = vsel %vm649_vm4, %v8130_v17, 0.0 }
 0x2de   : > { %882 = vrot.lane.b32.xlu1 %v8427_v30, %s10117_s23  ;;  %s10131_s23 = smov 96  }
 0x2eb   : > { %772 = vrot.lane.b32.xlu0 %v8427_v30, %s8229_s27 }
 0x302   : > { %987 = vadd.xlane.f32.xlu1 %v986_v18 }
 0x313   : > { %992 = vrot.lane.b32.xlu1 %v8427_v30, %s10113_s25 }
 0x352   : > { %v658_v19 = vpop.xlane.xlu0 %657 }
 0x353   : > { %8131 = vrcp.f32 %v658_v19 }
 0x356   : > { %v767_v20 = vpop.xlane.xlu1 %766 }
 0x357   : > { %8133 = vrcp.f32 %v767_v20 }
 0x35a   : > { %v883_v30 = vpop.permute.xlu1 %882 }
 0x35b   : > { %v888_v33 = vsel %vm665_vm3, %v883_v30, 0 }
 0x35e   : > { %v878_v21 = vpop.xlane.xlu0 %877 }
 0x35f   : > { %8135 = vrcp.f32 %v878_v21 }
 0x360   : > { %v8132_v22 = vpop.eup %8131 }
 0x361   : > { %v660_v24 = vmul.f32 %v8132_v22, %v8124_v5 }
 0x362   : > { %v773_v25 = vpop.permute.xlu0 %772 }
 0x363   : > { %v778_v26 = vsel %vm665_vm3, %v773_v25, 0  ;;  %v661_v27 = vpack.c.bf16 %v660_v24, %v660_v24  ;;  %v1220_v24 = vld [vmem:[%s10097_s7 + $0x180] sm:$0xff] }
 0x364   : > { %v8134_v28 = vpop.eup %8133  ;;  %v1228_v25 = vld [vmem:[%s10097_s7 + $0x1c0] sm:$0xff] }
 0x365   : > { %7659 = vmatmul.mubr.msk.bf16.vlgmr.msra.gmra.mxu1 %vm649_vm4, %v661_v27  ;;  %v769_v29 = vmul.f32 %v8134_v28, %v8126_v7  ;;  %v6516_v27 = vcombine.high %v1220_v24, %v1228_v25  ;;  %v1229_v28 = vld [vmem:[%s10097_s7 + $0x1c8] sm:$0xff] }
 0x366   : > { %7669 = vmatpush3.bf16.msra.mxu1 %v778_v26  ;;  %7670 = vmatprep.mubr.msk.bf16.mxu1 %vm8228_vm1, %v8227_v13  ;;  %v1221_v26 = vld [vmem:[%s10097_s7 + $0x188] sm:$0xff] }
 0x367   : > { %7680 = vmatprep.subr.bf16.mxu1 %v8227_v13  ;;  %v770_v31 = vpack.c.bf16 %v769_v29, %v769_v29  ;;  %v6515_v29 = vcombine.low %v1220_v24, %v1228_v25  ;;  %v6517_v30 = vcombine.low %v1221_v26, %v1229_v28  ;;  %v1199_v24 = vld [vmem:[%s10097_s7 + $0xd8] sm:$0xff] }
 0x36c   : > { %v8136_v32 = vpop.eup %8135 }
 0x36d   : > { %7671 = vmatmul.mubr.msk.bf16.vlgmr.msra.gmra.mxu1 %vm649_vm4, %v770_v31  ;;  %v880_v34 = vmul.f32 %v8136_v32, %v8128_v9  ;;  %v6518_v31 = vcombine.high %v1221_v26, %v1229_v28  ;;  %v1204_v32 = vld [vmem:[%s10097_s7 + $0x100] sm:$0xff] }
 0x36e   : > { %7681 = vmatpush3.bf16.msra.mxu1 %v888_v33  ;;  %7682 = vmatprep.mubr.msk.bf16.mxu1 %vm8228_vm1, %v8227_v13  ;;  %v1212_v33 = vld [vmem:[%s10097_s7 + $0x140] sm:$0xff] }
 0x36f   : > { %7692 = vmatprep.subr.bf16.mxu1 %v8227_v13  ;;  %v881_v35 = vpack.c.bf16 %v880_v34, %v880_v34  ;;  %1692 = vmatprep.subr.bf16.mxu0 %v6518_v31  ;;  %v1205_v34 = vld [vmem:[%s10097_s7 + $0x108] sm:$0xff]  ;;  %v1175_v31 = vld [vmem:[%s10097_s7 + $0x18] sm:$0xff] }
 0x375   : > { %7683 = vmatmul.mubr.msk.bf16.vlgmr.msra.gmra.mxu1 %vm649_vm4, %v881_v35  ;;  %v6500_v35 = vcombine.high %v1204_v32, %v1212_v33 }
 0x376   : > { %7694 = vmatprep.mubr.msk.bf16.mxu1 %vm8228_vm1, %v8227_v13 }
 0x38b   : > { %v988_v36 = vpop.xlane.xlu1 %987 }
 0x38c   : > { %8137 = vrcp.f32 %v988_v36  ;;  %v1213_v36 = vld [vmem:[%s10097_s7 + $0x148] sm:$0xff] }
 0x38f   : > { %v993_v37 = vpop.permute.xlu1 %992 }
 0x390   : > { %v998_v38 = vsel %vm665_vm3, %v993_v37, 0  ;;  %v6499_v37 = vcombine.low %v1204_v32, %v1212_v33  ;;  %v1183_v32 = vld [vmem:[%s10097_s7 + $0x58] sm:$0xff] }
 0x391   : > { %7693 = vmatpush3.bf16.msra.mxu1 %v998_v38  ;;  %v6501_v38 = vcombine.low %v1205_v34, %v1213_v36 }
 0x392   : > { %1651 = vmatprep.subr.bf16.mxu1 %v6516_v27 }
 0x399   : > { %v8138_v39 = vpop.eup %8137 }
 0x39a   : > { %v990_v40 = vmul.f32 %v8138_v39, %v8130_v17  ;;  %v6502_v39 = vcombine.high %v1205_v34, %v1213_v36  ;;  %v6474_v36 = vcombine.high %v1175_v31, %v1183_v32 }
 0x39c   : > { %v991_v41 = vpack.c.bf16 %v990_v40, %v990_v40  ;;  %v1188_v40 = vld [vmem:[%s10097_s7 + $0x80] sm:$0xff] }
 0x39e   : > { %7695 = vmatmul.mubr.msk.bf16.vlgmr.msra.gmra.mxu1 %vm649_vm4, %v991_v41  ;;  %v1196_v41 = vld [vmem:[%s10097_s7 + $0xc0] sm:$0xff] }
 0x39f   : > { %1675 = vmatprep.mubr.bf16.mxu1 %v8226_v2  ;;  %1652 = vmatpush1.bf16.msra.mxu1 %v6515_v29  ;;  %v6483_v45 = vcombine.low %v1188_v40, %v1196_v41  ;;  %v1174_v29 = vld [vmem:[%s10097_s7 + $0x10] sm:$0xff] }
 0x3a0   : > { %1653 = vmatprep.subr.bf16.mxu1 %v6500_v35 }
 0x3a3   : > { %1654 = vmatpush1.bf16.msra.mxu1 %v6499_v37  ;;  %v1224_v37 = vld [vmem:[%s10097_s7 + $0x1a0] sm:$0xff] }
 0x425   : > { %v703_v42 = vpop.f32.mrf.mxu1 }
 0x427   : > { %v7660_v43 = vpop.f32.mrf.mxu1 }
 0x428   : > { %v6484_v43 = vcombine.high %v1188_v40, %v1196_v41  ;;  %v1233_v40 = vld [vmem:[%s10097_s7 + $0x1e8] sm:$0xff] }
 0x429   : > { %v706_v44 = vpop.f32.mrf.mxu1 }
 0x42a   : > { %v1197_v44 = vld [vmem:[%s10097_s7 + $0xc8] sm:$0xff]  ;;  %1655 = vmatprep.subr.bf16.mxu1 %v6484_v43 }
 0x42b   : > { %v7661_v46 = vpop.f32.mrf.mxu1  ;;  %1656 = vmatpush1.bf16.msra.mxu1 %v6483_v45  ;;  %v1208_v45 = vld [vmem:[%s10097_s7 + $0x120] sm:$0xff] }
 0x42d   : > { %v814_v48 = vpop.f32.mrf.mxu1 }
 0x42e   : > { %1041 = vrot.lane.b32.xlu0 %v814_v48, %s10115_s17  ;;  %v1172_v48 = vld [vmem:[%s10097_s7] sm:$0xff]  ;;  %s10132_s17 = smov 16  }
 0x42f   : > { %v7672_v49 = vpop.f32.mrf.mxu1 }
 0x430   : > { %v1180_v49 = vld [vmem:[%s10097_s7 + $0x40] sm:$0xff] }
 0x431   : > { %v817_v51 = vpop.f32.mrf.mxu1 }
 0x432   : > { %v6468_v51 = vcombine.high %v1172_v48, %v1180_v49 }
 0x433   : > { %v7673_v52 = vpop.f32.mrf.mxu1 }
 0x434   : > { %v1181_v52 = vld [vmem:[%s10097_s7 + $0x48] sm:$0xff]  ;;  %1657 = vmatprep.subr.bf16.mxu1 %v6468_v51 }
 0x435   : > { %v924_v53 = vpop.f32.mrf.mxu1 }
 0x436   : > { %1045 = vrot.lane.b32.xlu1 %v924_v53, %s10119_s30  ;;  %v6467_v53 = vcombine.low %v1172_v48, %v1180_v49  ;;  %v1217_v48 = vld [vmem:[%s10097_s7 + $0x168] sm:$0xff]  ;;  %s10130_s30 = smov 32  }
 0x437   : > { %v7684_v54 = vpop.f32.mrf.mxu1 }
 0x438   : > { %v6469_v54 = vcombine.low %v1173_v50, %v1181_v52  ;;  %1658 = vmatpush1.bf16.msra.mxu1 %v6467_v53  ;;  %v1192_v53 = vld [vmem:[%s10097_s7 + $0xa0] sm:$0xff] }
 0x439   : > { %v927_v55 = vpop.f32.mrf.mxu1 }
 0x43a   : > { %v6470_v55 = vcombine.high %v1173_v50, %v1181_v52 }
 0x43b   : > { %v7685_v56 = vpop.f32.mrf.mxu1 }
 0x43c   : > { %v1222_v56 = vld [vmem:[%s10097_s7 + $0x190] sm:$0xff] }
 0x45e   : > { %v1034_v58 = vpop.f32.mrf.mxu1 }
 0x45f   : > { %1049 = vrot.lane.b32.xlu0 %v1034_v58, %s8232_s16  ;;  %v1223_v58 = vld [vmem:[%s10097_s7 + $0x198] sm:$0xff] }
 0x460   : > { %v7696_v59 = vpop.f32.mrf.mxu1 }
 0x461   : > { %v6519_v59 = vcombine.low %v1222_v56, %v1230_v57 }
 0x462   : > { %v1037_v60 = vpop.f32.mrf.mxu1 }
 0x463   : > { %v6520_v60 = vcombine.high %v1222_v56, %v1230_v57  ;;  %v1201_v56 = vld [vmem:[%s10097_s7 + $0xe8] sm:$0xff] }
 0x464   : > { %v7697_v61 = vpop.f32.mrf.mxu1 }
 0x465   : > { %v1231_v61 = vld [vmem:[%s10097_s7 + $0x1d8] sm:$0xff]  ;;  %1733 = vmatprep.subr.bf16.mxu1 %v6520_v60 }
 0x4a0   : > { %v1042_v62 = vpop.permute.xlu0 %1041 }
 0x4a1   : > { %v1052_v0 = vsel %vm602_vm2, %v703_v42, %v1042_v62  ;;  %v1189_v42 = vld [vmem:[%s10097_s7 + $0x88] sm:$0xff]  ;;  %v6521_v62 = vcombine.low %v1223_v58, %v1231_v61 }
 0x4a2   : > { %v6485_v46 = vcombine.low %v1189_v42, %v1197_v44  ;;  %v6486_v47 = vcombine.high %v1189_v42, %v1197_v44  ;;  %v6473_v42 = vcombine.low %v1175_v31, %v1183_v32  ;;  %v1203_v31 = vld [vmem:[%s10097_s7 + $0xf8] sm:$0xff] }
 0x4a8   : > { %v1046_v63 = vpop.permute.xlu1 %1045 }
 0x4a9   : > { %v1054_v1 = vsel %vm1053_vm5, %v1052_v0, %v1046_v63  ;;  %v6522_v63 = vcombine.high %v1223_v58, %v1231_v61  ;;  %v1176_v61 = vld [vmem:[%s10097_s7 + $0x20] sm:$0xff] }
 0x4d1   : > { %v1050_v3 = vpop.permute.xlu0 %1049 }
 0x4d2   : > { %v1056_v4 = vsel %vm1055_vm6, %v1054_v1, %v1050_v3 }
 0x4d3   : > { %v1057_v5 = vpack.c.bf16 %v1056_v4, %v1056_v4 }
 0x4d5   : > { %7707 = vmatmul.mubr.msk.bf16.vlgmr.msra.gmra.mxu0 %vm552_vm0, %v1057_v5  ;;  %v6465_v5 = vld [vmem:[%s10095_s5] ss:$0 sm:$0xff] }
 0x4d6   : > { %1716 = vmatprep.mubr.bf16.mxu0 %v8226_v2  ;;  %1693 = vmatpush1.bf16.msra.mxu0 %v6517_v30  ;;  %v1182_v30 = vld [vmem:[%s10097_s7 + $0x50] sm:$0xff] }
 0x4d7   : > { %1694 = vmatprep.subr.bf16.mxu0 %v6502_v39  ;;  %v6472_v35 = vcombine.high %v1174_v29, %v1182_v30  ;;  %v1225_v39 = vld [vmem:[%s10097_s7 + $0x1a8] sm:$0xff]  ;;  %v6471_v41 = vcombine.low %v1174_v29, %v1182_v30  ;;  %v1202_v29 = vld [vmem:[%s10097_s7 + $0xf0] sm:$0xff]  ;;  %v1195_v30 = vld [vmem:[%s10097_s7 + $0xb8] sm:$0xff] }
 0x4d8   : > { %v6526_v44 = vcombine.high %v1225_v39, %v1233_v40  ;;  %v6525_v50 = vcombine.low %v1225_v39, %v1233_v40  ;;  %v1187_v39 = vld [vmem:[%s10097_s7 + $0x78] sm:$0xff] }
 0x4da   : > { %1695 = vmatpush1.bf16.msra.mxu0 %v6501_v38  ;;  %v1232_v38 = vld [vmem:[%s10097_s7 + $0x1e0] sm:$0xff] }
 0x4db   : > { %1696 = vmatprep.subr.bf16.mxu0 %v6486_v47  ;;  %v6524_v43 = vcombine.high %v1224_v37, %v1232_v38  ;;  %v1209_v47 = vld [vmem:[%s10097_s7 + $0x128] sm:$0xff]  ;;  %v6523_v49 = vcombine.low %v1224_v37, %v1232_v38  ;;  %v1186_v37 = vld [vmem:[%s10097_s7 + $0x70] sm:$0xff]  ;;  %v1179_v38 = vld [vmem:[%s10097_s7 + $0x38] sm:$0xff] }
 0x4dc   : > { %v6510_v52 = vcombine.high %v1209_v47, %v1217_v48  ;;  %v6509_v58 = vcombine.low %v1209_v47, %v1217_v48  ;;  %v7848_v47 = vld [vmem:[%s10099_s9 + $0xf8] sm:$0xff]  }
 0x4dd   : > { %v7849_v48 = vld [vmem:[%s10099_s9 + $0x38] sm:$0xff]  }
 0x4de   : > { %1697 = vmatpush1.bf16.msra.mxu0 %v6485_v46  ;;  %v1216_v46 = vld [vmem:[%s10097_s7 + $0x160] sm:$0xff] }
 0x4df   : > { %1698 = vmatprep.subr.bf16.mxu0 %v6470_v55  ;;  %v6508_v51 = vcombine.high %v1208_v45, %v1216_v46  ;;  %v1193_v55 = vld [vmem:[%s10097_s7 + $0xa8] sm:$0xff]  ;;  %v6507_v57 = vcombine.low %v1208_v45, %v1216_v46  ;;  %v6481_v45 = vcombine.low %v1179_v38, %v1187_v39  ;;  %v7847_v46 = vld [vmem:[%s10099_s9 + $0x78] sm:$0xff]  }
 0x4e0   : > { %v6494_v60 = vcombine.high %v1193_v55, %v1201_v56 }
 0x4e2   : > { %1699 = vmatpush1.bf16.msra.mxu0 %v6469_v54  ;;  %v1200_v54 = vld [vmem:[%s10097_s7 + $0xe0] sm:$0xff] }
 0x4e3   : > { %1774 = vmatprep.subr.bf16.mxu0 %v6522_v63  ;;  %v1177_v63 = vld [vmem:[%s10097_s7 + $0x28] sm:$0xff] }
 0x595   : > { %v1134_v7 = vpop.f32.mrf.mxu0 }
 0x596   : > { %v1135_v8 = vadd.f32 %v6459_v6, %v1134_v7  ;;  %v6466_v7 = vld [vmem:[%s10096_s6] ss:$0 sm:$0xff] }
 0x597   : > { %v7708_v9 = vpop.f32.mrf.mxu0 }
 0x598   : > { %v1140_v11 = vadd.f32 %v8163_v10, %v1135_v8  ;;  %v1206_v9 = vld [vmem:[%s10097_s7 + $0x110] sm:$0xff] }
 0x599   : > { %v1137_v15 = vpop.f32.mrf.mxu0  ;;  %v1214_v10 = vld [vmem:[%s10097_s7 + $0x150] sm:$0xff] }
 0x59a   : > { %v1143_v16 = vsel %vm552_vm0, %v1140_v11, 0.0  ;;  %v1215_v15 = vld [vmem:[%s10097_s7 + $0x158] sm:$0xff]  ;;  %v6503_v25 = vcombine.low %v1206_v9, %v1214_v10 }
 0x59b   : > { %1144 = vadd.xlane.f32.xlu1 %v1143_v16  ;;  %v7709_v17 = vpop.f32.mrf.mxu0 }
 0x624   : > { %v1145_v18 = vpop.xlane.xlu1 %1144 }
 0x625   : > { %v1147_v19 = vmul.f32 0.015625, %v1145_v18  ;;  %v6504_v18 = vcombine.high %v1206_v9, %v1214_v10  ;;  %v1235_v9 = vld [vmem:[%s10097_s7 + $0x1f8] sm:$0xff] }
 0x627   : > { %v8508_v20 = vsub.f32 %v1140_v11, %v1147_v19  ;;  %v1207_v11 = vld [vmem:[%s10097_s7 + $0x118] sm:$0xff] }
 0x628   : > { %v6506_v19 = vcombine.high %v1207_v11, %v1215_v15  ;;  %v6505_v26 = vcombine.low %v1207_v11, %v1215_v15 }
 0x629   : > { %v1149_v21 = vmul.f32 %v8508_v20, %v8508_v20 }
 0x62b   : > { %v1150_v22 = vsel %vm552_vm0, %v1149_v21, 0.0  ;;  %v1198_v21 = vld [vmem:[%s10097_s7 + $0xd0] sm:$0xff] }
 0x62c   : > { %1151 = vadd.xlane.f32.xlu0 %v1150_v22  ;;  %v1191_v22 = vld [vmem:[%s10097_s7 + $0x98] sm:$0xff] }
 0x62d   : > { %v6490_v28 = vcombine.high %v1191_v22, %v1199_v24  ;;  %v6489_v34 = vcombine.low %v1191_v22, %v1199_v24  ;;  %v1219_v22 = vld [vmem:[%s10097_s7 + $0x178] sm:$0xff] }
 0x6b5   : > { %v1152_v0 = vpop.xlane.xlu0 %1151 }
 0x6b6   : > { %v1153_v1 = vmul.f32 0.015625, %v1152_v0  ;;  %v1185_v0 = vld [vmem:[%s10097_s7 + $0x68] sm:$0xff] }
 0x6b7   : > { %v6477_v11 = vcombine.low %v1177_v63, %v1185_v0 }
 0x6b8   : > { %v1154_v3 = vadd.f32 1e-05, %v1153_v1  ;;  %v6491_v1 = vcombine.low %v1192_v53, %v1200_v54 }
 0x6ba   : > { %8139 = vrsqrt.f32 %v1154_v3  ;;  %v6493_v3 = vcombine.low %v1193_v55, %v1201_v56  ;;  %v7857_v55 = vld [vmem:[%s10099_s9 + $0x28] sm:$0xff]  }
 0x6bb   : > { %v7858_v56 = vld [vmem:[%s10099_s9 + $0xa8] sm:$0xff]  }
 0x6c7   : > { %v8140_v4 = vpop.eup %8139 }
 0x6c8   : > { %v1156_v6 = vmul.f32 %v8140_v4, %v8508_v20  ;;  %v1190_v20 = vld [vmem:[%s10097_s7 + $0x90] sm:$0xff] }
 0x6c9   : > { %v6488_v27 = vcombine.high %v1190_v20, %v1198_v21  ;;  %v6487_v33 = vcombine.low %v1190_v20, %v1198_v21  ;;  %v1218_v20 = vld [vmem:[%s10097_s7 + $0x170] sm:$0xff]  ;;  %v1211_v21 = vld [vmem:[%s10097_s7 + $0x138] sm:$0xff] }
 0x6ca   : > { %v1163_v8 = vmul.f32 %v6465_v5, %v1156_v6  ;;  %v6478_v5 = vcombine.high %v1177_v63, %v1185_v0  ;;  %v1226_v6 = vld [vmem:[%s10097_s7 + $0x1b0] sm:$0xff]  ;;  %v7865_v63 = vld [vmem:[%s10099_s9 + $0x18] sm:$0xff]  }
 0x6cb   : > { %v7866_v0 = vld [vmem:[%s10099_s9 + $0x98] sm:$0xff]  }
 0x6cc   : > { %v8592_v16 = vadd.f32 %v6466_v7, %v1163_v8  ;;  %v1234_v7 = vld [vmem:[%s10097_s7 + $0x1f0] sm:$0xff]  ;;  %v1227_v8 = vld [vmem:[%s10097_s7 + $0x1b8] sm:$0xff] }
 0x6cd   : > { %v6528_v15 = vcombine.high %v1226_v6, %v1234_v7  ;;  %v6527_v24 = vcombine.low %v1226_v6, %v1234_v7  ;;  %v7871_v6 = vld [vmem:[%s10099_s9 + $0x48] sm:$0xff]  }
 0x6ce   : > { %v8596_v17 = vpack.c.bf16 %v8592_v16, %v8592_v16  ;;  %v7872_v7 = vld [vmem:[%s10099_s9 + $0xc8] sm:$0xff]  }
 0x6d0   : > { %6531 = vmatmul.mubr.msk.bf16.vlgmr.msra.gmra.mxu1 %vm552_vm0, %v8596_v17  ;;  %6532 = vmatmul.mubr.msk.bf16.vlgmr.msra.gmra.mxu0 %vm552_vm0, %v8596_v17 }
 0x6d1   : > { %1734 = vmatpush1.bf16.msra.mxu1 %v6519_v59  ;;  %1775 = vmatpush1.bf16.msra.mxu0 %v6521_v62  ;;  %v6492_v59 = vcombine.high %v1192_v53, %v1200_v54  ;;  %v1184_v62 = vld [vmem:[%s10097_s7 + $0x60] sm:$0xff]  ;;  %v7854_v53 = vld [vmem:[%s10099_s9 + $0xb0] sm:$0xff]   ;;  %v7855_v54 = vld [vmem:[%s10099_s9 + $0x68] sm:$0xff]  }
 0x6d2   : > { %1735 = vmatprep.subr.bf16.mxu1 %v6504_v18  ;;  %1776 = vmatprep.subr.bf16.mxu0 %v6506_v19  ;;  %v6476_v4 = vcombine.high %v1176_v61, %v1184_v62  ;;  %v6475_v10 = vcombine.low %v1176_v61, %v1184_v62  ;;  %v6530_v18 = vcombine.high %v1227_v8, %v1235_v9  ;;  %v1210_v19 = vld [vmem:[%s10097_s7 + $0x130] sm:$0xff]  ;;  %v7863_v61 = vld [vmem:[%s10099_s9 + $0x58] sm:$0xff]  }
 0x6d3   : > { %1757 = vmatprep.mubr.bf16.mxu1 %v8226_v2  ;;  %1798 = vmatprep.mubr.bf16.mxu0 %v8226_v2  ;;  %v6511_v32 = vcombine.low %v1210_v19, %v1218_v20  ;;  %v7864_v62 = vld [vmem:[%s10099_s9 + $0xd8] sm:$0xff]  }
 0x6d5   : > { %1736 = vmatpush1.bf16.msra.mxu1 %v6503_v25  ;;  %1777 = vmatpush1.bf16.msra.mxu0 %v6505_v26  ;;  %v6529_v25 = vcombine.low %v1227_v8, %v1235_v9  ;;  %v6512_v26 = vcombine.high %v1210_v19, %v1218_v20  ;;  %v7873_v8 = vld [vmem:[%s10099_s9 + $0x8] sm:$0xff]   ;;  %v7879_v19 = vld [vmem:[%s10099_s9 + $0x178] sm:$0xff]  }
 0x6d6   : > { %1737 = vmatprep.subr.bf16.mxu1 %v6488_v27  ;;  %1778 = vmatprep.subr.bf16.mxu0 %v6490_v28  ;;  %v6514_v27 = vcombine.high %v1211_v21, %v1219_v22  ;;  %v1194_v28 = vld [vmem:[%s10097_s7 + $0xb0] sm:$0xff]  ;;  %v7874_v9 = vld [vmem:[%s10099_s9 + $0x88] sm:$0xff]   ;;  %v7880_v20 = vld [vmem:[%s10099_s9 + $0x1f8] sm:$0xff]  }
 0x6d7   : > { %v6495_v40 = vcombine.low %v1194_v28, %v1202_v29 }
 0x6d9   : > { %1738 = vmatpush1.bf16.msra.mxu1 %v6487_v33  ;;  %1779 = vmatpush1.bf16.msra.mxu0 %v6489_v34  ;;  %v6513_v33 = vcombine.low %v1211_v21, %v1219_v22  ;;  %v6496_v34 = vcombine.high %v1194_v28, %v1202_v29  ;;  %v8843_v21 = vsub.s32 2, %v8399_v12  ;;  %v8848_v22 = vld [vmem:[%s10098_s8] sm:$0xff] }
 0x6da   : > { %1739 = vmatprep.subr.bf16.mxu1 %v6472_v35  ;;  %1780 = vmatprep.subr.bf16.mxu0 %v6474_v36  ;;  %v6498_v35 = vcombine.high %v1195_v30, %v1203_v31  ;;  %v1178_v36 = vld [vmem:[%s10097_s7 + $0x30] sm:$0xff] }
 0x6dd   : > { %1740 = vmatpush1.bf16.msra.mxu1 %v6471_v41  ;;  %1781 = vmatpush1.bf16.msra.mxu0 %v6473_v42  ;;  %v6497_v41 = vcombine.low %v1195_v30, %v1203_v31  ;;  %v6480_v42 = vcombine.high %v1178_v36, %v1186_v37 }
 0x6de   : > { %1815 = vmatprep.subr.bf16.mxu1 %v6524_v43  ;;  %1856 = vmatprep.subr.bf16.mxu0 %v6526_v44  ;;  %v6482_v43 = vcombine.high %v1179_v38, %v1187_v39  ;;  %v6479_v44 = vcombine.low %v1178_v36, %v1186_v37 }
 0x6e0   : > { %6533 = vmatmul.mubr.msk.bf16.vlgmr.msra.gmra.mxu1 %vm552_vm0, %v8596_v17  ;;  %6534 = vmatmul.mubr.msk.bf16.vlgmr.msra.gmra.mxu0 %vm552_vm0, %v8596_v17 }
 0x6e1   : > { %1816 = vmatpush1.bf16.msra.mxu1 %v6523_v49  ;;  %1857 = vmatpush1.bf16.msra.mxu0 %v6525_v50  ;;  %v7850_v49 = vld [vmem:[%s10099_s9 + $0xb8] sm:$0xff]   ;;  %v7851_v50 = vld [vmem:[%s10099_s9 + $0x70] sm:$0xff]  }
 0x6e2   : > { %1817 = vmatprep.subr.bf16.mxu1 %v6508_v51  ;;  %1858 = vmatprep.subr.bf16.mxu0 %v6510_v52  ;;  %v7852_v51 = vld [vmem:[%s10099_s9 + $0xf0] sm:$0xff]  }
 0x6e3   : > { %1839 = vmatprep.mubr.bf16.mxu1 %v8226_v2  ;;  %1880 = vmatprep.mubr.bf16.mxu0 %v8226_v2  ;;  %v7853_v52 = vld [vmem:[%s10099_s9 + $0x30] sm:$0xff]  }
 0x6e5   : > { %1818 = vmatpush1.bf16.msra.mxu1 %v6507_v57  ;;  %1859 = vmatpush1.bf16.msra.mxu0 %v6509_v58  ;;  %v7859_v57 = vld [vmem:[%s10099_s9 + $0x60] sm:$0xff]  }
 0x6e6   : > { %1819 = vmatprep.subr.bf16.mxu1 %v6492_v59  ;;  %1860 = vmatprep.subr.bf16.mxu0 %v6494_v60  ;;  %v7860_v58 = vld [vmem:[%s10099_s9 + $0xe0] sm:$0xff]  }
 0x6e7   : > { %v7861_v59 = vld [vmem:[%s10099_s9 + $0x20] sm:$0xff]  }
 0x6e8   : > { %v7862_v60 = vld [vmem:[%s10099_s9 + $0xa0] sm:$0xff]  }
 0x6e9   : > { %1820 = vmatpush1.bf16.msra.mxu1 %v6491_v1  ;;  %1861 = vmatpush1.bf16.msra.mxu0 %v6493_v3  ;;  %v7867_v1 = vld [vmem:[%s10099_s9 + $0x50] sm:$0xff]  }
 0x6ea   : > { %1821 = vmatprep.subr.bf16.mxu1 %v6476_v4  ;;  %1862 = vmatprep.subr.bf16.mxu0 %v6478_v5  ;;  %v7868_v3 = vld [vmem:[%s10099_s9 + $0xd0] sm:$0xff]  }
 0x6eb   : > { %v7869_v4 = vld [vmem:[%s10099_s9 + $0x10] sm:$0xff]  }
 0x6ec   : > { %v7870_v5 = vld [vmem:[%s10099_s9 + $0x90] sm:$0xff]  }
 0x6ed   : > { %1822 = vmatpush1.bf16.msra.mxu1 %v6475_v10  ;;  %1863 = vmatpush1.bf16.msra.mxu0 %v6477_v11  ;;  %v7875_v10 = vld [vmem:[%s10099_s9 + $0x40] sm:$0xff]  }
 0x6ee   : > { %1897 = vmatprep.subr.bf16.mxu1 %v6528_v15  ;;  %1938 = vmatprep.subr.bf16.mxu0 %v6530_v18  ;;  %v7876_v11 = vld [vmem:[%s10099_s9 + $0xc0] sm:$0xff]  }
 0x6ef   : > { %v7877_v15 = vld [vmem:[%s10099_s9] sm:$0xff]  }
 0x6f0   : > { %6535 = vmatmul.mubr.msk.bf16.vlgmr.msra.gmra.mxu1 %vm552_vm0, %v8596_v17  ;;  %6536 = vmatmul.mubr.msk.bf16.vlgmr.msra.gmra.mxu0 %vm552_vm0, %v8596_v17  ;;  %v7878_v18 = vld [vmem:[%s10099_s9 + $0x80] sm:$0xff]  }
 0x6f1   : > { %1898 = vmatpush1.bf16.msra.mxu1 %v6527_v24  ;;  %1939 = vmatpush1.bf16.msra.mxu0 %v6529_v25  ;;  %v8851_v24 = vsub.s32 3, %v8399_v12  ;;  %v1243_v25 = vrot.slane %v8848_v22, %v8404_v14 }
 0x6f2   : > { %1899 = vmatprep.subr.bf16.mxu1 %v6512_v26  ;;  %1940 = vmatprep.subr.bf16.mxu0 %v6514_v27  ;;  %v1251_v26 = vrot.slane %v8848_v22, %v8843_v21  ;;  %v1247_v27 = vrot.slane %v8848_v22, %v8422_v23 }
 0x6f3   : > { %1921 = vmatprep.mubr.bf16.mxu1 %v8226_v2  ;;  %1962 = vmatprep.mubr.bf16.mxu0 %v8226_v2  ;;  %v1255_v28 = vrot.slane %v8848_v22, %v8851_v24 }
 0x6f5   : > { %1900 = vmatpush1.bf16.msra.mxu1 %v6511_v32  ;;  %1941 = vmatpush1.bf16.msra.mxu0 %v6513_v33 }
 0x6f6   : > { %1901 = vmatprep.subr.bf16.mxu1 %v6496_v34  ;;  %1942 = vmatprep.subr.bf16.mxu0 %v6498_v35 }
 0x6f9   : > { %1902 = vmatpush1.bf16.msra.mxu1 %v6495_v40  ;;  %1943 = vmatpush1.bf16.msra.mxu0 %v6497_v41 }
 0x6fa   : > { %1903 = vmatprep.subr.bf16.mxu1 %v6480_v42  ;;  %1944 = vmatprep.subr.bf16.mxu0 %v6482_v43 }
 0x6fd   : > { %1904 = vmatpush1.bf16.msra.mxu1 %v6479_v44  ;;  %1945 = vmatpush1.bf16.msra.mxu0 %v6481_v45 }
 0x6fe   : > { %7272 = vmatprep.subr.bf16.mxu1 %v7847_v46  ;;  %7294 = vmatprep.subr.bf16.mxu0 %v7848_v47  ;;  %v7881_v47 = vld [vmem:[%s10099_s9 + $0x138] sm:$0xff]  }
 0x700   : > { %6537 = vmatmul.mubr.msk.bf16.vlgmr.msra.gmra.mxu1 %vm552_vm0, %v8596_v17  ;;  %6538 = vmatmul.mubr.msk.bf16.vlgmr.msra.gmra.mxu0 %vm552_vm0, %v8596_v17  ;;  %v7856_v17 = vld [vmem:[%s10099_s9 + $0xe8] sm:$0xff]  }
 0x701   : > { %7273 = vmatpush3.bf16.msra.mxu1 %v7849_v48  ;;  %7295 = vmatpush3.bf16.msra.mxu0 %v7850_v49  ;;  %v7882_v48 = vld [vmem:[%s10099_s9 + $0x1b8] sm:$0xff]  }
 0x702   : > { %7274 = vmatprep.subr.bf16.mxu1 %v7851_v50  ;;  %7296 = vmatprep.subr.bf16.mxu0 %v7852_v51  ;;  %v7883_v51 = vld [vmem:[%s10099_s9 + $0x170] sm:$0xff]  }
 0x705   : > { %7275 = vmatpush3.bf16.msra.mxu1 %v7853_v52  ;;  %7297 = vmatpush3.bf16.msra.mxu0 %v7854_v53  ;;  %v7884_v52 = vld [vmem:[%s10099_s9 + $0x1f0] sm:$0xff]  }
 0x706   : > { %7276 = vmatprep.subr.bf16.mxu1 %v7855_v54  ;;  %7298 = vmatprep.subr.bf16.mxu0 %v7856_v17  ;;  %v7885_v53 = vld [vmem:[%s10099_s9 + $0x130] sm:$0xff]   ;;  %v8880_v17 = vsub.s32 5, %v8399_v12 }
 0x707   : > { %v7886_v54 = vld [vmem:[%s10099_s9 + $0x1b0] sm:$0xff]  }
 0x709   : > { %7277 = vmatpush3.bf16.msra.mxu1 %v7857_v55  ;;  %7299 = vmatpush3.bf16.msra.mxu0 %v7858_v56  ;;  %v8883_v55 = vsub.s32 7, %v8399_v12  ;;  %v7887_v56 = vld [vmem:[%s10099_s9 + $0x168] sm:$0xff]  }
 0x70a   : > { %7278 = vmatprep.subr.bf16.mxu1 %v7859_v57  ;;  %7300 = vmatprep.subr.bf16.mxu0 %v7860_v58  ;;  %v7888_v57 = vld [vmem:[%s10099_s9 + $0x1e8] sm:$0xff]   ;;  %v1263_v58 = vrot.slane %v8848_v22, %v8880_v17 }
 0x70d   : > { %7279 = vmatpush3.bf16.msra.mxu1 %v7861_v59  ;;  %7301 = vmatpush3.bf16.msra.mxu0 %v7862_v60  ;;  %v1271_v59 = vrot.slane %v8848_v22, %v8883_v55  ;;  %v7889_v60 = vld [vmem:[%s10099_s9 + $0x128] sm:$0xff]  }
 0x70e   : > { %7280 = vmatprep.subr.bf16.mxu1 %v7863_v61  ;;  %7302 = vmatprep.subr.bf16.mxu0 %v7864_v62  ;;  %v7890_v61 = vld [vmem:[%s10099_s9 + $0x1a8] sm:$0xff]  }
 0x711   : > { %7281 = vmatpush3.bf16.msra.mxu1 %v7865_v63  ;;  %7303 = vmatpush3.bf16.msra.mxu0 %v7866_v0  ;;  %v7891_v0 = vld [vmem:[%s10099_s9 + $0x160] sm:$0xff]  }
 0x712   : > { %7282 = vmatprep.subr.bf16.mxu1 %v7867_v1  ;;  %7304 = vmatprep.subr.bf16.mxu0 %v7868_v3  ;;  %v7892_v1 = vld [vmem:[%s10099_s9 + $0x1e0] sm:$0xff]  }
 0x715   : > { %7283 = vmatpush3.bf16.msra.mxu1 %v7869_v4  ;;  %7305 = vmatpush3.bf16.msra.mxu0 %v7870_v5 }
 0x716   : > { %7284 = vmatprep.subr.bf16.mxu1 %v7871_v6  ;;  %7306 = vmatprep.subr.bf16.mxu0 %v7872_v7  ;;  %v7893_v7 = vld [vmem:[%s10099_s9 + $0x120] sm:$0xff]  }
 0x719   : > { %7285 = vmatpush3.bf16.msra.mxu1 %v7873_v8  ;;  %7307 = vmatpush3.bf16.msra.mxu0 %v7874_v9  ;;  %v7894_v8 = vld [vmem:[%s10099_s9 + $0x1a0] sm:$0xff]  }
 0x71a   : > { %7286 = vmatprep.subr.bf16.mxu1 %v7875_v10  ;;  %7308 = vmatprep.subr.bf16.mxu0 %v7876_v11  ;;  %v7895_v11 = vld [vmem:[%s10099_s9 + $0x158] sm:$0xff]  }
 0x71d   : > { %7287 = vmatpush3.bf16.msra.mxu1 %v7877_v15  ;;  %7309 = vmatpush3.bf16.msra.mxu0 %v7878_v18  ;;  %v7896_v15 = vld [vmem:[%s10099_s9 + $0x1d8] sm:$0xff]  }
 0x71e   : > { %7316 = vmatprep.subr.bf16.mxu1 %v7879_v19  ;;  %7338 = vmatprep.subr.bf16.mxu0 %v7880_v20 }
 0x790   : > { %v1677_v29 = vpop.f32.mrf.mxu1  ;;  %v1718_v30 = vpop.f32.mrf.mxu0 }
 0x791   : > { %v1678_v31 = vadd.f32 %v1677_v29, %v1243_v25  ;;  %v1719_v32 = vadd.f32 %v1718_v30, %v1251_v26  ;;  %v7898_v29 = vld [vmem:[%s10099_s9 + $0x198] sm:$0xff]   ;;  %v8926_v30 = vsub.s32 4, %v8399_v12 }
 0x792   : > { %v1679_v33 = vpop.f32.mrf.mxu1  ;;  %v1720_v34 = vpop.f32.mrf.mxu0 }
 0x793   : > { %v1680_v35 = vadd.f32 %v1679_v33, %v1247_v27  ;;  %v1721_v36 = vadd.f32 %v1720_v34, %v1255_v28  ;;  %v1971_v37 = vmax.f32 %v1678_v31, 0.0  ;;  %v1973_v38 = vmax.f32 %v1719_v32, 0.0  ;;  %v7897_v28 = vld [vmem:[%s10099_s9 + $0x118] sm:$0xff]   ;;  %v7899_v32 = vld [vmem:[%s10099_s9 + $0x150] sm:$0xff]  }
 0x794   : > { %v1681_v39 = vpop.f32.mrf.mxu1  ;;  %v1722_v40 = vpop.f32.mrf.mxu0  ;;  %v8929_v31 = vsub.s32 6, %v8399_v12  ;;  %v7900_v33 = vld [vmem:[%s10099_s9 + $0x1d0] sm:$0xff]  }
 0x795   : > { %v1972_v41 = vmax.f32 %v1680_v35, 0.0  ;;  %v1974_v42 = vmax.f32 %v1721_v36, 0.0  ;;  %v1987_v49 = vpack.c.bf16 %v1971_v37, %v1971_v37  ;;  %v1989_v50 = vpack.c.bf16 %v1973_v38, %v1973_v38  ;;  %v7901_v34 = vld [vmem:[%s10099_s9 + $0x110] sm:$0xff]   ;;  %v7903_v37 = vld [vmem:[%s10099_s9 + $0x148] sm:$0xff]  }
 0x796   : > { %v1682_v43 = vpop.f32.mrf.mxu1  ;;  %v1723_v44 = vpop.f32.mrf.mxu0  ;;  %v7902_v12 = vld [vmem:[%s10099_s9 + $0x190] sm:$0xff]   ;;  %v1259_v35 = vrot.slane %v8848_v22, %v8926_v30  ;;  %v1267_v36 = vrot.slane %v8848_v22, %v8929_v31  ;;  %v7904_v38 = vld [vmem:[%s10099_s9 + $0x1c8] sm:$0xff]  }
 0x797   : > { %v1988_v45 = vpack.c.bf16 %v1972_v41, %v1972_v41  ;;  %v1990_v46 = vpack.c.bf16 %v1974_v42, %v1974_v42  ;;  %v8956_v39 = vld [vmem:[%s10098_s8 + $0x8] sm:$0xff] }
 0x798   : > { %v1279_v22 = vrot.slane %v8956_v39, %v8422_v23  ;;  %v1287_v40 = vrot.slane %v8956_v39, %v8851_v24  ;;  %v7905_v41 = vld [vmem:[%s10099_s9 + $0x108] sm:$0xff]  }
 0x799   : > { %3066 = vmatprep.mubr.bf16.mxu1 %v1988_v45  ;;  %3106 = vmatprep.mubr.bf16.mxu0 %v1990_v46  ;;  %v7906_v42 = vld [vmem:[%s10099_s9 + $0x188] sm:$0xff]  }
 0x79a   : > { %3067 = vmatmul.mubr.bf16.vlgmr.msra.gmra.mxu1 %v1987_v49  ;;  %3107 = vmatmul.mubr.bf16.vlgmr.msra.gmra.mxu0 %v1989_v50 }
 0x79b   : > { %7317 = vmatpush3.bf16.msra.mxu1 %v7881_v47  ;;  %7339 = vmatpush3.bf16.msra.mxu0 %v7882_v48  ;;  %v7907_v47 = vld [vmem:[%s10099_s9 + $0x140] sm:$0xff]  }
 0x79c   : > { %7318 = vmatprep.subr.bf16.mxu1 %v7883_v51  ;;  %7340 = vmatprep.subr.bf16.mxu0 %v7884_v52  ;;  %v7908_v48 = vld [vmem:[%s10099_s9 + $0x1c0] sm:$0xff]  }
 0x79f   : > { %7319 = vmatpush3.bf16.msra.mxu1 %v7885_v53  ;;  %7341 = vmatpush3.bf16.msra.mxu0 %v7886_v54  ;;  %v7909_v53 = vld [vmem:[%s10099_s9 + $0x100] sm:$0xff]  }
 0x7a0   : > { %v1759_v62 = vpop.f32.mrf.mxu1  ;;  %v1800_v63 = vpop.f32.mrf.mxu0  ;;  %7320 = vmatprep.subr.bf16.mxu1 %v7887_v56  ;;  %7342 = vmatprep.subr.bf16.mxu0 %v7888_v57  ;;  %v7910_v54 = vld [vmem:[%s10099_s9 + $0x180] sm:$0xff]  }
 0x7a1   : > { %v1760_v43 = vadd.f32 %v1759_v62, %v1259_v35  ;;  %v1801_v44 = vadd.f32 %v1800_v63, %v1267_v36  ;;  %v7926_v36 = vld [vmem:[%s10099_s9 + $0x2a0] sm:$0xff]  }
 0x7a2   : > { %v1761_v3 = vpop.f32.mrf.mxu1  ;;  %v1802_v4 = vpop.f32.mrf.mxu0 }
 0x7a3   : > { %v1762_v5 = vadd.f32 %v1761_v3, %v1263_v58  ;;  %v1803_v6 = vadd.f32 %v1802_v4, %v1271_v59  ;;  %7321 = vmatpush3.bf16.msra.mxu1 %v7889_v60  ;;  %7343 = vmatpush3.bf16.msra.mxu0 %v7890_v61  ;;  %v1975_v56 = vmax.f32 %v1760_v43, 0.0  ;;  %v1977_v57 = vmax.f32 %v1801_v44, 0.0  ;;  %v7911_v60 = vld [vmem:[%s10099_s9 + $0x278] sm:$0xff]   ;;  %v7931_v43 = vld [vmem:[%s10099_s9 + $0x250] sm:$0xff]  }
 0x7a4   : > { %v1763_v9 = vpop.f32.mrf.mxu1  ;;  %v1804_v10 = vpop.f32.mrf.mxu0  ;;  %7322 = vmatprep.subr.bf16.mxu1 %v7891_v0  ;;  %7344 = vmatprep.subr.bf16.mxu0 %v7892_v1  ;;  %v7912_v61 = vld [vmem:[%s10099_s9 + $0x2f8] sm:$0xff]   ;;  %v7932_v44 = vld [vmem:[%s10099_s9 + $0x2d0] sm:$0xff]  }
 0x7a5   : > { %v1976_v18 = vmax.f32 %v1762_v5, 0.0  ;;  %v1978_v19 = vmax.f32 %v1803_v6, 0.0  ;;  %v7913_v3 = vld [vmem:[%s10099_s9 + $0x238] sm:$0xff]   ;;  %v1991_v4 = vpack.c.bf16 %v1975_v56, %v1975_v56  ;;  %v1993_v5 = vpack.c.bf16 %v1977_v57, %v1977_v57  ;;  %v7916_v9 = vld [vmem:[%s10099_s9 + $0x2f0] sm:$0xff]   ;;  %v7937_v56 = vld [vmem:[%s10099_s9 + $0x208] sm:$0xff]  }
 0x7a6   : > { %v1764_v20 = vpop.f32.mrf.mxu1  ;;  %v1805_v25 = vpop.f32.mrf.mxu0  ;;  %v7914_v6 = vld [vmem:[%s10099_s9 + $0x2b8] sm:$0xff]  }
 0x7a7   : > { %v1992_v26 = vpack.c.bf16 %v1976_v18, %v1976_v18  ;;  %v1994_v27 = vpack.c.bf16 %v1978_v19, %v1978_v19  ;;  %7323 = vmatpush3.bf16.msra.mxu1 %v7893_v7  ;;  %7345 = vmatpush3.bf16.msra.mxu0 %v7894_v8  ;;  %v7915_v8 = vld [vmem:[%s10099_s9 + $0x270] sm:$0xff]   ;;  %v7919_v18 = vld [vmem:[%s10099_s9 + $0x268] sm:$0xff]  }
 0x7a8   : > { %7324 = vmatprep.subr.bf16.mxu1 %v7895_v11  ;;  %7346 = vmatprep.subr.bf16.mxu0 %v7896_v15  ;;  %v7917_v11 = vld [vmem:[%s10099_s9 + $0x230] sm:$0xff]   ;;  %v7920_v19 = vld [vmem:[%s10099_s9 + $0x2e8] sm:$0xff]  }
 0x7a9   : > { %3146 = vmatprep.mubr.bf16.mxu1 %v1992_v26  ;;  %3186 = vmatprep.mubr.bf16.mxu0 %v1994_v27  ;;  %v7918_v15 = vld [vmem:[%s10099_s9 + $0x2b0] sm:$0xff]   ;;  %v7921_v20 = vld [vmem:[%s10099_s9 + $0x228] sm:$0xff]  }
 0x7aa   : > { %v7922_v27 = vld [vmem:[%s10099_s9 + $0x2a8] sm:$0xff]  }
 0x7ab   : > { %7325 = vmatpush3.bf16.msra.mxu1 %v7897_v28  ;;  %7347 = vmatpush3.bf16.msra.mxu0 %v7898_v29  ;;  %v7923_v28 = vld [vmem:[%s10099_s9 + $0x260] sm:$0xff]  }
 0x7ac   : > { %7326 = vmatprep.subr.bf16.mxu1 %v7899_v32  ;;  %7348 = vmatprep.subr.bf16.mxu0 %v7900_v33  ;;  %v7924_v29 = vld [vmem:[%s10099_s9 + $0x2e0] sm:$0xff]  }
 0x7af   : > { %7327 = vmatpush3.bf16.msra.mxu1 %v7901_v34  ;;  %7349 = vmatpush3.bf16.msra.mxu0 %v7902_v12  ;;  %v7925_v34 = vld [vmem:[%s10099_s9 + $0x220] sm:$0xff]  }
 0x7b0   : > { %v8968_v45 = vpop.f32.mrf.mxu1  ;;  %v8970_v46 = vpop.f32.mrf.mxu0  ;;  %7328 = vmatprep.subr.bf16.mxu1 %v7903_v37  ;;  %7350 = vmatprep.subr.bf16.mxu0 %v7904_v38  ;;  %v7927_v37 = vld [vmem:[%s10099_s9 + $0x258] sm:$0xff]  }
 0x7b1   : > { %v7928_v38 = vld [vmem:[%s10099_s9 + $0x2d8] sm:$0xff]  }
 0x7b2   : > { %v1843_v49 = vpop.f32.mrf.mxu1  ;;  %v1884_v50 = vpop.f32.mrf.mxu0 }
 0x7b3   : > { %v1844_v51 = vadd.f32 %v1843_v49, %v1279_v22  ;;  %v1885_v52 = vadd.f32 %v1884_v50, %v1287_v40  ;;  %7329 = vmatpush3.bf16.msra.mxu1 %v7905_v41  ;;  %7351 = vmatpush3.bf16.msra.mxu0 %v7906_v42  ;;  %v7929_v41 = vld [vmem:[%s10099_s9 + $0x218] sm:$0xff]   ;;  %v7934_v49 = vld [vmem:[%s10099_s9 + $0x290] sm:$0xff]   ;;  %v7935_v50 = vld [vmem:[%s10099_s9 + $0x248] sm:$0xff]  }
 0x7b4   : > { %v1845_v58 = vpop.f32.mrf.mxu1  ;;  %v1886_v59 = vpop.f32.mrf.mxu0  ;;  %7330 = vmatprep.subr.bf16.mxu1 %v7907_v47  ;;  %7352 = vmatprep.subr.bf16.mxu0 %v7908_v48  ;;  %v7930_v42 = vld [vmem:[%s10099_s9 + $0x298] sm:$0xff]   ;;  %v7933_v47 = vld [vmem:[%s10099_s9 + $0x210] sm:$0xff]   ;;  %v1275_v48 = vrot.slane %v8956_v39, %v8404_v14 }
 0x7b5   : > { %v1980_v62 = vmax.f32 %v1844_v51, 0.0  ;;  %v1982_v63 = vmax.f32 %v1885_v52, 0.0  ;;  %v1283_v51 = vrot.slane %v8956_v39, %v8843_v21  ;;  %v7936_v52 = vld [vmem:[%s10099_s9 + $0x2c8] sm:$0xff]   ;;  %v7939_v59 = vld [vmem:[%s10099_s9 + $0x240] sm:$0xff]  }
 0x7b6   : > { %v1846_v0 = vpop.f32.mrf.mxu1  ;;  %v1887_v1 = vpop.f32.mrf.mxu0  ;;  %v1842_v57 = vadd.f32 %v8968_v45, %v1275_v48  ;;  %v7938_v58 = vld [vmem:[%s10099_s9 + $0x288] sm:$0xff]   ;;  %v7941_v45 = vld [vmem:[%s10099_s9 + $0x200] sm:$0xff]  }
 0x7b7   : > { %7331 = vmatpush3.bf16.msra.mxu1 %v7909_v53  ;;  %7353 = vmatpush3.bf16.msra.mxu0 %v7910_v54  ;;  %v1996_v7 = vpack.c.bf16 %v1980_v62, %v1980_v62  ;;  %v1998_v10 = vpack.c.bf16 %v1982_v63, %v1982_v63  ;;  %v1295_v53 = vrot.slane %v8956_v39, %v8880_v17  ;;  %v7942_v1 = vld [vmem:[%s10099_s9 + $0x280] sm:$0xff]   ;;  %v7967_v48 = vld [vmem:[%s10099_s9 + $0x348] sm:$0xff]  }
 0x7b8   : > { %7360 = vmatprep.subr.bf16.mxu1 %v7911_v60  ;;  %7382 = vmatprep.subr.bf16.mxu0 %v7912_v61  ;;  %v1303_v54 = vrot.slane %v8956_v39, %v8883_v55  ;;  %v1883_v60 = vadd.f32 %v8970_v46, %v1283_v51  ;;  %v7940_v61 = vld [vmem:[%s10099_s9 + $0x2c0] sm:$0xff]   ;;  %v1979_v0 = vmax.f32 %v1842_v57, 0.0  ;;  %v7943_v46 = vld [vmem:[%s10099_s9 + $0x378] sm:$0xff]   ;;  %v7969_v51 = vld [vmem:[%s10099_s9 + $0x308] sm:$0xff]  }
 0x7ba   : > { %3147 = vmatmul.mubr.bf16.vlgmr.msra.gmra.mxu1 %v1991_v4  ;;  %3187 = vmatmul.mubr.bf16.vlgmr.msra.gmra.mxu0 %v1993_v5  ;;  %v7944_v4 = vld [vmem:[%s10099_s9 + $0x3f8] sm:$0xff]  }
 0x7bb   : > { %7361 = vmatpush3.bf16.msra.mxu1 %v7913_v3  ;;  %3226 = vmatprep.mubr.bf16.mxu1 %v1996_v7  ;;  %v1981_v3 = vmax.f32 %v1883_v60, 0.0  ;;  %v7945_v7 = vld [vmem:[%s10099_s9 + $0x338] sm:$0xff]  }
 0x7bc   : > { %7383 = vmatpush3.bf16.msra.mxu0 %v7914_v6  ;;  %3266 = vmatprep.mubr.bf16.mxu0 %v1998_v10 }
 0x7bd   : > { %7362 = vmatprep.subr.bf16.mxu1 %v7915_v8  ;;  %7384 = vmatprep.subr.bf16.mxu0 %v7916_v9  ;;  %v1995_v8 = vpack.c.bf16 %v1979_v0, %v1979_v0  ;;  %v7946_v9 = vld [vmem:[%s10099_s9 + $0x3b8] sm:$0xff]   ;;  %v1997_v10 = vpack.c.bf16 %v1981_v3, %v1981_v3 }
 0x7bf   : > { %7363 = vmatpush3.bf16.msra.mxu1 %v7917_v11  ;;  %v7947_v11 = vld [vmem:[%s10099_s9 + $0x370] sm:$0xff]  }
 0x7c0   : > { %7385 = vmatpush3.bf16.msra.mxu0 %v7918_v15  ;;  %v9017_v25 = vpop.f32.mrf.mxu1  ;;  %v9019_v26 = vpop.f32.mrf.mxu0  ;;  %7364 = vmatprep.subr.bf16.mxu1 %v7919_v18  ;;  %v7948_v18 = vld [vmem:[%s10099_s9 + $0x3f0] sm:$0xff]  }
 0x7c1   : > { %7386 = vmatprep.subr.bf16.mxu0 %v7920_v19 }
 0x7c2   : > { %v1925_v32 = vpop.f32.mrf.mxu1  ;;  %v1966_v33 = vpop.f32.mrf.mxu0 }
 0x7c3   : > { %7365 = vmatpush3.bf16.msra.mxu1 %v7921_v20  ;;  %v1926_v62 = vadd.f32 %v1925_v32, %v1295_v53  ;;  %v1967_v63 = vadd.f32 %v1966_v33, %v1303_v54  ;;  %v7949_v20 = vld [vmem:[%s10099_s9 + $0x330] sm:$0xff]   ;;  %v7953_v32 = vld [vmem:[%s10099_s9 + $0x328] sm:$0xff]  }
 0x7c4   : > { %7387 = vmatpush3.bf16.msra.mxu0 %v7922_v27  ;;  %v1927_v12 = vpop.f32.mrf.mxu1  ;;  %v1968_v35 = vpop.f32.mrf.mxu0  ;;  %7366 = vmatprep.subr.bf16.mxu1 %v7923_v28  ;;  %v7950_v27 = vld [vmem:[%s10099_s9 + $0x3b0] sm:$0xff]   ;;  %v7951_v28 = vld [vmem:[%s10099_s9 + $0x368] sm:$0xff]  }
 0x7c5   : > { %7388 = vmatprep.subr.bf16.mxu0 %v7924_v29  ;;  %v1984_v5 = vmax.f32 %v1926_v62, 0.0  ;;  %v1986_v6 = vmax.f32 %v1967_v63, 0.0  ;;  %v7952_v29 = vld [vmem:[%s10099_s9 + $0x3e8] sm:$0xff]   ;;  %v7956_v12 = vld [vmem:[%s10099_s9 + $0x3e0] sm:$0xff]  }
 0x7c6   : > { %v1928_v22 = vpop.f32.mrf.mxu1  ;;  %v1969_v40 = vpop.f32.mrf.mxu0  ;;  %v7954_v33 = vld [vmem:[%s10099_s9 + $0x3a8] sm:$0xff]   ;;  %v7957_v35 = vld [vmem:[%s10099_s9 + $0x320] sm:$0xff]  }
 0x7c7   : > { %7367 = vmatpush3.bf16.msra.mxu1 %v7925_v34  ;;  %v2000_v15 = vpack.c.bf16 %v1984_v5, %v1984_v5  ;;  %v2002_v19 = vpack.c.bf16 %v1986_v6, %v1986_v6  ;;  %v7955_v34 = vld [vmem:[%s10099_s9 + $0x360] sm:$0xff]   ;;  %v7961_v22 = vld [vmem:[%s10099_s9 + $0x318] sm:$0xff]   ;;  %v7970_v53 = vld [vmem:[%s10099_s9 + $0x388] sm:$0xff]  }
 0x7c8   : > { %7389 = vmatpush3.bf16.msra.mxu0 %v7926_v36  ;;  %7368 = vmatprep.subr.bf16.mxu1 %v7927_v37  ;;  %v7958_v36 = vld [vmem:[%s10099_s9 + $0x3a0] sm:$0xff]   ;;  %v7959_v37 = vld [vmem:[%s10099_s9 + $0x358] sm:$0xff]  }
 0x7c9   : > { %7390 = vmatprep.subr.bf16.mxu0 %v7928_v38  ;;  %v7960_v38 = vld [vmem:[%s10099_s9 + $0x3d8] sm:$0xff]   ;;  %v6539_v63 = vld [vmem:[%s10100_s10] ss:$0 sm:$0xff] }
 0x7ca   : > { %v7962_v40 = vld [vmem:[%s10099_s9 + $0x398] sm:$0xff]  }
 0x7cb   : > { %7369 = vmatpush3.bf16.msra.mxu1 %v7929_v41  ;;  %v7963_v41 = vld [vmem:[%s10099_s9 + $0x350] sm:$0xff]  }
 0x7cc   : > { %7391 = vmatpush3.bf16.msra.mxu0 %v7930_v42  ;;  %7370 = vmatprep.subr.bf16.mxu1 %v7931_v43  ;;  %v7964_v42 = vld [vmem:[%s10099_s9 + $0x3d0] sm:$0xff]  }
 0x7cd   : > { %7392 = vmatprep.subr.bf16.mxu0 %v7932_v44  ;;  %v7965_v43 = vld [vmem:[%s10099_s9 + $0x310] sm:$0xff]   ;;  %v1291_v44 = vrot.slane %v8956_v39, %v8926_v30 }
 0x7cf   : > { %7371 = vmatpush3.bf16.msra.mxu1 %v7933_v47  ;;  %v7966_v47 = vld [vmem:[%s10099_s9 + $0x390] sm:$0xff]  }
 0x7d0   : > { %7393 = vmatpush3.bf16.msra.mxu0 %v7934_v49  ;;  %7372 = vmatprep.subr.bf16.mxu1 %v7935_v50  ;;  %v1299_v49 = vrot.slane %v8956_v39, %v8929_v31  ;;  %v7968_v50 = vld [vmem:[%s10099_s9 + $0x3c8] sm:$0xff]   ;;  %v7971_v39 = vld [vmem:[%s10099_s9 + $0x340] sm:$0xff]  }
 0x7d1   : > { %7394 = vmatprep.subr.bf16.mxu0 %v7936_v52  ;;  %v1924_v52 = vadd.f32 %v9017_v25, %v1291_v44  ;;  %v7973_v25 = vld [vmem:[%s10099_s9 + $0x300] sm:$0xff]  }
 0x7d2   : > { %v1965_v54 = vadd.f32 %v9019_v26, %v1299_v49 }
 0x7d3   : > { %7373 = vmatpush3.bf16.msra.mxu1 %v7937_v56  ;;  %v7972_v56 = vld [vmem:[%s10099_s9 + $0x3c0] sm:$0xff]   ;;  %v1983_v57 = vmax.f32 %v1924_v52, 0.0 }
 0x7d4   : > { %7395 = vmatpush3.bf16.msra.mxu0 %v7938_v58  ;;  %7374 = vmatprep.subr.bf16.mxu1 %v7939_v59  ;;  %v7974_v58 = vld [vmem:[%s10099_s9 + $0x380] sm:$0xff]   ;;  %v1985_v59 = vmax.f32 %v1965_v54, 0.0 }
 0x7d5   : > { %7396 = vmatprep.subr.bf16.mxu0 %v7940_v61  ;;  %v1999_v26 = vpack.c.bf16 %v1983_v57, %v1983_v57 }
 0x7d6   : > { %v2001_v60 = vpack.c.bf16 %v1985_v59, %v1985_v59 }
 0x7d7   : > { %7375 = vmatpush3.bf16.msra.mxu1 %v7941_v45 }
 0x7d8   : > { %7397 = vmatpush3.bf16.msra.mxu0 %v7942_v1  ;;  %7404 = vmatprep.subr.bf16.mxu1 %v7943_v46 }
 0x7d9   : > { %7426 = vmatprep.subr.bf16.mxu0 %v7944_v4 }
 0x7da   : > { %3227 = vmatmul.mubr.bf16.vlgmr.msra.gmra.mxu1 %v1995_v8 }
 0x7db   : > { %3267 = vmatmul.mubr.bf16.vlgmr.msra.gmra.mxu0 %v1997_v10  ;;  %7405 = vmatpush3.bf16.msra.mxu1 %v7945_v7 }
 0x7dc   : > { %3306 = vmatprep.mubr.bf16.mxu1 %v2000_v15  ;;  %7427 = vmatpush3.bf16.msra.mxu0 %v7946_v9 }
 0x7dd   : > { %3346 = vmatprep.mubr.bf16.mxu0 %v2002_v19  ;;  %7406 = vmatprep.subr.bf16.mxu1 %v7947_v11 }
 0x7de   : > { %7428 = vmatprep.subr.bf16.mxu0 %v7948_v18 }
 0x7df   : > { %7407 = vmatpush3.bf16.msra.mxu1 %v7949_v20 }
 0x7e0   : > { %7429 = vmatpush3.bf16.msra.mxu0 %v7950_v27  ;;  %7408 = vmatprep.subr.bf16.mxu1 %v7951_v28 }
 0x7e1   : > { %7430 = vmatprep.subr.bf16.mxu0 %v7952_v29 }
 0x7e3   : > { %7409 = vmatpush3.bf16.msra.mxu1 %v7953_v32 }
 0x7e4   : > { %7431 = vmatpush3.bf16.msra.mxu0 %v7954_v33  ;;  %7410 = vmatprep.subr.bf16.mxu1 %v7955_v34 }
 0x7e5   : > { %7432 = vmatprep.subr.bf16.mxu0 %v7956_v12 }
 0x7e7   : > { %7411 = vmatpush3.bf16.msra.mxu1 %v7957_v35 }
 0x7e8   : > { %7433 = vmatpush3.bf16.msra.mxu0 %v7958_v36  ;;  %7412 = vmatprep.subr.bf16.mxu1 %v7959_v37 }
 0x7e9   : > { %7434 = vmatprep.subr.bf16.mxu0 %v7960_v38 }
 0x7eb   : > { %7413 = vmatpush3.bf16.msra.mxu1 %v7961_v22 }
 0x7ec   : > { %7435 = vmatpush3.bf16.msra.mxu0 %v7962_v40  ;;  %7414 = vmatprep.subr.bf16.mxu1 %v7963_v41 }
 0x7ed   : > { %7436 = vmatprep.subr.bf16.mxu0 %v7964_v42 }
 0x7ef   : > { %7415 = vmatpush3.bf16.msra.mxu1 %v7965_v43 }
 0x7f0   : > { %7437 = vmatpush3.bf16.msra.mxu0 %v7966_v47  ;;  %7416 = vmatprep.subr.bf16.mxu1 %v7967_v48 }
 0x7f1   : > { %7438 = vmatprep.subr.bf16.mxu0 %v7968_v50 }
 0x7f3   : > { %7417 = vmatpush3.bf16.msra.mxu1 %v7969_v51 }
 0x7f4   : > { %7439 = vmatpush3.bf16.msra.mxu0 %v7970_v53  ;;  %7418 = vmatprep.subr.bf16.mxu1 %v7971_v39 }
 0x7f5   : > { %7440 = vmatprep.subr.bf16.mxu0 %v7972_v56 }
 0x7f7   : > { %7419 = vmatpush3.bf16.msra.mxu1 %v7973_v25 }
 0x7f8   : > { %7441 = vmatpush3.bf16.msra.mxu0 %v7974_v58 }
 0x7f9   : > { %7710 = vmatprep.subr.bf16.mxu0 %v8227_v13 }
 0x7fa   : > { %3307 = vmatmul.mubr.bf16.vlgmr.msra.gmra.mxu1 %v1999_v26 }
 0x7fb   : > { %3347 = vmatmul.mubr.bf16.vlgmr.msra.gmra.mxu0 %v2001_v60  ;;  %3482 = vmatprep.mubr.bf16.mxu1 %v8226_v2 }
 0x7fc   : > { %7712 = vmatprep.mubr.msk.bf16.mxu0 %vm8228_vm1, %v8227_v13 }
 0x85a   : > { %v7288_v61 = vpop.f32.mrf.mxu1  ;;  %v7310_v62 = vpop.f32.mrf.mxu0 }
 0x85c   : > { %v7289_v45 = vpop.f32.mrf.mxu1  ;;  %v7311_v0 = vpop.f32.mrf.mxu0 }
 0x85d   : > { %v7290_v1 = vadd.f32 %v7289_v45, %v7288_v61  ;;  %v7312_v46 = vadd.f32 %v7311_v0, %v7310_v62  ;;  %v7977_v45 = vld [vmem:[%s10091_s1 + $0x74] ss:$8 sps:$4 sm:$0xff]   ;;  %v7975_v0 = vld [vmem:[%s10091_s1 + $0x70] ss:$8 sps:$4 sm:$0xff]  }
 0x85e   : > { %v7291_v3 = vpop.f32.mrf.mxu1  ;;  %v7313_v4 = vpop.f32.mrf.mxu0  ;;  %3458 = vmatprep.subr.bf16.mxu1 %v7977_v45 }
 0x85f   : > { %v3069_v5 = vadd.f32 %v7290_v1, %v6539_v63  ;;  %3459 = vmatpush1.bf16.msra.mxu1 %v7975_v0  ;;  %v7978_v1 = vld [vmem:[%s10091_s1 + $0x60] ss:$8 sps:$4 sm:$0xff]   ;;  %v7983_v3 = vld [vmem:[%s10091_s1 + $0x54] ss:$8 sps:$4 sm:$0xff]   ;;  %v7986_v4 = vld [vmem:[%s10091_s1 + $0x44] ss:$8 sps:$4 sm:$0xff]  }
 0x860   : > { %v7292_v6 = vpop.f32.mrf.mxu1  ;;  %v7314_v7 = vpop.f32.mrf.mxu0 }
 0x861   : > { %v3109_v8 = vadd.f32 %v7312_v46, %v3069_v5  ;;  %v7981_v46 = vld [vmem:[%s10091_s1 + $0x50] ss:$8 sps:$4 sm:$0xff]   ;;  %v7984_v5 = vld [vmem:[%s10091_s1 + $0x40] ss:$8 sps:$4 sm:$0xff]  }
 0x87a   : > { %v7332_v9 = vpop.f32.mrf.mxu1  ;;  %v7354_v10 = vpop.f32.mrf.mxu0 }
 0x87c   : > { %v7333_v11 = vpop.f32.mrf.mxu1  ;;  %v7355_v15 = vpop.f32.mrf.mxu0 }
 0x87d   : > { %v7334_v37 = vadd.f32 %v7333_v11, %v7332_v9  ;;  %v7356_v22 = vadd.f32 %v7355_v15, %v7354_v10  ;;  %v6668_v10 = vld [vmem:[%s10101_s11] ss:$0 sm:$0xff] }
 0x87e   : > { %v7335_v18 = vpop.f32.mrf.mxu1  ;;  %v7357_v19 = vpop.f32.mrf.mxu0  ;;  %v6669_v15 = vld [vmem:[%s10102_s12] ss:$0 sm:$0xff] }
 0x87f   : > { %v3149_v38 = vadd.f32 %v7334_v37, %v3109_v8 }
 0x880   : > { %v7336_v20 = vpop.f32.mrf.mxu1  ;;  %v7358_v27 = vpop.f32.mrf.mxu0 }
 0x881   : > { %v3189_v41 = vadd.f32 %v7356_v22, %v3149_v38  ;;  %v6678_v27 = vld [vmem:[%s10092_s2 + $0x2] sm:$0x3] }
 0x89a   : > { %v7376_v28 = vpop.f32.mrf.mxu1 }
 0x89b   : > { %v7398_v29 = vpop.f32.mrf.mxu0 }
 0x89c   : > { %v7377_v32 = vpop.f32.mrf.mxu1 }
 0x89d   : > { %v7399_v33 = vpop.f32.mrf.mxu0  ;;  %v7378_v40 = vadd.f32 %v7377_v32, %v7376_v28  ;;  %v3400_v28 = vrot.slane %v6678_v27, %v8404_v14 }
 0x89e   : > { %v7379_v34 = vpop.f32.mrf.mxu1  ;;  %v7400_v44 = vadd.f32 %v7399_v33, %v7398_v29  ;;  %v3404_v29 = vrot.slane %v6678_v27, %v8422_v23 }
 0x89f   : > { %v7401_v12 = vpop.f32.mrf.mxu0  ;;  %v3229_v42 = vadd.f32 %v7378_v40, %v3189_v41 }
 0x8a0   : > { %v7380_v35 = vpop.f32.mrf.mxu1 }
 0x8a1   : > { %v7402_v36 = vpop.f32.mrf.mxu0  ;;  %v3269_v49 = vadd.f32 %v7400_v44, %v3229_v42 }
 0x8ba   : > { %v7420_v43 = vpop.f32.mrf.mxu1 }
 0x8bb   : > { %v7442_v47 = vpop.f32.mrf.mxu0 }
 0x8bc   : > { %v7421_v48 = vpop.f32.mrf.mxu1 }
 0x8bd   : > { %v7422_v50 = vadd.f32 %v7421_v48, %v7420_v43  ;;  %v7443_v51 = vpop.f32.mrf.mxu0 }
 0x8be   : > { %v7423_v52 = vpop.f32.mrf.mxu1  ;;  %v7444_v39 = vadd.f32 %v7443_v51, %v7442_v47 }
 0x8bf   : > { %v3309_v53 = vadd.f32 %v7422_v50, %v3269_v49  ;;  %v7445_v54 = vpop.f32.mrf.mxu0 }
 0x8c0   : > { %v7424_v56 = vpop.f32.mrf.mxu1 }
 0x8c1   : > { %v3349_v25 = vadd.f32 %v7444_v39, %v3309_v53  ;;  %v7446_v57 = vpop.f32.mrf.mxu0 }
 0x8c3   : > { %v3354_v58 = vadd.f32 %v3349_v25, %v8592_v16  ;;  %v7980_v16 = vld [vmem:[%s10091_s1 + $0x64] ss:$8 sps:$4 sm:$0xff]  }
 0x8c4   : > { %3460 = vmatprep.subr.bf16.mxu1 %v7980_v16 }
 0x8c5   : > { %v3357_v59 = vsel %vm552_vm0, %v3354_v58, 0.0  ;;  %3461 = vmatpush1.bf16.msra.mxu1 %v7978_v1 }
 0x8c6   : > { %3358 = vadd.xlane.f32.xlu0 %v3357_v59  ;;  %3462 = vmatprep.subr.bf16.mxu1 %v7983_v3 }
 0x8c9   : > { %3463 = vmatpush1.bf16.msra.mxu1 %v7981_v46 }
 0x8ca   : > { %3464 = vmatprep.subr.bf16.mxu1 %v7986_v4 }
 0x8cd   : > { %3465 = vmatpush1.bf16.msra.mxu1 %v7984_v5 }
 0x8ce   : > { %7716 = vmatprep.subr.bf16.mxu1 %v8227_v13 }
 0x94f   : > { %v3359_v26 = vpop.xlane.xlu0 %3358 }
 0x950   : > { %v3360_v60 = vmul.f32 0.015625, %v3359_v26 }
 0x952   : > { %v3361_v61 = vsub.f32 %v3354_v58, %v3360_v60 }
 0x954   : > { %v3362_v62 = vmul.f32 %v3361_v61, %v3361_v61 }
 0x956   : > { %v3363_v63 = vsel %vm552_vm0, %v3362_v62, 0.0 }
 0x957   : > { %3364 = vadd.xlane.f32.xlu1 %v3363_v63 }
 0x9e0   : > { %v3365_v6 = vpop.xlane.xlu1 %3364 }
 0x9e1   : > { %v3366_v7 = vmul.f32 0.015625, %v3365_v6 }
 0x9e3   : > { %v3367_v8 = vadd.f32 1e-05, %v3366_v7 }
 0x9e5   : > { %8141 = vrsqrt.f32 %v3367_v8 }
 0x9f2   : > { %v8142_v9 = vpop.eup %8141 }
 0x9f3   : > { %v3369_v11 = vmul.f32 %v8142_v9, %v3361_v61 }
 0x9f5   : > { %v3376_v18 = vmul.f32 %v6668_v10, %v3369_v11 }
 0x9f7   : > { %v9237_v19 = vadd.f32 %v6669_v15, %v3376_v18 }
 0x9f9   : > { %v3384_v20 = vpack.c.bf16 %v9237_v19, %v9237_v19 }
 0x9fb   : > { %6687 = vmatmul.mubr.msk.bf16.vlgmr.msra.gmra.mxu1 %vm552_vm0, %v3384_v20 }
 0x9fc   : > { %7718 = vmatprep.mubr.msk.bf16.mxu1 %vm8228_vm1, %v8227_v13 }
 0xabb   : > { %v3484_v32 = vpop.f32.mrf.mxu1 }
 0xabc   : > { %v3485_v33 = vadd.f32 %v3484_v32, %v3400_v28 }
 0xabd   : > { %v3486_v34 = vpop.f32.mrf.mxu1 }
 0xabe   : > { %v3491_v12 = vpack.c.bf16 %v3485_v33, %v3485_v33  ;;  %v3487_v35 = vadd.f32 %v3486_v34, %v3404_v29 }
 0xabf   : > { %v3488_v36 = vpop.f32.mrf.mxu1 }
 0xac0   : > { %v9249_v37 = vpack.c.bf16 %v3487_v35, %v3487_v35  ;;  %3602 = vrot.lane.b32.xlu1 %v3491_v12, %s8232_s16  ;;  %3494 = vrot.lane.b32.xlu0 %v3491_v12, %s8230_s29 }
 0xac1   : > { %v3489_v38 = vpop.f32.mrf.mxu1 }
 0xac2   : > { %v3558_v22 = vsel %vm665_vm3, %v9249_v37, 0 }
 0xac3   : > { %7717 = vmatpush3.bf16.msra.mxu1 %v3558_v22 }
 0xac4   : > { %3600 = vrot.lane.b32.xlu1 %v3491_v12, %s8229_s27  ;;  %3713 = vrot.lane.b32.xlu0 %v3491_v12, %s10130_s30 }
 0xac5   : > { %7728 = vmatprep.subr.bf16.mxu1 %v8227_v13 }
 0xac8   : > { %3711 = vrot.lane.b32.xlu1 %v3491_v12, %s10131_s23  ;;  %3823 = vrot.lane.b32.xlu0 %v3491_v12, %s10132_s17 }
 0xacc   : > { %3821 = vrot.lane.b32.xlu1 %v3491_v12, %s10133_s24 }
 0xb32   : > { %v3495_v40 = vpop.permute.xlu0 %3494  ;;  %v3603_v42 = vpop.permute.xlu1 %3602 }
 0xb33   : > { %v3500_v41 = vsel %vm602_vm2, %v3495_v40, 0  ;;  %v3608_v43 = vsel %vm602_vm2, %v3603_v42, 0 }
 0xb34   : > { %7711 = vmatpush3.bf16.xpose.msra.mxu0 %v3500_v41 }
 0xb35   : > { %7722 = vmatprep.subr.bf16.mxu0 %v8227_v13 }
 0xb36   : > { %v3714_v44 = vpop.permute.xlu0 %3713  ;;  %v3601_v47 = vpop.permute.xlu1 %3600 }
 0xb37   : > { %v3719_v48 = vsel %vm602_vm2, %v3714_v44, 0 }
 0xb3a   : > { %v3824_v49 = vpop.permute.xlu0 %3823  ;;  %v3712_v50 = vpop.permute.xlu1 %3711 }
 0xb3b   : > { %7713 = vmatmul.mubr.msk.bf16.vlgmr.msra.gmra.mxu0 %vm602_vm2, %v3491_v12  ;;  %v3829_v51 = vsel %vm602_vm2, %v3824_v49, 0 }
 0xb3c   : > { %7723 = vmatpush3.bf16.xpose.msra.mxu0 %v3608_v43  ;;  %7724 = vmatprep.mubr.msk.bf16.mxu0 %vm8228_vm1, %v8227_v13 }
 0xb3d   : > { %7734 = vmatprep.subr.bf16.mxu0 %v8227_v13 }
 0xb3e   : > { %v3822_v52 = vpop.permute.xlu1 %3821 }
 0xb43   : > { %7725 = vmatmul.mubr.msk.bf16.vlgmr.msra.gmra.mxu0 %vm602_vm2, %v3601_v47 }
 0xb44   : > { %7735 = vmatpush3.bf16.xpose.msra.mxu0 %v3719_v48  ;;  %7736 = vmatprep.mubr.msk.bf16.mxu0 %vm8228_vm1, %v8227_v13 }
 0xb45   : > { %7746 = vmatprep.subr.bf16.mxu0 %v8227_v13 }
 0xb4b   : > { %7737 = vmatmul.mubr.msk.bf16.vlgmr.msra.gmra.mxu0 %vm602_vm2, %v3712_v50 }
 0xb4c   : > { %7747 = vmatpush3.bf16.xpose.msra.mxu0 %v3829_v51  ;;  %7748 = vmatprep.mubr.msk.bf16.mxu0 %vm8228_vm1, %v8227_v13 }
 0xb4d   : > { %7758 = vmatprep.subr.bf16.mxu0 %v8227_v13 }
 0xb53   : > { %7749 = vmatmul.mubr.msk.bf16.vlgmr.msra.gmra.mxu0 %vm602_vm2, %v3822_v52 }
 0xb54   : > { %7766 = vmatprep.mubr.msk.bf16.mxu0 %vm8228_vm1, %v8227_v13 }
 0xbfb   : > { %v3536_v53 = vpop.f32.mrf.mxu0 }
 0xbfc   : > { %v3542_v39 = vsel %vm649_vm4, %v3536_v53, -inf }
 0xbfd   : > { %3543 = vmax.xlane.f32.xlu0 %v3542_v39  ;;  %v7714_v54 = vpop.f32.mrf.mxu0 }
 0xbff   : > { %v3539_v56 = vpop.f32.mrf.mxu0 }
 0xc01   : > { %v7715_v25 = vpop.f32.mrf.mxu0 }
 0xc03   : > { %v3644_v57 = vpop.f32.mrf.mxu0 }
 0xc04   : > { %v3650_v58 = vsel %vm649_vm4, %v3644_v57, -inf }
 0xc05   : > { %3651 = vmax.xlane.f32.xlu1 %v3650_v58  ;;  %v7726_v59 = vpop.f32.mrf.mxu0 }
 0xc07   : > { %v3647_v26 = vpop.f32.mrf.mxu0 }
 0xc09   : > { %v7727_v60 = vpop.f32.mrf.mxu0 }
 0xc0a   : > { %v7987_v60 = vld [vmem:[%s10093_s3 + $0x38] sm:$0xff]  }
 0xc0b   : > { %v3755_v61 = vpop.f32.mrf.mxu0  ;;  %7759 = vmatpush3.bf16.msra.mxu0 %v7987_v60 }
 0xc0c   : > { %v3761_v62 = vsel %vm649_vm4, %v3755_v61, -inf  ;;  %7760 = vmatprep.subr.bf16.mxu0 %v8227_v13 }
 0xc0d   : > { %3762 = vmax.xlane.f32.xlu0 %v3761_v62  ;;  %v7738_v63 = vpop.f32.mrf.mxu0 }
 0xc0f   : > { %v3758_v45 = vpop.f32.mrf.mxu0 }
 0xc11   : > { %v7739_v0 = vpop.f32.mrf.mxu0 }
 0xc13   : > { %v3865_v16 = vpop.f32.mrf.mxu0 }
 0xc14   : > { %v3871_v1 = vsel %vm649_vm4, %v3865_v16, -inf }
 0xc15   : > { %3872 = vmax.xlane.f32.xlu0 %v3871_v1  ;;  %v7750_v46 = vpop.f32.mrf.mxu0 }
 0xc17   : > { %v3868_v3 = vpop.f32.mrf.mxu0 }
 0xc18   : > { %v7988_v3 = vld [vmem:[%s10093_s3 + $0x30] sm:$0xff]  }
 0xc19   : > { %v7751_v4 = vpop.f32.mrf.mxu0  ;;  %7761 = vmatpush3.bf16.msra.mxu0 %v7988_v3 }
 0xc1a   : > { %v7989_v4 = vld [vmem:[%s10093_s3 + $0x28] sm:$0xff]   ;;  %7762 = vmatprep.subr.bf16.mxu0 %v8227_v13 }
 0xc1d   : > { %7763 = vmatpush3.bf16.msra.mxu0 %v7989_v4  ;;  %v6715_v4 = vld [vmem:[%s10097_s7 + $0x200] sm:$0xff] }
 0xc1e   : > { %7764 = vmatprep.subr.bf16.mxu0 %v8227_v13 }
 0xc86   : > { %v3544_v5 = vpop.xlane.xlu0 %3543 }
 0xc87   : > { %v3545_v6 = vsub.f32 %v3536_v53, %v3544_v5  ;;  %v7990_v5 = vld [vmem:[%s10093_s3 + $0x20] sm:$0xff]  }
 0xc88   : > { %7765 = vmatpush3.bf16.msra.mxu0 %v7990_v5  ;;  %v6723_v5 = vld [vmem:[%s10097_s7 + $0x240] sm:$0xff] }
 0xc89   : > { %v3546_v7 = vmul.f32 1.442695, %v3545_v6 }
 0xc8b   : > { %8143 = vpow2.f32 %v3546_v7 }
 0xc8e   : > { %v3652_v8 = vpop.xlane.xlu1 %3651 }
 0xc8f   : > { %v3653_v9 = vsub.f32 %v3644_v57, %v3652_v8 }
 0xc91   : > { %v3654_v10 = vmul.f32 1.442695, %v3653_v9 }
 0xc93   : > { %8145 = vpow2.f32 %v3654_v10 }
 0xc96   : > { %v3763_v18 = vpop.xlane.xlu0 %3762 }
 0xc97   : > { %v3764_v12 = vsub.f32 %v3755_v61, %v3763_v18 }
 0xc98   : > { %v8144_v11 = vpop.eup %8143 }
 0xc99   : > { %v3548_v15 = vsel %vm649_vm4, %v8144_v11, 0.0  ;;  %v3765_v35 = vmul.f32 1.442695, %v3764_v12  ;;  %v6705_v12 = vld [vmem:[%s10094_s4 + $0x1] ss:$0 sm:$0xff] }
 0xc9a   : > { %3549 = vadd.xlane.f32.xlu1 %v3548_v15 }
 0xc9e   : > { %v3873_v20 = vpop.xlane.xlu0 %3872 }
 0xc9f   : > { %v3874_v27 = vsub.f32 %v3865_v16, %v3873_v20 }
 0xca0   : > { %v8146_v28 = vpop.eup %8145 }
 0xca1   : > { %v3875_v29 = vmul.f32 1.442695, %v3874_v27  ;;  %v3656_v32 = vsel %vm649_vm4, %v8146_v28, 0.0 }
 0xca2   : > { %3657 = vadd.xlane.f32.xlu0 %v3656_v32 }
 0xca3   : > { %8147 = vpow2.f32 %v3875_v29 }
 0xca4   : > { %8149 = vpow2.f32 %v3765_v35 }
 0xcab   : > { %3663 = vrot.lane.b32.xlu1 %v9249_v37, %s8229_s27  ;;  %s483_s27 = sand.u32 1, %s8216_s19  }
 0xcac   : > { %s484_s15 = scalar_lea.vmem [#allocation2], %s483_s27 }
 0xcad   : > { %s6382_s26 = sshll.u32 %s484_s15, 4  ;;  %s10051_s26 = int_to_ptr.vmem [resolvable:$true] %s6382_s26 }
 0xcb0   : > { %v8148_v33 = vpop.eup %8147 }
 0xcb1   : > { %v3877_v34 = vsel %vm649_vm4, %v8148_v33, 0.0  ;;  %v8150_v36 = vpop.eup %8149 }
 0xcb2   : > { %3878 = vadd.xlane.f32.xlu0 %v3877_v34  ;;  %v3767_v38 = vsel %vm649_vm4, %v8150_v36, 0.0 }
 0xcc8   : > { %3773 = vrot.lane.b32.xlu0 %v9249_v37, %s10131_s23 }
 0xccf   : > { %3768 = vadd.xlane.f32.xlu1 %v3767_v38 }
 0xce0   : > { %3883 = vrot.lane.b32.xlu1 %v9249_v37, %s10133_s24  ;;  %s8168_s24 = sshll.u32 %s8236_s22, 4  ;;  %s8169_s24 = int_to_ptr.vmem [resolvable:$false] %s8168_s24 }
 0xce1   : > { %s8170_s29 = scalar_lea.vmem %s8169_s24, 32  ;;  %p8171_p0 = scmp.lt.s32.totalorder %s10051_s26, %s8169_s24 }
 0xd23   : > { %v3550_v22 = vpop.xlane.xlu1 %3549 }
 0xd24   : > { %8151 = vrcp.f32 %v3550_v22 }
 0xd27   : > { %v3664_v43 = vpop.permute.xlu1 %3663 }
 0xd28   : > { %v3669_v47 = vsel %vm665_vm3, %v3664_v43, 0 }
 0xd2b   : > { %v3658_v40 = vpop.xlane.xlu0 %3657 }
 0xd2c   : > { %8153 = vrcp.f32 %v3658_v40 }
 0xd31   : > { %v8152_v41 = vpop.eup %8151 }
 0xd32   : > { %v3552_v42 = vmul.f32 %v8152_v41, %v8144_v11 }
 0xd34   : > { %v3553_v44 = vpack.c.bf16 %v3552_v42, %v3552_v42 }
 0xd36   : > { %7719 = vmatmul.mubr.msk.bf16.vlgmr.msra.gmra.mxu1 %vm649_vm4, %v3553_v44 }
 0xd37   : > { %7729 = vmatpush3.bf16.msra.mxu1 %v3669_v47  ;;  %7730 = vmatprep.mubr.msk.bf16.mxu1 %vm8228_vm1, %v8227_v13 }
 0xd38   : > { %7740 = vmatprep.subr.bf16.mxu1 %v8227_v13 }
 0xd39   : > { %v8154_v48 = vpop.eup %8153 }
 0xd3a   : > { %v3660_v37 = vmul.f32 %v8154_v48, %v8146_v28 }
 0xd3b   : > { %v3879_v49 = vpop.xlane.xlu0 %3878 }
 0xd3c   : > { %v3661_v50 = vpack.c.bf16 %v3660_v37, %v3660_v37 }
 0xd3e   : > { %7731 = vmatmul.mubr.msk.bf16.vlgmr.msra.gmra.mxu1 %vm649_vm4, %v3661_v50  ;;  %v6764_v50 = vld [vmem:[%s10097_s7 + $0x388] sm:$0xff] }
 0xd3f   : > { %v3774_v51 = vpop.permute.xlu0 %3773  ;;  %7742 = vmatprep.mubr.msk.bf16.mxu1 %vm8228_vm1, %v8227_v13 }
 0xd40   : > { %v3779_v52 = vsel %vm665_vm3, %v3774_v51, 0 }
 0xd41   : > { %7741 = vmatpush3.bf16.msra.mxu1 %v3779_v52  ;;  %v6772_v52 = vld [vmem:[%s10097_s7 + $0x3c8] sm:$0xff] }
 0xd42   : > { %7752 = vmatprep.subr.bf16.mxu1 %v8227_v13 }
 0xd58   : > { %v3769_v53 = vpop.xlane.xlu1 %3768 }
 0xd59   : > { %8155 = vrcp.f32 %v3769_v53 }
 0xd5a   : > { %8157 = vrcp.f32 %v3879_v49  ;;  %v6763_v49 = vld [vmem:[%s10097_s7 + $0x380] sm:$0xff] }
 0xd5c   : > { %v3884_v56 = vpop.permute.xlu1 %3883 }
 0xd5d   : > { %v3889_v58 = vsel %vm665_vm3, %v3884_v56, 0  ;;  %v6747_v56 = vld [vmem:[%s10097_s7 + $0x300] sm:$0xff] }
 0xd66   : > { %v8156_v39 = vpop.eup %8155 }
 0xd67   : > { %v3771_v54 = vmul.f32 %v8156_v39, %v8150_v36  ;;  %v8158_v57 = vpop.eup %8157  ;;  %v6831_v39 = vcombine.low %v6764_v50, %v6772_v52 }
 0xd68   : > { %v3881_v59 = vmul.f32 %v8158_v57, %v8148_v33  ;;  %v6748_v57 = vld [vmem:[%s10097_s7 + $0x308] sm:$0xff] }
 0xd69   : > { %v3772_v25 = vpack.c.bf16 %v3771_v54, %v3771_v54  ;;  %v6832_v54 = vcombine.high %v6764_v50, %v6772_v52  ;;  %v6733_v50 = vld [vmem:[%s10097_s7 + $0x290] sm:$0xff]  ;;  %v6734_v52 = vld [vmem:[%s10097_s7 + $0x298] sm:$0xff] }
 0xd6a   : > { %v3882_v26 = vpack.c.bf16 %v3881_v59, %v3881_v59  ;;  %v6756_v59 = vld [vmem:[%s10097_s7 + $0x348] sm:$0xff] }
 0xd6b   : > { %7743 = vmatmul.mubr.msk.bf16.vlgmr.msra.gmra.mxu1 %vm649_vm4, %v3772_v25  ;;  %4586 = vmatprep.subr.bf16.mxu0 %v6832_v54  ;;  %v6755_v25 = vld [vmem:[%s10097_s7 + $0x340] sm:$0xff]  ;;  %v6815_v60 = vcombine.low %v6748_v57, %v6756_v59 }
 0xd6c   : > { %7753 = vmatpush3.bf16.msra.mxu1 %v3889_v58  ;;  %7754 = vmatprep.mubr.msk.bf16.mxu1 %vm8228_vm1, %v8227_v13  ;;  %v6814_v58 = vcombine.high %v6747_v56, %v6755_v25 }
 0xd73   : > { %7755 = vmatmul.mubr.msk.bf16.vlgmr.msra.gmra.mxu1 %vm649_vm4, %v3882_v26  ;;  %v6813_v26 = vcombine.low %v6747_v56, %v6755_v25 }
 0xd74   : > { %4569 = vmatprep.mubr.bf16.mxu1 %v8226_v2 }
 0xdf6   : > { %v3594_v61 = vpop.f32.mrf.mxu1 }
 0xdf8   : > { %v7720_v62 = vpop.f32.mrf.mxu1 }
 0xdf9   : > { %v6731_v62 = vld [vmem:[%s10097_s7 + $0x280] sm:$0xff] }
 0xdfa   : > { %v3597_v63 = vpop.f32.mrf.mxu1 }
 0xdfb   : > { %v6739_v63 = vld [vmem:[%s10097_s7 + $0x2c0] sm:$0xff] }
 0xdfc   : > { %v7721_v45 = vpop.f32.mrf.mxu1 }
 0xdfd   : > { %v6732_v45 = vld [vmem:[%s10097_s7 + $0x288] sm:$0xff] }
 0xdfe   : > { %v3705_v0 = vpop.f32.mrf.mxu1 }
 0xdff   : > { %3932 = vrot.lane.b32.xlu1 %v3705_v0, %s10132_s17  ;;  %v6798_v0 = vcombine.high %v6731_v62, %v6739_v63  ;;  %s8164_s17 = scalar_lea.vmem %s10051_s26, 16 }
 0xe00   : > { %v7732_v16 = vpop.f32.mrf.mxu1  ;;  %p8165_p11 = scmp.ne.s32.totalorder %s10051_s26, %s8164_s17  ;;  %p8172_p1 = scmp.lt.s32.totalorder %s8170_s29, %s8164_s17 }
 0xe01   : > { %v6740_v16 = vld [vmem:[%s10097_s7 + $0x2c8] sm:$0xff] }
 0xe02   : > { %v3708_v1 = vpop.f32.mrf.mxu1  ;;  %v6800_v3 = vcombine.high %v6732_v45, %v6740_v16  ;;  %p8166_p12 = pnand %p8165_p11, %p8355_p5  ;;  %p8173_p2 = por %p8172_p1, %p8171_p0 }
 0xe03   : > { %v6797_v1 = vcombine.low %v6731_v62, %v6739_v63 }
 0xe04   : > { %v7733_v46 = vpop.f32.mrf.mxu1  ;;  %p8167_p13 = pneg %p8166_p12 }
 0xe05   : > { %v6799_v46 = vcombine.low %v6732_v45, %v6740_v16  ;;  %v6767_v45 = vld [vmem:[%s10097_s7 + $0x3a0] sm:$0xff]  ;;  %v6768_v16 = vld [vmem:[%s10097_s7 + $0x3a8] sm:$0xff] }
 0xe06   : > { %p8174_p3 = pnand %p8173_p2, %p8167_p13 }
 0xe2b   : > { %v3815_v6 = vpop.f32.mrf.mxu1 }
 0xe2c   : > { %3936 = vrot.lane.b32.xlu0 %v3815_v6, %s10130_s30  ;;  %v6716_v6 = vld [vmem:[%s10097_s7 + $0x208] sm:$0xff]  ;;  %s10134_s30 = sld [smem:[#allocation11_spill]] }
 0xe2d   : > { %v7744_v7 = vpop.f32.mrf.mxu1 }
 0xe2e   : > { %v6782_v7 = vcombine.high %v6715_v4, %v6723_v5 }
 0xe2f   : > { %v3818_v8 = vpop.f32.mrf.mxu1 }
 0xe30   : > { %v6724_v8 = vld [vmem:[%s10097_s7 + $0x248] sm:$0xff] }
 0xe31   : > { %v7745_v9 = vpop.f32.mrf.mxu1 }
 0xe32   : > { %v6781_v9 = vcombine.low %v6715_v4, %v6723_v5  ;;  %s10049_s23 = scalar_lea.hbm %s10134_s30, %s7248_s21 }
 0xe33   : > { %v3925_v10 = vpop.f32.mrf.mxu1 }
 0xe34   : > { %3940 = vrot.lane.b32.xlu1 %v3925_v10, %s8232_s16  ;;  %v6783_v10 = vcombine.low %v6716_v6, %v6724_v8  ;;  %s6370_s16 = scalar_lea.sflag [#allocation3], %s483_s27 }
 0xe35   : > { %v7756_v11 = vpop.f32.mrf.mxu1 }
 0xe36   : > { %v6784_v11 = vcombine.high %v6716_v6, %v6724_v8  ;;  %v6751_v6 = vld [vmem:[%s10097_s7 + $0x320] sm:$0xff]  ;;  %v6752_v8 = vld [vmem:[%s10097_s7 + $0x328] sm:$0xff] }
 0xe37   : > { %v3928_v15 = vpop.f32.mrf.mxu1 }
 0xe38   : > { %v6765_v15 = vld [vmem:[%s10097_s7 + $0x390] sm:$0xff] }
 0xe39   : > { %v7757_v18 = vpop.f32.mrf.mxu1 }
 0xe3a   : > { %v6773_v18 = vld [vmem:[%s10097_s7 + $0x3d0] sm:$0xff] }
 0xe71   : > { %v3933_v20 = vpop.permute.xlu1 %3932 }
 0xe72   : > { %v3943_v28 = vsel %vm602_vm2, %v3594_v61, %v3933_v20  ;;  %v6816_v61 = vcombine.high %v6748_v57, %v6756_v59  ;;  %v6766_v20 = vld [vmem:[%s10097_s7 + $0x398] sm:$0xff]  ;;  %v6717_v57 = vld [vmem:[%s10097_s7 + $0x210] sm:$0xff] }
 0xe73   : > { %v6718_v59 = vld [vmem:[%s10097_s7 + $0x218] sm:$0xff] }
 0xe9e   : > { %v3937_v27 = vpop.permute.xlu0 %3936 }
 0xe9f   : > { %v3944_v29 = vsel %vm1053_vm5, %v3943_v28, %v3937_v27  ;;  %v6833_v27 = vcombine.low %v6765_v15, %v6773_v18  ;;  %v6834_v28 = vcombine.high %v6765_v15, %v6773_v18 }
 0xea6   : > { %v3941_v32 = vpop.permute.xlu1 %3940 }
 0xea7   : > { %v3945_v33 = vsel %vm1055_vm6, %v3944_v29, %v3941_v32  ;;  %v6774_v29 = vld [vmem:[%s10097_s7 + $0x3d8] sm:$0xff] }
 0xea8   : > { %v3946_v34 = vpack.c.bf16 %v3945_v33, %v3945_v33  ;;  %v6835_v32 = vcombine.low %v6766_v20, %v6774_v29  ;;  %v6836_v33 = vcombine.high %v6766_v20, %v6774_v29  ;;  %v6735_v20 = vld [vmem:[%s10097_s7 + $0x2a0] sm:$0xff]  ;;  %v6744_v29 = vld [vmem:[%s10097_s7 + $0x2e8] sm:$0xff] }
 0xeaa   : > { %7767 = vmatmul.mubr.msk.bf16.vlgmr.msra.gmra.mxu0 %vm552_vm0, %v3946_v34 }
 0xeab   : > { %4610 = vmatprep.mubr.bf16.mxu0 %v8226_v2  ;;  %4587 = vmatpush1.bf16.msra.mxu0 %v6831_v39 }
 0xeac   : > { %4588 = vmatprep.subr.bf16.mxu0 %v6816_v61 }
 0xeaf   : > { %4589 = vmatpush1.bf16.msra.mxu0 %v6815_v60 }
 0xeb0   : > { %4590 = vmatprep.subr.bf16.mxu0 %v6800_v3 }
 0xeb3   : > { %4591 = vmatpush1.bf16.msra.mxu0 %v6799_v46 }
 0xeb4   : > { %4592 = vmatprep.subr.bf16.mxu0 %v6784_v11 }
 0xeb7   : > { %4593 = vmatpush1.bf16.msra.mxu0 %v6783_v10 }
 0xeb8   : > { %4668 = vmatprep.subr.bf16.mxu0 %v6836_v33 }
 0xf6a   : > { %v4025_v35 = vpop.f32.mrf.mxu0 }
 0xf6b   : > { %v4026_v36 = vadd.f32 %v6705_v12, %v4025_v35 }
 0xf6c   : > { %v7768_v38 = vpop.f32.mrf.mxu0 }
 0xf6d   : > { %v4031_v22 = vadd.f32 %v4026_v36, %v9237_v19  ;;  %v6771_v19 = vld [vmem:[%s10097_s7 + $0x3c0] sm:$0xff] }
 0xf6e   : > { %v4028_v40 = vpop.f32.mrf.mxu0  ;;  %v6830_v51 = vcombine.high %v6763_v49, %v6771_v19  ;;  %v6829_v53 = vcombine.low %v6763_v49, %v6771_v19  ;;  %v6713_v38 = vld [vmem:[%s10095_s5 + $0x1] ss:$0 sm:$0xff] }
 0xf6f   : > { %v4036_v41 = vsel %vm552_vm0, %v4031_v22, 0.0  ;;  %v6714_v40 = vld [vmem:[%s10096_s6 + $0x1] ss:$0 sm:$0xff] }
 0xf70   : > { %4037 = vadd.xlane.f32.xlu0 %v4036_v41  ;;  %v7769_v42 = vpop.f32.mrf.mxu0  ;;  %4545 = vmatprep.subr.bf16.mxu1 %v6830_v51  ;;  %v6741_v51 = vld [vmem:[%s10097_s7 + $0x2d0] sm:$0xff] }
 0xf71   : > { %4546 = vmatpush1.bf16.msra.mxu1 %v6829_v53  ;;  %v6749_v42 = vld [vmem:[%s10097_s7 + $0x310] sm:$0xff]  ;;  %v6742_v53 = vld [vmem:[%s10097_s7 + $0x2d8] sm:$0xff]  ;;  %v6802_v56 = vcombine.high %v6733_v50, %v6741_v51  ;;  %v6801_v60 = vcombine.low %v6733_v50, %v6741_v51 }
 0xf72   : > { %4547 = vmatprep.subr.bf16.mxu1 %v6814_v58  ;;  %v6804_v25 = vcombine.high %v6734_v52, %v6742_v53  ;;  %v6725_v58 = vld [vmem:[%s10097_s7 + $0x250] sm:$0xff]  ;;  %v6803_v61 = vcombine.low %v6734_v52, %v6742_v53 }
 0xf73   : > { %v6786_v62 = vcombine.high %v6717_v57, %v6725_v58  ;;  %v6785_v46 = vcombine.low %v6717_v57, %v6725_v58 }
 0xf75   : > { %4548 = vmatpush1.bf16.msra.mxu1 %v6813_v26  ;;  %v6726_v26 = vld [vmem:[%s10097_s7 + $0x258] sm:$0xff] }
 0xf76   : > { %4549 = vmatprep.subr.bf16.mxu1 %v6798_v0  ;;  %v6788_v63 = vcombine.high %v6718_v59, %v6726_v26  ;;  %v6775_v0 = vld [vmem:[%s10097_s7 + $0x3e0] sm:$0xff]  ;;  %v6787_v3 = vcombine.low %v6718_v59, %v6726_v26 }
 0xf77   : > { %v6838_v4 = vcombine.high %v6767_v45, %v6775_v0  ;;  %v6837_v10 = vcombine.low %v6767_v45, %v6775_v0 }
 0xf79   : > { %4550 = vmatpush1.bf16.msra.mxu1 %v6797_v1  ;;  %v6776_v1 = vld [vmem:[%s10097_s7 + $0x3e8] sm:$0xff] }
 0xf7a   : > { %4551 = vmatprep.subr.bf16.mxu1 %v6782_v7  ;;  %v6840_v5 = vcombine.high %v6768_v16, %v6776_v1  ;;  %v6759_v7 = vld [vmem:[%s10097_s7 + $0x360] sm:$0xff]  ;;  %v6839_v11 = vcombine.low %v6768_v16, %v6776_v1 }
 0xf7b   : > { %v6822_v15 = vcombine.high %v6751_v6, %v6759_v7 }
 0xf7d   : > { %4552 = vmatpush1.bf16.msra.mxu1 %v6781_v9  ;;  %v6760_v9 = vld [vmem:[%s10097_s7 + $0x368] sm:$0xff] }
 0xf7e   : > { %4627 = vmatprep.subr.bf16.mxu1 %v6834_v28  ;;  %v6824_v18 = vcombine.high %v6752_v8, %v6760_v9  ;;  %v6736_v28 = vld [vmem:[%s10097_s7 + $0x2a8] sm:$0xff]  ;;  %v6823_v33 = vcombine.low %v6752_v8, %v6760_v9 }
 0xff9   : > { %v4038_v43 = vpop.xlane.xlu0 %4037 }
 0xffa   : > { %v4039_v44 = vmul.f32 0.015625, %v4038_v43  ;;  %v6757_v43 = vld [vmem:[%s10097_s7 + $0x350] sm:$0xff] }
 0xffb   : > { %v6818_v49 = vcombine.high %v6749_v42, %v6757_v43  ;;  %v6817_v39 = vcombine.low %v6749_v42, %v6757_v43 }
 0xffc   : > { %v9339_v47 = vsub.f32 %v4031_v22, %v4039_v44  ;;  %v6750_v44 = vld [vmem:[%s10097_s7 + $0x318] sm:$0xff] }
 0xffe   : > { %v4041_v48 = vmul.f32 %v9339_v47, %v9339_v47 }
0x1000   : > { %v4042_v37 = vsel %vm552_vm0, %v4041_v48, 0.0 }
0x1001   : > { %4043 = vadd.xlane.f32.xlu1 %v4042_v37 }
0x108a   : > { %v4044_v34 = vpop.xlane.xlu1 %4043 }
0x108b   : > { %v4045_v12 = vmul.f32 0.015625, %v4044_v34 }
0x108d   : > { %v4046_v35 = vadd.f32 1e-05, %v4045_v12  ;;  %v6808_v12 = vcombine.high %v6736_v28, %v6744_v29 }
0x108f   : > { %8159 = vrsqrt.f32 %v4046_v35  ;;  %v6719_v35 = vld [vmem:[%s10097_s7 + $0x220] sm:$0xff] }
0x109c   : > { %v8160_v36 = vpop.eup %8159 }
0x109d   : > { %v4048_v22 = vmul.f32 %v8160_v36, %v9339_v47  ;;  %v6758_v47 = vld [vmem:[%s10097_s7 + $0x358] sm:$0xff]  ;;  %v6727_v36 = vld [vmem:[%s10097_s7 + $0x260] sm:$0xff] }
0x109e   : > { %v6820_v19 = vcombine.high %v6750_v44, %v6758_v47  ;;  %v6819_v54 = vcombine.low %v6750_v44, %v6758_v47  ;;  %v6790_v42 = vcombine.high %v6719_v35, %v6727_v36  ;;  %v6769_v44 = vld [vmem:[%s10097_s7 + $0x3b0] sm:$0xff]  ;;  %v6789_v50 = vcombine.low %v6719_v35, %v6727_v36  ;;  %v8003_v35 = vld [vmem:[%s10099_s9 + $0x460] sm:$0xff]  }
0x109f   : > { %v4055_v41 = vmul.f32 %v6713_v38, %v4048_v22  ;;  %v6720_v38 = vld [vmem:[%s10097_s7 + $0x228] sm:$0xff]  ;;  %v6777_v47 = vld [vmem:[%s10097_s7 + $0x3f0] sm:$0xff]  ;;  %v8004_v36 = vld [vmem:[%s10099_s9 + $0x4e0] sm:$0xff]  }
0x10a0   : > { %v6728_v22 = vld [vmem:[%s10097_s7 + $0x268] sm:$0xff]  ;;  %v6842_v52 = vcombine.high %v6769_v44, %v6777_v47  ;;  %v6841_v57 = vcombine.low %v6769_v44, %v6777_v47  ;;  %v8011_v44 = vld [vmem:[%s10099_s9 + $0x450] sm:$0xff]  }
0x10a1   : > { %v9423_v48 = vadd.f32 %v6714_v40, %v4055_v41  ;;  %v6807_v41 = vcombine.low %v6736_v28, %v6744_v29  ;;  %v6792_v43 = vcombine.high %v6720_v38, %v6728_v22  ;;  %v6791_v51 = vcombine.low %v6720_v38, %v6728_v22  ;;  %v7996_v28 = vld [vmem:[%s10099_s9 + $0x4f0] sm:$0xff]   ;;  %v8005_v38 = vld [vmem:[%s10099_s9 + $0x420] sm:$0xff]  }
0x10a2   : > { %v7997_v29 = vld [vmem:[%s10099_s9 + $0x430] sm:$0xff]   ;;  %v8006_v22 = vld [vmem:[%s10099_s9 + $0x4a0] sm:$0xff]  }
0x10a3   : > { %v9427_v37 = vpack.c.bf16 %v9423_v48, %v9423_v48  ;;  %v8012_v47 = vld [vmem:[%s10099_s9 + $0x4d0] sm:$0xff]  }
0x10a5   : > { %6845 = vmatmul.mubr.msk.bf16.vlgmr.msra.gmra.mxu1 %vm552_vm0, %v9427_v37  ;;  %6846 = vmatmul.mubr.msk.bf16.vlgmr.msra.gmra.mxu0 %vm552_vm0, %v9427_v37 }
0x10a6   : > { %4628 = vmatpush1.bf16.msra.mxu1 %v6833_v27  ;;  %4669 = vmatpush1.bf16.msra.mxu0 %v6835_v32  ;;  %v6743_v27 = vld [vmem:[%s10097_s7 + $0x2e0] sm:$0xff]  ;;  %v6821_v32 = vcombine.low %v6751_v6, %v6759_v7 }
0x10a7   : > { %4629 = vmatprep.subr.bf16.mxu1 %v6818_v49  ;;  %4670 = vmatprep.subr.bf16.mxu0 %v6820_v19  ;;  %v6806_v34 = vcombine.high %v6735_v20, %v6743_v27  ;;  %v6805_v40 = vcombine.low %v6735_v20, %v6743_v27  ;;  %v6770_v49 = vld [vmem:[%s10097_s7 + $0x3b8] sm:$0xff]  ;;  %v7995_v27 = vld [vmem:[%s10099_s9 + $0x470] sm:$0xff]  }
0x10a8   : > { %4651 = vmatprep.mubr.bf16.mxu1 %v8226_v2  ;;  %4692 = vmatprep.mubr.bf16.mxu0 %v8226_v2  ;;  %v6778_v19 = vld [vmem:[%s10097_s7 + $0x3f8] sm:$0xff] }
0x10a9   : > { %v6844_v53 = vcombine.high %v6770_v49, %v6778_v19  ;;  %v6843_v58 = vcombine.low %v6770_v49, %v6778_v19  ;;  %v7994_v20 = vld [vmem:[%s10099_s9 + $0x4b8] sm:$0xff]   ;;  %v8013_v49 = vld [vmem:[%s10099_s9 + $0x410] sm:$0xff]  }
0x10aa   : > { %4630 = vmatpush1.bf16.msra.mxu1 %v6817_v39  ;;  %4671 = vmatpush1.bf16.msra.mxu0 %v6819_v54  ;;  %v6753_v39 = vld [vmem:[%s10097_s7 + $0x330] sm:$0xff] }
0x10ab   : > { %4631 = vmatprep.subr.bf16.mxu1 %v6802_v56  ;;  %4672 = vmatprep.subr.bf16.mxu0 %v6804_v25  ;;  %v6761_v54 = vld [vmem:[%s10097_s7 + $0x370] sm:$0xff]  ;;  %v6754_v56 = vld [vmem:[%s10097_s7 + $0x338] sm:$0xff] }
0x10ac   : > { %v6762_v25 = vld [vmem:[%s10097_s7 + $0x378] sm:$0xff]  ;;  %v6826_v59 = vcombine.high %v6753_v39, %v6761_v54  ;;  %v6825_v45 = vcombine.low %v6753_v39, %v6761_v54  ;;  %v8014_v19 = vld [vmem:[%s10099_s9 + $0x490] sm:$0xff]   ;;  %v8019_v39 = vld [vmem:[%s10099_s9 + $0x440] sm:$0xff]  }
0x10ad   : > { %v6828_v26 = vcombine.high %v6754_v56, %v6762_v25  ;;  %v6827_v0 = vcombine.low %v6754_v56, %v6762_v25  ;;  %v8020_v54 = vld [vmem:[%s10099_s9 + $0x4c0] sm:$0xff]  }
0x10ae   : > { %4632 = vmatpush1.bf16.msra.mxu1 %v6801_v60  ;;  %4673 = vmatpush1.bf16.msra.mxu0 %v6803_v61  ;;  %v6737_v60 = vld [vmem:[%s10097_s7 + $0x2b0] sm:$0xff]  ;;  %v8021_v56 = vld [vmem:[%s10099_s9 + $0x400] sm:$0xff]  }
0x10af   : > { %4633 = vmatprep.subr.bf16.mxu1 %v6786_v62  ;;  %4674 = vmatprep.subr.bf16.mxu0 %v6788_v63  ;;  %v6745_v61 = vld [vmem:[%s10097_s7 + $0x2f0] sm:$0xff]  ;;  %v6738_v62 = vld [vmem:[%s10097_s7 + $0x2b8] sm:$0xff]  ;;  %v8022_v25 = vld [vmem:[%s10099_s9 + $0x480] sm:$0xff]  }
0x10b0   : > { %v6746_v63 = vld [vmem:[%s10097_s7 + $0x2f8] sm:$0xff]  ;;  %v6810_v16 = vcombine.high %v6737_v60, %v6745_v61  ;;  %v6809_v6 = vcombine.low %v6737_v60, %v6745_v61 }
0x10b1   : > { %v6812_v1 = vcombine.high %v6738_v62, %v6746_v63  ;;  %v6811_v7 = vcombine.low %v6738_v62, %v6746_v63 }
0x10b2   : > { %4634 = vmatpush1.bf16.msra.mxu1 %v6785_v46  ;;  %4675 = vmatpush1.bf16.msra.mxu0 %v6787_v3  ;;  %v6721_v46 = vld [vmem:[%s10097_s7 + $0x230] sm:$0xff] }
0x10b3   : > { %4709 = vmatprep.subr.bf16.mxu1 %v6838_v4  ;;  %4750 = vmatprep.subr.bf16.mxu0 %v6840_v5  ;;  %v6729_v3 = vld [vmem:[%s10097_s7 + $0x270] sm:$0xff]  ;;  %v6722_v4 = vld [vmem:[%s10097_s7 + $0x238] sm:$0xff] }
0x10b4   : > { %v6730_v5 = vld [vmem:[%s10097_s7 + $0x278] sm:$0xff]  ;;  %v6794_v8 = vcombine.high %v6721_v46, %v6729_v3 }
0x10b5   : > { %6847 = vmatmul.mubr.msk.bf16.vlgmr.msra.gmra.mxu1 %vm552_vm0, %v9427_v37  ;;  %6848 = vmatmul.mubr.msk.bf16.vlgmr.msra.gmra.mxu0 %vm552_vm0, %v9427_v37  ;;  %v6796_v9 = vcombine.high %v6722_v4, %v6730_v5 }
0x10b6   : > { %4710 = vmatpush1.bf16.msra.mxu1 %v6837_v10  ;;  %4751 = vmatpush1.bf16.msra.mxu0 %v6839_v11  ;;  %v6793_v10 = vcombine.low %v6721_v46, %v6729_v3  ;;  %v6795_v11 = vcombine.low %v6722_v4, %v6730_v5 }
0x10b7   : > { %4711 = vmatprep.subr.bf16.mxu1 %v6822_v15  ;;  %4752 = vmatprep.subr.bf16.mxu0 %v6824_v18  ;;  %v7991_v15 = vld [vmem:[%s10099_s9 + $0x478] sm:$0xff]  }
0x10b8   : > { %4733 = vmatprep.mubr.bf16.mxu1 %v8226_v2  ;;  %4774 = vmatprep.mubr.bf16.mxu0 %v8226_v2  ;;  %v7993_v18 = vld [vmem:[%s10099_s9 + $0x438] sm:$0xff]  }
0x10ba   : > { %4712 = vmatpush1.bf16.msra.mxu1 %v6821_v32  ;;  %4753 = vmatpush1.bf16.msra.mxu0 %v6823_v33  ;;  %v7998_v32 = vld [vmem:[%s10099_s9 + $0x4b0] sm:$0xff]   ;;  %v7999_v33 = vld [vmem:[%s10099_s9 + $0x468] sm:$0xff]  }
0x10bb   : > { %4713 = vmatprep.subr.bf16.mxu1 %v6806_v34  ;;  %4754 = vmatprep.subr.bf16.mxu0 %v6808_v12  ;;  %v8001_v34 = vld [vmem:[%s10099_s9 + $0x428] sm:$0xff]  }
0x10bc   : > { %v8002_v12 = vld [vmem:[%s10099_s9 + $0x4a8] sm:$0xff]  }
0x10be   : > { %4714 = vmatpush1.bf16.msra.mxu1 %v6805_v40  ;;  %4755 = vmatpush1.bf16.msra.mxu0 %v6807_v41  ;;  %v8007_v40 = vld [vmem:[%s10099_s9 + $0x458] sm:$0xff]  }
0x10bf   : > { %4715 = vmatprep.subr.bf16.mxu1 %v6790_v42  ;;  %4756 = vmatprep.subr.bf16.mxu0 %v6792_v43  ;;  %v8008_v41 = vld [vmem:[%s10099_s9 + $0x4d8] sm:$0xff]  }
0x10c0   : > { %v8009_v42 = vld [vmem:[%s10099_s9 + $0x418] sm:$0xff]  }
0x10c1   : > { %v8010_v43 = vld [vmem:[%s10099_s9 + $0x498] sm:$0xff]  }
0x10c2   : > { %4716 = vmatpush1.bf16.msra.mxu1 %v6789_v50  ;;  %4757 = vmatpush1.bf16.msra.mxu0 %v6791_v51  ;;  %v8015_v50 = vld [vmem:[%s10099_s9 + $0x448] sm:$0xff]  }
0x10c3   : > { %4791 = vmatprep.subr.bf16.mxu1 %v6842_v52  ;;  %4832 = vmatprep.subr.bf16.mxu0 %v6844_v53  ;;  %v8016_v51 = vld [vmem:[%s10099_s9 + $0x4c8] sm:$0xff]  }
0x10c4   : > { %v8017_v52 = vld [vmem:[%s10099_s9 + $0x408] sm:$0xff]  }
0x10c5   : > { %6849 = vmatmul.mubr.msk.bf16.vlgmr.msra.gmra.mxu1 %vm552_vm0, %v9427_v37  ;;  %6850 = vmatmul.mubr.msk.bf16.vlgmr.msra.gmra.mxu0 %vm552_vm0, %v9427_v37  ;;  %v8018_v53 = vld [vmem:[%s10099_s9 + $0x488] sm:$0xff]  }
0x10c6   : > { %4792 = vmatpush1.bf16.msra.mxu1 %v6841_v57  ;;  %4833 = vmatpush1.bf16.msra.mxu0 %v6843_v58  ;;  %v8023_v57 = vld [vmem:[%s10099_s9 + $0x578] sm:$0xff]  }
0x10c7   : > { %4793 = vmatprep.subr.bf16.mxu1 %v6826_v59  ;;  %4834 = vmatprep.subr.bf16.mxu0 %v6828_v26  ;;  %v8024_v58 = vld [vmem:[%s10099_s9 + $0x5f8] sm:$0xff]   ;;  %v9676_v59 = vld [vmem:[%s10098_s8 + $0x10] sm:$0xff] }
0x10c8   : > { %4815 = vmatprep.mubr.bf16.mxu1 %v8226_v2  ;;  %4856 = vmatprep.mubr.bf16.mxu0 %v8226_v2  ;;  %v7992_v2 = vld [vmem:[%s10099_s9 + $0x4f8] sm:$0xff]   ;;  %v4137_v26 = vrot.slane %v9676_v59, %v8404_v14  ;;  %v4145_v60 = vrot.slane %v9676_v59, %v8843_v21  ;;  %v4141_v61 = vrot.slane %v9676_v59, %v8422_v23 }
0x10c9   : > { %v4149_v62 = vrot.slane %v9676_v59, %v8851_v24 }
0x10ca   : > { %4794 = vmatpush1.bf16.msra.mxu1 %v6825_v45  ;;  %4835 = vmatpush1.bf16.msra.mxu0 %v6827_v0 }
0x10cb   : > { %4795 = vmatprep.subr.bf16.mxu1 %v6810_v16  ;;  %4836 = vmatprep.subr.bf16.mxu0 %v6812_v1 }
0x10ce   : > { %4796 = vmatpush1.bf16.msra.mxu1 %v6809_v6  ;;  %4837 = vmatpush1.bf16.msra.mxu0 %v6811_v7 }
0x10cf   : > { %4797 = vmatprep.subr.bf16.mxu1 %v6794_v8  ;;  %4838 = vmatprep.subr.bf16.mxu0 %v6796_v9 }
0x10d2   : > { %4798 = vmatpush1.bf16.msra.mxu1 %v6793_v10  ;;  %4839 = vmatpush1.bf16.msra.mxu0 %v6795_v11 }
0x10d3   : > { %7469 = vmatprep.subr.bf16.mxu1 %v7991_v15  ;;  %7491 = vmatprep.subr.bf16.mxu0 %v7992_v2 }
0x10d5   : > { %6851 = vmatmul.mubr.msk.bf16.vlgmr.msra.gmra.mxu1 %vm552_vm0, %v9427_v37  ;;  %6852 = vmatmul.mubr.msk.bf16.vlgmr.msra.gmra.mxu0 %vm552_vm0, %v9427_v37  ;;  %v8000_v37 = vld [vmem:[%s10099_s9 + $0x4e8] sm:$0xff]  }
0x10d6   : > { %7470 = vmatpush3.bf16.msra.mxu1 %v7993_v18  ;;  %7492 = vmatpush3.bf16.msra.mxu0 %v7994_v20  ;;  %v8025_v20 = vld [vmem:[%s10099_s9 + $0x538] sm:$0xff]  }
0x10d7   : > { %7471 = vmatprep.subr.bf16.mxu1 %v7995_v27  ;;  %7493 = vmatprep.subr.bf16.mxu0 %v7996_v28  ;;  %v8026_v27 = vld [vmem:[%s10099_s9 + $0x5b8] sm:$0xff]  }
0x10da   : > { %7472 = vmatpush3.bf16.msra.mxu1 %v7997_v29  ;;  %7494 = vmatpush3.bf16.msra.mxu0 %v7998_v32  ;;  %v8027_v32 = vld [vmem:[%s10099_s9 + $0x570] sm:$0xff]  }
0x10db   : > { %7473 = vmatprep.subr.bf16.mxu1 %v7999_v33  ;;  %7495 = vmatprep.subr.bf16.mxu0 %v8000_v37  ;;  %v8028_v33 = vld [vmem:[%s10099_s9 + $0x5f0] sm:$0xff]  }
0x10dc   : > { %v8029_v37 = vld [vmem:[%s10099_s9 + $0x530] sm:$0xff]  }
0x10de   : > { %7474 = vmatpush3.bf16.msra.mxu1 %v8001_v34  ;;  %7496 = vmatpush3.bf16.msra.mxu0 %v8002_v12  ;;  %v8030_v34 = vld [vmem:[%s10099_s9 + $0x5b0] sm:$0xff]   ;;  %v8031_v12 = vld [vmem:[%s10099_s9 + $0x568] sm:$0xff]  }
0x10df   : > { %7475 = vmatprep.subr.bf16.mxu1 %v8003_v35  ;;  %7497 = vmatprep.subr.bf16.mxu0 %v8004_v36  ;;  %v8032_v35 = vld [vmem:[%s10099_s9 + $0x5e8] sm:$0xff]   ;;  %v4157_v36 = vrot.slane %v9676_v59, %v8880_v17 }
0x10e2   : > { %7476 = vmatpush3.bf16.msra.mxu1 %v8005_v38  ;;  %7498 = vmatpush3.bf16.msra.mxu0 %v8006_v22  ;;  %v4165_v38 = vrot.slane %v9676_v59, %v8883_v55  ;;  %v8033_v22 = vld [vmem:[%s10099_s9 + $0x528] sm:$0xff]  }
0x10e3   : > { %7477 = vmatprep.subr.bf16.mxu1 %v8007_v40  ;;  %7499 = vmatprep.subr.bf16.mxu0 %v8008_v41  ;;  %v8034_v40 = vld [vmem:[%s10099_s9 + $0x5a8] sm:$0xff]  }
0x10e6   : > { %7478 = vmatpush3.bf16.msra.mxu1 %v8009_v42  ;;  %7500 = vmatpush3.bf16.msra.mxu0 %v8010_v43  ;;  %v8035_v43 = vld [vmem:[%s10099_s9 + $0x560] sm:$0xff]  }
0x10e7   : > { %7479 = vmatprep.subr.bf16.mxu1 %v8011_v44  ;;  %7501 = vmatprep.subr.bf16.mxu0 %v8012_v47  ;;  %v8036_v44 = vld [vmem:[%s10099_s9 + $0x5e0] sm:$0xff]  }
0x10ea   : > { %7480 = vmatpush3.bf16.msra.mxu1 %v8013_v49  ;;  %7502 = vmatpush3.bf16.msra.mxu0 %v8014_v19 }
0x10eb   : > { %7481 = vmatprep.subr.bf16.mxu1 %v8015_v50  ;;  %7503 = vmatprep.subr.bf16.mxu0 %v8016_v51  ;;  %v8037_v51 = vld [vmem:[%s10099_s9 + $0x520] sm:$0xff]  }
0x10ee   : > { %7482 = vmatpush3.bf16.msra.mxu1 %v8017_v52  ;;  %7504 = vmatpush3.bf16.msra.mxu0 %v8018_v53  ;;  %v8038_v52 = vld [vmem:[%s10099_s9 + $0x5a0] sm:$0xff]  }
0x10ef   : > { %7483 = vmatprep.subr.bf16.mxu1 %v8019_v39  ;;  %7505 = vmatprep.subr.bf16.mxu0 %v8020_v54  ;;  %v8039_v54 = vld [vmem:[%s10099_s9 + $0x558] sm:$0xff]  }
0x10f2   : > { %7484 = vmatpush3.bf16.msra.mxu1 %v8021_v56  ;;  %7506 = vmatpush3.bf16.msra.mxu0 %v8022_v25  ;;  %v8040_v56 = vld [vmem:[%s10099_s9 + $0x5d8] sm:$0xff]  }
0x10f3   : > { %7513 = vmatprep.subr.bf16.mxu1 %v8023_v57  ;;  %7535 = vmatprep.subr.bf16.mxu0 %v8024_v58 }
0x1165   : > { %v4571_v63 = vpop.f32.mrf.mxu1  ;;  %v4612_v45 = vpop.f32.mrf.mxu0 }
0x1166   : > { %v4572_v0 = vadd.f32 %v4571_v63, %v4137_v26  ;;  %v4613_v16 = vadd.f32 %v4612_v45, %v4145_v60  ;;  %v8042_v63 = vld [vmem:[%s10099_s9 + $0x598] sm:$0xff]   ;;  %v8043_v45 = vld [vmem:[%s10099_s9 + $0x550] sm:$0xff]  }
0x1167   : > { %v4573_v1 = vpop.f32.mrf.mxu1  ;;  %v4614_v46 = vpop.f32.mrf.mxu0 }
0x1168   : > { %v4574_v3 = vadd.f32 %v4573_v1, %v4141_v61  ;;  %v4615_v4 = vadd.f32 %v4614_v46, %v4149_v62  ;;  %v4865_v5 = vmax.f32 %v4572_v0, 0.0  ;;  %v4867_v6 = vmax.f32 %v4613_v16, 0.0  ;;  %v8041_v62 = vld [vmem:[%s10099_s9 + $0x518] sm:$0xff]   ;;  %v8044_v0 = vld [vmem:[%s10099_s9 + $0x5d0] sm:$0xff]  }
0x1169   : > { %v4575_v7 = vpop.f32.mrf.mxu1  ;;  %v4616_v8 = vpop.f32.mrf.mxu0  ;;  %v8045_v16 = vld [vmem:[%s10099_s9 + $0x510] sm:$0xff]   ;;  %v4153_v46 = vrot.slane %v9676_v59, %v8926_v30 }
0x116a   : > { %v4866_v9 = vmax.f32 %v4574_v3, 0.0  ;;  %v4868_v10 = vmax.f32 %v4615_v4, 0.0  ;;  %v4881_v28 = vpack.c.bf16 %v4865_v5, %v4865_v5  ;;  %v4883_v29 = vpack.c.bf16 %v4867_v6, %v4867_v6  ;;  %v8046_v1 = vld [vmem:[%s10099_s9 + $0x590] sm:$0xff]   ;;  %v8047_v4 = vld [vmem:[%s10099_s9 + $0x548] sm:$0xff]   ;;  %v9769_v6 = vld [vmem:[%s10098_s8 + $0x18] sm:$0xff] }
0x116b   : > { %v4576_v11 = vpop.f32.mrf.mxu1  ;;  %v4617_v15 = vpop.f32.mrf.mxu0  ;;  %v4161_v3 = vrot.slane %v9676_v59, %v8929_v31  ;;  %v8048_v5 = vld [vmem:[%s10099_s9 + $0x5c8] sm:$0xff]   ;;  %v4173_v59 = vrot.slane %v9769_v6, %v8422_v23  ;;  %v4181_v7 = vrot.slane %v9769_v6, %v8851_v24  ;;  %v8051_v23 = vld [vmem:[%s10099_s9 + $0x540] sm:$0xff]  }
0x116c   : > { %v4882_v2 = vpack.c.bf16 %v4866_v9, %v4866_v9  ;;  %v4884_v18 = vpack.c.bf16 %v4868_v10, %v4868_v10  ;;  %v8049_v8 = vld [vmem:[%s10099_s9 + $0x508] sm:$0xff]   ;;  %v8052_v24 = vld [vmem:[%s10099_s9 + $0x5c0] sm:$0xff]  }
0x116d   : > { %v8050_v9 = vld [vmem:[%s10099_s9 + $0x588] sm:$0xff]  }
0x116e   : > { %5962 = vmatprep.mubr.bf16.mxu1 %v4882_v2  ;;  %6002 = vmatprep.mubr.bf16.mxu0 %v4884_v18 }
0x116f   : > { %5963 = vmatmul.mubr.bf16.vlgmr.msra.gmra.mxu1 %v4881_v28  ;;  %6003 = vmatmul.mubr.bf16.vlgmr.msra.gmra.mxu0 %v4883_v29  ;;  %v8053_v29 = vld [vmem:[%s10099_s9 + $0x500] sm:$0xff]  }
0x1170   : > { %7514 = vmatpush3.bf16.msra.mxu1 %v8025_v20  ;;  %7536 = vmatpush3.bf16.msra.mxu0 %v8026_v27 }
0x1171   : > { %7515 = vmatprep.subr.bf16.mxu1 %v8027_v32  ;;  %7537 = vmatprep.subr.bf16.mxu0 %v8028_v33  ;;  %v8054_v32 = vld [vmem:[%s10099_s9 + $0x580] sm:$0xff]  }
0x1174   : > { %7516 = vmatpush3.bf16.msra.mxu1 %v8029_v37  ;;  %7538 = vmatpush3.bf16.msra.mxu0 %v8030_v34 }
0x1175   : > { %v4653_v41 = vpop.f32.mrf.mxu1  ;;  %v4694_v42 = vpop.f32.mrf.mxu0  ;;  %7517 = vmatprep.subr.bf16.mxu1 %v8031_v12  ;;  %7539 = vmatprep.subr.bf16.mxu0 %v8032_v35  ;;  %v8055_v35 = vld [vmem:[%s10099_s9 + $0x678] sm:$0xff]  }
0x1176   : > { %v4654_v10 = vadd.f32 %v4653_v41, %v4153_v46  ;;  %v4695_v11 = vadd.f32 %v4694_v42, %v4161_v3  ;;  %v8057_v42 = vld [vmem:[%s10099_s9 + $0x638] sm:$0xff]  }
0x1177   : > { %v4655_v47 = vpop.f32.mrf.mxu1  ;;  %v4696_v49 = vpop.f32.mrf.mxu0  ;;  %v8072_v46 = vld [vmem:[%s10099_s9 + $0x6d8] sm:$0xff]  }
0x1178   : > { %v4656_v19 = vadd.f32 %v4655_v47, %v4157_v36  ;;  %v4697_v50 = vadd.f32 %v4696_v49, %v4165_v38  ;;  %7518 = vmatpush3.bf16.msra.mxu1 %v8033_v22  ;;  %7540 = vmatpush3.bf16.msra.mxu0 %v8034_v40  ;;  %v4869_v33 = vmax.f32 %v4654_v10, 0.0  ;;  %v4871_v37 = vmax.f32 %v4695_v11, 0.0  ;;  %v8056_v36 = vld [vmem:[%s10099_s9 + $0x6f8] sm:$0xff]   ;;  %v8078_v11 = vld [vmem:[%s10099_s9 + $0x690] sm:$0xff]  }
0x1179   : > { %v4657_v53 = vpop.f32.mrf.mxu1  ;;  %v4698_v39 = vpop.f32.mrf.mxu0  ;;  %7519 = vmatprep.subr.bf16.mxu1 %v8035_v43  ;;  %7541 = vmatprep.subr.bf16.mxu0 %v8036_v44  ;;  %v8058_v47 = vld [vmem:[%s10099_s9 + $0x6b8] sm:$0xff]   ;;  %v4169_v10 = vrot.slane %v9769_v6, %v8404_v14  ;;  %v4189_v14 = vrot.slane %v9769_v6, %v8880_v17  ;;  %v8083_v17 = vld [vmem:[%s10099_s9 + $0x640] sm:$0xff]  }
0x117a   : > { %v4870_v25 = vmax.f32 %v4656_v19, 0.0  ;;  %v4872_v57 = vmax.f32 %v4697_v50, 0.0  ;;  %v4885_v43 = vpack.c.bf16 %v4869_v33, %v4869_v33  ;;  %v4887_v44 = vpack.c.bf16 %v4871_v37, %v4871_v37  ;;  %v8059_v19 = vld [vmem:[%s10099_s9 + $0x670] sm:$0xff]   ;;  %v8063_v39 = vld [vmem:[%s10099_s9 + $0x668] sm:$0xff]  }
0x117b   : > { %v4658_v58 = vpop.f32.mrf.mxu1  ;;  %v4699_v26 = vpop.f32.mrf.mxu0  ;;  %v8060_v50 = vld [vmem:[%s10099_s9 + $0x6f0] sm:$0xff]  }
0x117c   : > { %v4886_v60 = vpack.c.bf16 %v4870_v25, %v4870_v25  ;;  %v4888_v61 = vpack.c.bf16 %v4872_v57, %v4872_v57  ;;  %7520 = vmatpush3.bf16.msra.mxu1 %v8037_v51  ;;  %7542 = vmatpush3.bf16.msra.mxu0 %v8038_v52  ;;  %v8061_v52 = vld [vmem:[%s10099_s9 + $0x630] sm:$0xff]   ;;  %v8066_v58 = vld [vmem:[%s10099_s9 + $0x6a8] sm:$0xff]   ;;  %v8067_v26 = vld [vmem:[%s10099_s9 + $0x660] sm:$0xff]  }
0x117d   : > { %7521 = vmatprep.subr.bf16.mxu1 %v8039_v54  ;;  %7543 = vmatprep.subr.bf16.mxu0 %v8040_v56  ;;  %v8062_v53 = vld [vmem:[%s10099_s9 + $0x6b0] sm:$0xff]   ;;  %v8064_v54 = vld [vmem:[%s10099_s9 + $0x6e8] sm:$0xff]  }
0x117e   : > { %6042 = vmatprep.mubr.bf16.mxu1 %v4886_v60  ;;  %6082 = vmatprep.mubr.bf16.mxu0 %v4888_v61  ;;  %v8065_v56 = vld [vmem:[%s10099_s9 + $0x628] sm:$0xff]   ;;  %v8068_v60 = vld [vmem:[%s10099_s9 + $0x6e0] sm:$0xff]  }
0x1180   : > { %7522 = vmatpush3.bf16.msra.mxu1 %v8041_v62  ;;  %7544 = vmatpush3.bf16.msra.mxu0 %v8042_v63  ;;  %v8069_v63 = vld [vmem:[%s10099_s9 + $0x620] sm:$0xff]  }
0x1181   : > { %7523 = vmatprep.subr.bf16.mxu1 %v8043_v45  ;;  %7545 = vmatprep.subr.bf16.mxu0 %v8044_v0 }
0x1184   : > { %7524 = vmatpush3.bf16.msra.mxu1 %v8045_v16  ;;  %7546 = vmatpush3.bf16.msra.mxu0 %v8046_v1  ;;  %v8070_v16 = vld [vmem:[%s10099_s9 + $0x6a0] sm:$0xff]   ;;  %v8071_v1 = vld [vmem:[%s10099_s9 + $0x658] sm:$0xff]  }
0x1185   : > { %v9781_v15 = vpop.f32.mrf.mxu1  ;;  %v9783_v2 = vpop.f32.mrf.mxu0  ;;  %7525 = vmatprep.subr.bf16.mxu1 %v8047_v4  ;;  %7547 = vmatprep.subr.bf16.mxu0 %v8048_v5  ;;  %v8073_v5 = vld [vmem:[%s10099_s9 + $0x618] sm:$0xff]  }
0x1187   : > { %v4737_v18 = vpop.f32.mrf.mxu1  ;;  %v4778_v20 = vpop.f32.mrf.mxu0 }
0x1188   : > { %v4738_v27 = vadd.f32 %v4737_v18, %v4173_v59  ;;  %v4779_v28 = vadd.f32 %v4778_v20, %v4181_v7  ;;  %7526 = vmatpush3.bf16.msra.mxu1 %v8049_v8  ;;  %7548 = vmatpush3.bf16.msra.mxu0 %v8050_v9  ;;  %v8074_v59 = vld [vmem:[%s10099_s9 + $0x698] sm:$0xff]   ;;  %v8075_v7 = vld [vmem:[%s10099_s9 + $0x650] sm:$0xff]   ;;  %v8080_v18 = vld [vmem:[%s10099_s9 + $0x6c8] sm:$0xff]   ;;  %v4197_v20 = vrot.slane %v9769_v6, %v8883_v55 }
0x1189   : > { %v4739_v34 = vpop.f32.mrf.mxu1  ;;  %v4780_v12 = vpop.f32.mrf.mxu0  ;;  %7527 = vmatprep.subr.bf16.mxu1 %v8051_v23  ;;  %7549 = vmatprep.subr.bf16.mxu0 %v8052_v24  ;;  %v8076_v8 = vld [vmem:[%s10099_s9 + $0x6d0] sm:$0xff]   ;;  %v8079_v23 = vld [vmem:[%s10099_s9 + $0x648] sm:$0xff]   ;;  %v4177_v24 = vrot.slane %v9769_v6, %v8843_v21  ;;  %v8084_v55 = vld [vmem:[%s10099_s9 + $0x6c0] sm:$0xff]  }
0x118a   : > { %v4874_v38 = vmax.f32 %v4738_v27, 0.0  ;;  %v4876_v22 = vmax.f32 %v4779_v28, 0.0  ;;  %v8077_v9 = vld [vmem:[%s10099_s9 + $0x610] sm:$0xff]   ;;  %v8081_v27 = vld [vmem:[%s10099_s9 + $0x608] sm:$0xff]   ;;  %v4736_v28 = vadd.f32 %v9781_v15, %v4169_v10  ;;  %v8085_v15 = vld [vmem:[%s10099_s9 + $0x600] sm:$0xff]  }
0x118b   : > { %v4740_v40 = vpop.f32.mrf.mxu1  ;;  %v4781_v41 = vpop.f32.mrf.mxu0  ;;  %v8082_v21 = vld [vmem:[%s10099_s9 + $0x688] sm:$0xff]   ;;  %v8086_v34 = vld [vmem:[%s10099_s9 + $0x680] sm:$0xff]  }
0x118c   : > { %7528 = vmatpush3.bf16.msra.mxu1 %v8053_v29  ;;  %7550 = vmatpush3.bf16.msra.mxu0 %v8054_v32  ;;  %v4890_v49 = vpack.c.bf16 %v4874_v38, %v4874_v38  ;;  %v4892_v51 = vpack.c.bf16 %v4876_v22, %v4876_v22  ;;  %v4777_v29 = vadd.f32 %v9783_v2, %v4177_v24  ;;  %v4873_v37 = vmax.f32 %v4736_v28, 0.0  ;;  %v8087_v2 = vld [vmem:[%s10099_s9 + $0x778] sm:$0xff]   ;;  %v8118_v10 = vld [vmem:[%s10099_s9 + $0x780] sm:$0xff]  }
0x118d   : > { %7557 = vmatprep.subr.bf16.mxu1 %v8055_v35  ;;  %7579 = vmatprep.subr.bf16.mxu0 %v8056_v36  ;;  %v8088_v35 = vld [vmem:[%s10099_s9 + $0x7f8] sm:$0xff]  }
0x118e   : > { %v4875_v12 = vmax.f32 %v4777_v29, 0.0  ;;  %v8089_v22 = vld [vmem:[%s10099_s9 + $0x738] sm:$0xff]   ;;  %v4889_v40 = vpack.c.bf16 %v4873_v37, %v4873_v37 }
0x118f   : > { %6043 = vmatmul.mubr.bf16.vlgmr.msra.gmra.mxu1 %v4885_v43  ;;  %6083 = vmatmul.mubr.bf16.vlgmr.msra.gmra.mxu0 %v4887_v44  ;;  %v8090_v41 = vld [vmem:[%s10099_s9 + $0x7b8] sm:$0xff]   ;;  %v8091_v43 = vld [vmem:[%s10099_s9 + $0x770] sm:$0xff]  }
0x1190   : > { %7558 = vmatpush3.bf16.msra.mxu1 %v8057_v42  ;;  %6122 = vmatprep.mubr.bf16.mxu1 %v4890_v49  ;;  %v4891_v42 = vpack.c.bf16 %v4875_v12, %v4875_v12 }
0x1191   : > { %7580 = vmatpush3.bf16.msra.mxu0 %v8058_v47  ;;  %6162 = vmatprep.mubr.bf16.mxu0 %v4892_v51  ;;  %v8092_v47 = vld [vmem:[%s10099_s9 + $0x7f0] sm:$0xff]   ;;  %v8095_v51 = vld [vmem:[%s10099_s9 + $0x768] sm:$0xff]  }
0x1192   : > { %7559 = vmatprep.subr.bf16.mxu1 %v8059_v19  ;;  %7581 = vmatprep.subr.bf16.mxu0 %v8060_v50  ;;  %v8093_v19 = vld [vmem:[%s10099_s9 + $0x730] sm:$0xff]  }
0x1193   : > { %v8094_v50 = vld [vmem:[%s10099_s9 + $0x7b0] sm:$0xff]  }
0x1194   : > { %7560 = vmatpush3.bf16.msra.mxu1 %v8061_v52  ;;  %v8096_v52 = vld [vmem:[%s10099_s9 + $0x7e8] sm:$0xff]  }
0x1195   : > { %7582 = vmatpush3.bf16.msra.mxu0 %v8062_v53  ;;  %v9830_v25 = vpop.f32.mrf.mxu1  ;;  %v9832_v57 = vpop.f32.mrf.mxu0  ;;  %7561 = vmatprep.subr.bf16.mxu1 %v8063_v39  ;;  %v8097_v53 = vld [vmem:[%s10099_s9 + $0x728] sm:$0xff]  }
0x1196   : > { %7583 = vmatprep.subr.bf16.mxu0 %v8064_v54  ;;  %v8098_v39 = vld [vmem:[%s10099_s9 + $0x7a8] sm:$0xff]   ;;  %v8099_v54 = vld [vmem:[%s10099_s9 + $0x760] sm:$0xff]  }
0x1197   : > { %v4819_v61 = vpop.f32.mrf.mxu1  ;;  %v4860_v62 = vpop.f32.mrf.mxu0 }
0x1198   : > { %7562 = vmatpush3.bf16.msra.mxu1 %v8065_v56  ;;  %v4820_v32 = vadd.f32 %v4819_v61, %v4189_v14  ;;  %v4861_v33 = vadd.f32 %v4860_v62, %v4197_v20  ;;  %v8100_v56 = vld [vmem:[%s10099_s9 + $0x7e0] sm:$0xff]   ;;  %v8104_v61 = vld [vmem:[%s10099_s9 + $0x7d8] sm:$0xff]  }
0x1199   : > { %7584 = vmatpush3.bf16.msra.mxu0 %v8066_v58  ;;  %v4821_v45 = vpop.f32.mrf.mxu1  ;;  %v4862_v0 = vpop.f32.mrf.mxu0  ;;  %7563 = vmatprep.subr.bf16.mxu1 %v8067_v26  ;;  %v8101_v58 = vld [vmem:[%s10099_s9 + $0x720] sm:$0xff]   ;;  %v8105_v62 = vld [vmem:[%s10099_s9 + $0x718] sm:$0xff]  }
0x119a   : > { %7585 = vmatprep.subr.bf16.mxu0 %v8068_v60  ;;  %v4878_v36 = vmax.f32 %v4820_v32, 0.0  ;;  %v4880_v38 = vmax.f32 %v4861_v33, 0.0  ;;  %v8102_v26 = vld [vmem:[%s10099_s9 + $0x7a0] sm:$0xff]   ;;  %v8103_v60 = vld [vmem:[%s10099_s9 + $0x758] sm:$0xff]   ;;  %v8107_v45 = vld [vmem:[%s10099_s9 + $0x750] sm:$0xff]  }
0x119b   : > { %v4822_v3 = vpop.f32.mrf.mxu1  ;;  %v4863_v4 = vpop.f32.mrf.mxu0  ;;  %v8108_v0 = vld [vmem:[%s10099_s9 + $0x7d0] sm:$0xff]   ;;  %v7110_v14 = vld [vmem:[%s10100_s10 + $0x1] ss:$0 sm:$0xff] }
0x119c   : > { %7564 = vmatpush3.bf16.msra.mxu1 %v8069_v63  ;;  %v4894_v44 = vpack.c.bf16 %v4878_v36, %v4878_v36  ;;  %v4896_v49 = vpack.c.bf16 %v4880_v38, %v4880_v38  ;;  %v8106_v63 = vld [vmem:[%s10099_s9 + $0x798] sm:$0xff]   ;;  %v8111_v3 = vld [vmem:[%s10099_s9 + $0x748] sm:$0xff]   ;;  %v4193_v4 = vrot.slane %v9769_v6, %v8929_v31  ;;  %v8115_v31 = vld [vmem:[%s10099_s9 + $0x740] sm:$0xff]  }
0x119d   : > { %7586 = vmatpush3.bf16.msra.mxu0 %v8070_v16  ;;  %7565 = vmatprep.subr.bf16.mxu1 %v8071_v1  ;;  %v8109_v16 = vld [vmem:[%s10099_s9 + $0x710] sm:$0xff]   ;;  %v4185_v1 = vrot.slane %v9769_v6, %v8926_v30  ;;  %v8113_v30 = vld [vmem:[%s10099_s9 + $0x708] sm:$0xff]  }
0x119e   : > { %7587 = vmatprep.subr.bf16.mxu0 %v8072_v46  ;;  %v8110_v46 = vld [vmem:[%s10099_s9 + $0x790] sm:$0xff]   ;;  %v4859_v6 = vadd.f32 %v9832_v57, %v4193_v4 }
0x11a0   : > { %7566 = vmatpush3.bf16.msra.mxu1 %v8073_v5  ;;  %v8112_v5 = vld [vmem:[%s10099_s9 + $0x7c8] sm:$0xff]  }
0x11a1   : > { %7588 = vmatpush3.bf16.msra.mxu0 %v8074_v59  ;;  %7567 = vmatprep.subr.bf16.mxu1 %v8075_v7  ;;  %v4818_v59 = vadd.f32 %v9830_v25, %v4185_v1  ;;  %v8114_v7 = vld [vmem:[%s10099_s9 + $0x788] sm:$0xff]   ;;  %v8117_v25 = vld [vmem:[%s10099_s9 + $0x700] sm:$0xff]  }
0x11a2   : > { %7589 = vmatprep.subr.bf16.mxu0 %v8076_v8  ;;  %v8116_v8 = vld [vmem:[%s10099_s9 + $0x7c0] sm:$0xff]  }
0x11a4   : > { %7568 = vmatpush3.bf16.msra.mxu1 %v8077_v9  ;;  %v4877_v9 = vmax.f32 %v4818_v59, 0.0 }
0x11a5   : > { %7590 = vmatpush3.bf16.msra.mxu0 %v8078_v11  ;;  %7569 = vmatprep.subr.bf16.mxu1 %v8079_v23  ;;  %v4879_v11 = vmax.f32 %v4859_v6, 0.0 }
0x11a6   : > { %7591 = vmatprep.subr.bf16.mxu0 %v8080_v18  ;;  %v4893_v57 = vpack.c.bf16 %v4877_v9, %v4877_v9  ;;  %v8120_v9 = vld [vmem:[%s10103_s13 + $0x10] sm:$0xff]  }
0x11a7   : > { %v4895_v23 = vpack.c.bf16 %v4879_v11, %v4879_v11 }
0x11a8   : > { %7570 = vmatpush3.bf16.msra.mxu1 %v8081_v27 }
0x11a9   : > { %7592 = vmatpush3.bf16.msra.mxu0 %v8082_v21  ;;  %7571 = vmatprep.subr.bf16.mxu1 %v8083_v17 }
0x11aa   : > { %7593 = vmatprep.subr.bf16.mxu0 %v8084_v55 }
0x11ac   : > { %7572 = vmatpush3.bf16.msra.mxu1 %v8085_v15 }
0x11ad   : > { %7594 = vmatpush3.bf16.msra.mxu0 %v8086_v34  ;;  %7601 = vmatprep.subr.bf16.mxu1 %v8087_v2 }
0x11ae   : > { %7623 = vmatprep.subr.bf16.mxu0 %v8088_v35 }
0x11af   : > { %6123 = vmatmul.mubr.bf16.vlgmr.msra.gmra.mxu1 %v4889_v40 }
0x11b0   : > { %6163 = vmatmul.mubr.bf16.vlgmr.msra.gmra.mxu0 %v4891_v42  ;;  %7602 = vmatpush3.bf16.msra.mxu1 %v8089_v22 }
0x11b1   : > { %6202 = vmatprep.mubr.bf16.mxu1 %v4894_v44  ;;  %7624 = vmatpush3.bf16.msra.mxu0 %v8090_v41 }
0x11b2   : > { %6242 = vmatprep.mubr.bf16.mxu0 %v4896_v49  ;;  %7603 = vmatprep.subr.bf16.mxu1 %v8091_v43 }
0x11b3   : > { %7625 = vmatprep.subr.bf16.mxu0 %v8092_v47 }
0x11b4   : > { %7604 = vmatpush3.bf16.msra.mxu1 %v8093_v19 }
0x11b5   : > { %7626 = vmatpush3.bf16.msra.mxu0 %v8094_v50  ;;  %7605 = vmatprep.subr.bf16.mxu1 %v8095_v51 }
0x11b6   : > { %7627 = vmatprep.subr.bf16.mxu0 %v8096_v52 }
0x11b8   : > { %7606 = vmatpush3.bf16.msra.mxu1 %v8097_v53 }
0x11b9   : > { %7628 = vmatpush3.bf16.msra.mxu0 %v8098_v39  ;;  %7607 = vmatprep.subr.bf16.mxu1 %v8099_v54 }
0x11ba   : > { %7629 = vmatprep.subr.bf16.mxu0 %v8100_v56 }
0x11bc   : > { %7608 = vmatpush3.bf16.msra.mxu1 %v8101_v58 }
0x11bd   : > { %7630 = vmatpush3.bf16.msra.mxu0 %v8102_v26  ;;  %7609 = vmatprep.subr.bf16.mxu1 %v8103_v60 }
0x11be   : > { %7631 = vmatprep.subr.bf16.mxu0 %v8104_v61 }
0x11c0   : > { %7610 = vmatpush3.bf16.msra.mxu1 %v8105_v62 }
0x11c1   : > { %7632 = vmatpush3.bf16.msra.mxu0 %v8106_v63  ;;  %7611 = vmatprep.subr.bf16.mxu1 %v8107_v45 }
0x11c2   : > { %7633 = vmatprep.subr.bf16.mxu0 %v8108_v0 }
0x11c4   : > { %7612 = vmatpush3.bf16.msra.mxu1 %v8109_v16 }
0x11c5   : > { %7634 = vmatpush3.bf16.msra.mxu0 %v8110_v46  ;;  %7613 = vmatprep.subr.bf16.mxu1 %v8111_v3 }
0x11c6   : > { %7635 = vmatprep.subr.bf16.mxu0 %v8112_v5 }
0x11c8   : > { %7614 = vmatpush3.bf16.msra.mxu1 %v8113_v30 }
0x11c9   : > { %7636 = vmatpush3.bf16.msra.mxu0 %v8114_v7  ;;  %7615 = vmatprep.subr.bf16.mxu1 %v8115_v31 }
0x11ca   : > { %7637 = vmatprep.subr.bf16.mxu0 %v8116_v8 }
0x11cc   : > { %7616 = vmatpush3.bf16.msra.mxu1 %v8117_v25  ;;  %v8119_v25 = vld [vmem:[%s10103_s13 + $0x18] sm:$0xff]  }
0x11cd   : > { %7638 = vmatpush3.bf16.msra.mxu0 %v8118_v10  ;;  %7770 = vmatprep.subr.bf16.mxu1 %v8227_v13  ;;  %v8122_v10 = vld [vmem:[%s10103_s13] sm:$0xff]  }
0x11cf   : > { %6203 = vmatmul.mubr.bf16.vlgmr.msra.gmra.mxu1 %v4893_v57 }
0x11d0   : > { %6243 = vmatmul.mubr.bf16.vlgmr.msra.gmra.mxu0 %v4895_v23  ;;  %7778 = vmatprep.mubr.msk.bf16.mxu1 %vm8228_vm1, %v8227_v13 }
0x11d1   : > { %7771 = vmatpush3.bf16.msra.mxu1 %v8119_v25 }
0x11d2   : > { %7772 = vmatprep.subr.bf16.mxu1 %v8227_v13 }
0x11d5   : > { %7773 = vmatpush3.bf16.msra.mxu1 %v8120_v9 }
0x11d6   : > { %7774 = vmatprep.subr.bf16.mxu1 %v8227_v13 }
0x122f   : > { %v7485_v24 = vpop.f32.mrf.mxu1  ;;  %v7507_v18 = vpop.f32.mrf.mxu0 }
0x1231   : > { %v7486_v20 = vpop.f32.mrf.mxu1  ;;  %v7508_v27 = vpop.f32.mrf.mxu0 }
0x1232   : > { %v7487_v28 = vadd.f32 %v7486_v20, %v7485_v24  ;;  %v7509_v21 = vadd.f32 %v7508_v27, %v7507_v18  ;;  %v7241_v18 = vld [vmem:[%s10101_s11 + $0x1] ss:$0 sm:$0xff] }
0x1233   : > { %v7488_v17 = vpop.f32.mrf.mxu1  ;;  %v7510_v29 = vpop.f32.mrf.mxu0  ;;  %v7242_v20 = vld [vmem:[%s10102_s12 + $0x1] ss:$0 sm:$0xff] }
0x1234   : > { %v5965_v55 = vadd.f32 %v7487_v28, %v7110_v14 }
0x1235   : > { %v7489_v32 = vpop.f32.mrf.mxu1  ;;  %v7511_v33 = vpop.f32.mrf.mxu0 }
0x1236   : > { %v6005_v15 = vadd.f32 %v7509_v21, %v5965_v55 }
0x124f   : > { %v7529_v37 = vpop.f32.mrf.mxu1  ;;  %v7551_v34 = vpop.f32.mrf.mxu0 }
0x1251   : > { %v7530_v2 = vpop.f32.mrf.mxu1  ;;  %v7552_v12 = vpop.f32.mrf.mxu0 }
0x1252   : > { %v7531_v50 = vadd.f32 %v7530_v2, %v7529_v37  ;;  %v7553_v52 = vadd.f32 %v7552_v12, %v7551_v34  ;;  %v6300_v34 = vld [vmem:[%s10104_s14] sm:$0x1] }
0x1253   : > { %v7532_v35 = vpop.f32.mrf.mxu1  ;;  %v7554_v36 = vpop.f32.mrf.mxu0 }
0x1254   : > { %v6045_v51 = vadd.f32 %v7531_v50, %v6005_v15 }
0x1255   : > { %v7533_v38 = vpop.f32.mrf.mxu1  ;;  %v7555_v22 = vpop.f32.mrf.mxu0 }
0x1256   : > { %v6085_v39 = vadd.f32 %v7553_v52, %v6045_v51 }
0x126f   : > { %v7573_v40 = vpop.f32.mrf.mxu1 }
0x1270   : > { %v7595_v41 = vpop.f32.mrf.mxu0 }
0x1271   : > { %v7574_v42 = vpop.f32.mrf.mxu1 }
0x1272   : > { %v7596_v43 = vpop.f32.mrf.mxu0  ;;  %v7575_v53 = vadd.f32 %v7574_v42, %v7573_v40 }
0x1273   : > { %v7576_v44 = vpop.f32.mrf.mxu1  ;;  %v7597_v58 = vadd.f32 %v7596_v43, %v7595_v41 }
0x1274   : > { %v7598_v47 = vpop.f32.mrf.mxu0  ;;  %v6125_v54 = vadd.f32 %v7575_v53, %v6085_v39 }
0x1275   : > { %v7577_v49 = vpop.f32.mrf.mxu1 }
0x1276   : > { %v7599_v19 = vpop.f32.mrf.mxu0  ;;  %v6165_v61 = vadd.f32 %v7597_v58, %v6125_v54 }
0x128f   : > { %v7617_v56 = vpop.f32.mrf.mxu1 }
0x1290   : > { %v7639_v26 = vpop.f32.mrf.mxu0 }
0x1291   : > { %v7618_v60 = vpop.f32.mrf.mxu1 }
0x1292   : > { %v7619_v62 = vadd.f32 %v7618_v60, %v7617_v56  ;;  %v7640_v63 = vpop.f32.mrf.mxu0 }
0x1293   : > { %v7620_v45 = vpop.f32.mrf.mxu1  ;;  %v7641_v16 = vadd.f32 %v7640_v63, %v7639_v26 }
0x1294   : > { %v6205_v0 = vadd.f32 %v7619_v62, %v6165_v61  ;;  %v7642_v1 = vpop.f32.mrf.mxu0 }
0x1295   : > { %v7621_v46 = vpop.f32.mrf.mxu1 }
0x1296   : > { %v6245_v3 = vadd.f32 %v7641_v16, %v6205_v0  ;;  %v7643_v4 = vpop.f32.mrf.mxu0 }
0x1298   : > { %v6250_v5 = vadd.f32 %v6245_v3, %v9423_v48  ;;  %v8121_v48 = vld [vmem:[%s10103_s13 + $0x8] sm:$0xff]  }
0x1299   : > { %7775 = vmatpush3.bf16.msra.mxu1 %v8121_v48 }
0x129a   : > { %v6255_v30 = vsel %vm552_vm0, %v6250_v5, 0.0  ;;  %7776 = vmatprep.subr.bf16.mxu1 %v8227_v13 }
0x129b   : > { %6256 = vadd.xlane.f32.xlu0 %v6255_v30 }
0x129d   : > { %7777 = vmatpush3.bf16.msra.mxu1 %v8122_v10 }
0x1324   : > { %v6257_v59 = vpop.xlane.xlu0 %6256 }
0x1325   : > { %v6258_v7 = vmul.f32 0.015625, %v6257_v59 }
0x1327   : > { %v6259_v31 = vsub.f32 %v6250_v5, %v6258_v7 }
0x1329   : > { %v6260_v6 = vmul.f32 %v6259_v31, %v6259_v31 }
0x132b   : > { %v6261_v8 = vsel %vm552_vm0, %v6260_v6, 0.0 }
0x132c   : > { %6262 = vadd.xlane.f32.xlu0 %v6261_v8 }
0x13b5   : > { %v6263_v11 = vpop.xlane.xlu0 %6262 }
0x13b6   : > { %v6264_v57 = vmul.f32 0.015625, %v6263_v11 }
0x13b8   : > { %v6265_v23 = vadd.f32 1e-05, %v6264_v57 }
0x13ba   : > { %8161 = vrsqrt.f32 %v6265_v23 }
0x13c7   : > { %v8162_v24 = vpop.eup %8161 }
0x13c8   : > { %v6267_v14 = vmul.f32 %v8162_v24, %v6259_v31 }
0x13ca   : > { %v6274_v27 = vmul.f32 %v7241_v18, %v6267_v14 }
0x13cc   : > { %v6281_v28 = vadd.f32 %v7242_v20, %v6274_v27 }
0x13ce   : > { %v6282_v13 = vsel %vm552_vm0, %v6281_v28, 0.0 }
0x13cf   : > { %v6283_v21 = vrot.slane %v6282_v13, 4 }
0x13d1   : > { %v6284_v17 = vadd.f32 %v6283_v21, %v6282_v13 }
0x13d3   : > { %v6285_v29 = vrot.slane %v6284_v17, 2 }
0x13d5   : > { %v6286_v55 = vadd.f32 %v6285_v29, %v6284_v17 }
0x13d7   : > { %v6287_v32 = vrot.slane %v6286_v55, 1 }
0x13d9   : > { %v6288_v33 = vadd.f32 %v6287_v32, %v6286_v55 }
0x13db   : > { %v6290_v15 = vmul.f32 0.125, %v6288_v33 }
0x13dd   : > { %v6291_v37 = vpack.c.bf16 %v6290_v15, %v6290_v15 }
0x13df   : > { %7779 = vmatmul.mubr.msk.bf16.vlgmr.msra.gmra.mxu1 %vm552_vm0, %v6291_v37 }
0x149f   : > { %v6362_v2 = vpop.f32.mrf.mxu1 }
0x14a0   : > { %v6363_v12 = vadd.f32 %v6362_v2, %v6300_v34 }
0x14a1   : > { %v7780_v35 = vpop.f32.mrf.mxu1 }
0x14a2   : > { %6368 = vst [vmem:[%s484_s15] sm:$0x1] %v6363_v12 }
0x14a3   : > { %v6365_v36 = vpop.f32.mrf.mxu1 }
0x14a4   : > { %8177 = shalt.err (!%p8174_p3)
}
0x14a5   : > { %s8178_s18 = scalar_lea.hbm %s10049_s23, 16  ;;  %s8182_s15 = scalar_lea.hbm %s10134_s30, 32 }
0x14a6   : > { %p8179_p4 = scmp.ne.s32.totalorder %s10049_s23, %s8178_s18  ;;  %p8183_p9 = scmp.lt.s32.totalorder %s10049_s23, %s10134_s30 }
0x14a7   : > { %p8184_p10 = scmp.lt.s32.totalorder %s8182_s15, %s8178_s18 }
0x14a8   : > { %p8180_p7 = pnand %p8179_p4, %p8355_p5 }
0x14a9   : > { %p8185_p11 = por %p8184_p10, %p8183_p9 }
0x14aa   : > { %p8181_p8 = pneg %p8180_p7 }
0x14ac   : > { %p8186_p12 = pnand %p8185_p11, %p8181_p8 }
0x14ae   : > { %8189 = shalt.err (!%p8186_p12)
}
0x14af   : > { %7782 = dma.vmem_to_hbm [thread:$0]  (%p8355_p5), %s10051_s26, 16, %s10049_s23, %s6370_s16   ;;  %v7781_v38 = vpop.f32.mrf.mxu1 }
0x14b0 PF: > { %s10135_s17 = sld [smem:[#allocation7_spill]] }
0x14b1   : > { %s10136_s22 = sld [smem:[#allocation5_spill]] }
0x14b6   : > { %p7788_p13 = scmp.ge.s32.totalorder %s10135_s17, 2 }
0x14b7   : > { %s6394_s29 = sand.u32 1, %s10136_s22  }
0x14b8   : > { %p7785_p0 = pnand %p7788_p13, %p8359_p6  ;;  %s6395_s27 = scalar_lea.sflag [#allocation3], %s6394_s29 }
0x14ba   : > { %p7786_p1 = pneg %p7785_p0 }
0x14bc   : > { %8207 = dma.done.wait (%p7786_p1), %s6395_s27, 16  }
0x14bd   : > { %8209 = vsyncadd (%p7786_p1), %s6395_s27, 4294967280  ;;  %s10138_s21 = sld [smem:[#allocation8_spill]]  ;;  %s10141_s18 = smov %s8216_s19 }
0x14be   : > { %s10139_s15 = sld [smem:[#allocation6_spill]] }
0x14bf   : > { %s10140_s20 = sld [smem:[#allocation9_spill]] }
0x14c3   : > { %p25_p2 = scmp.ge.s32.totalorder %s10138_s21, 4  }
0x14c4   : > { %s10142_s19 = smov %s10139_s15 }
0x14c5   :  { %27 = sbr.rel (!%p25_p2) target bundleno = 5 (0x5), region = 127 }
0x14ca   :  { %6399 = vsyncpa [#allocation3], 1 }
0x14cb   :  { %6401 = vsyncpa [#allocation3 + $0x1], 1 }

</bundles_post_ra>
